<compile_context>
chip_gen: v6e
topology: v6e:2x2x1
jax: 0.10.0
libtpu: 0.0.40
codegen_flags: <defaults>
</compile_context>

<pallas_src>
import math
import jax
import jax.numpy as jnp
from jax.experimental import pallas as pl
from jax.experimental.pallas import tpu as pltpu

EPS = 1e-5          # nn.LayerNorm default
MLP_DIM = 2048      # AttentionLayer.linear1/linear2 default

_WEIGHT_KEYS = ("n1g", "n1b", "wq_t", "bq", "wkv_t", "bkv", "wo_heads", "bo",
                "n2g", "n2b", "w1_t", "b1", "w2_t", "b2")


# ----------------------------- in-kernel math helpers ------------------------

def _layernorm(x, g, b):
    mu = jnp.mean(x, axis=-1, keepdims=True)
    var = jnp.mean((x - mu) ** 2, axis=-1, keepdims=True)
    return (x - mu) * jax.lax.rsqrt(var + EPS) * g + b


def _gelu_tanh(x):
    # TODO(synk): tanh-approximate GELU (EUP tanh); nn.GELU default is exact erf (~1e-3 abs diff).
    c = math.sqrt(2.0 / math.pi)
    return 0.5 * x * (1.0 + jnp.tanh(c * (x + 0.044715 * x * x * x)))


def _bf16_gelu_ok():
    """bf16 EUP/VPU exists on v6e/v7x; on v5e and older bf16 elementwise math only adds converts."""
    try:
        kind = jax.devices()[0].device_kind.lower()
    except Exception:
        return False
    return not any(t in kind for t in ("v2", "v3", "v4", "v5"))


# ----------------------------- the per-layer kernel --------------------------

def make_layer_kernel(nhead, has_query, BN, L, E, gelu_bf16):
    H = nhead
    d = E // H
    rows = BN * L

    def kernel(*refs):
        if has_query:
            (x_ref, q_ref, n1g, n1b, wq_t, bq, wkv_t, bkv, wo_h, bo,
             n2g, n2b, w1_t, b1, w2_t, b2, o_ref) = refs
        else:
            (x_ref, n1g, n1b, wq_t, bq, wkv_t, bkv, wo_h, bo,
             n2g, n2b, w1_t, b1, w2_t, b2, o_ref) = refs
            q_ref = None

        # (BN, L, E) token block -> (rows, E): leading-dim merge (L == 8 sublane tile, free).
        x = x_ref[...].reshape(rows, E)
        x2 = _layernorm(x, n1g[...], n1b[...])                # norm1 (f32)
        x2b = x2.astype(jnp.bfloat16)

        # K/V from the fused (E, 2E) weight; Q from its own (E, E) weight with the 1/sqrt(d)
        # softmax scale folded in at prep time.  Query path projects raw feature2 (un-normed)
        # through the same Q weight and does no wasted K/V work.
        kv = jnp.dot(x2b, wkv_t[...], preferred_element_type=jnp.float32) + bkv[...]
        if has_query:
            q_src = q_ref[...].reshape(rows, E).astype(jnp.bfloat16)
        else:
            q_src = x2b
        q = jnp.dot(q_src, wq_t[...], preferred_element_type=jnp.float32) + bq[...]

        # bf16 operands for all attention MXU dots (f32 accumulation).
        Q3 = q.reshape(BN, L, E).astype(jnp.bfloat16)
        K3 = kv[:, :E].reshape(BN, L, E).astype(jnp.bfloat16)
        V3 = kv[:, E:].reshape(BN, L, E).astype(jnp.bfloat16)

        # Multi-head attention: batched over the BN samples inside each head step (no batch
        # loop); each head's output is folded straight into its slice of the output
        # projection, so there is no head concat and no separate (rows,E) x (E,E) matmul.
        attn = jnp.zeros((rows, E), jnp.float32)
        for h in range(H):                                    # static head loop, H <= 8
            sl = slice(h * d, (h + 1) * d)
            S = jnp.einsum('bld,bmd->blm', Q3[:, :, sl], K3[:, :, sl],
                           preferred_element_type=jnp.float32)        # (BN, L, L)
            S = S - jnp.max(S, axis=-1, keepdims=True)
            P = jnp.exp(S)
            P = P * pl.reciprocal(jnp.sum(P, axis=-1, keepdims=True), approx=True)
            Oh = jnp.einsum('blm,bmd->bld', P.astype(jnp.bfloat16), V3[:, :, sl],
                            preferred_element_type=jnp.float32)        # (BN, L, d)
            attn = attn + jnp.dot(Oh.reshape(rows, d).astype(jnp.bfloat16), wo_h[h],
                                  preferred_element_type=jnp.float32)
        x = x + attn + bo[...]                                # residual (dropout1 == identity)

        # MLP block (dropout / dropout2 == identity).
        x2 = _layernorm(x, n2g[...], n2b[...])                # norm2
        h1 = jnp.dot(x2.astype(jnp.bfloat16), w1_t[...],
                     preferred_element_type=jnp.float32) + b1[...]
        if gelu_bf16:
            h1 = _gelu_tanh(h1.astype(jnp.bfloat16))          # bf16 EUP/VPU (v6e / v7x)
        else:
            h1 = _gelu_tanh(h1).astype(jnp.bfloat16)          # f32 math (v5e has no bf16 EUP)
        y = jnp.dot(h1, w2_t[...], preferred_element_type=jnp.float32) + b2[...]

        o_ref[...] = (x + y).reshape(BN, L, E)

    return kernel


def _pick_block_batch(N, L, target_rows=512):
    """Largest divisor of N with BN*L <= target_rows (big tiles amortize the ~0.35us/step
    overhead); prefer >= 2 grid steps (pipelining + megacore on v7x) only if each step would
    still see >= 128 rows."""
    divs = [dd for dd in range(1, N + 1) if N % dd == 0]
    fits = [dd for dd in divs if dd * L <= target_rows]
    bn = max(fits) if fits else 1
    if N // bn < 2:
        alt = [dd for dd in divs if dd < bn and dd * L >= 128]
        if alt:
            bn = max(alt)
    return bn


def run_layer(x3d, q3d, p, nhead, N, L, E, gelu_bf16):
    """x3d / q3d: (N, L, E) f32 batch-major token tensors (q3d may be None)."""
    has_query = q3d is not None
    BN = _pick_block_batch(N, L)
    kernel = make_layer_kernel(nhead, has_query, BN, L, E, gelu_bf16)
    mlp = p["w1_t"].shape[1]

    # TODO(synk): with E=32 the token tiles are 32/128 lane-sparse; packing (L, E) into a
    # dense 256-lane slab would need an in-kernel lane<->sublane reshape whose Mosaic
    # lowering is shape-fragile, so it is left as-is (weights dominate HBM traffic here).
    tok_spec = pl.BlockSpec((BN, L, E), lambda n: (n, 0, 0))

    def wspec(w):
        nd = w.ndim
        return pl.BlockSpec(w.shape, (lambda n: (0,) * nd))   # VMEM-resident across steps

    weight_args = [p[k] for k in _WEIGHT_KEYS]
    in_args = [x3d] + ([q3d] if has_query else []) + weight_args
    in_specs = ([tok_spec] + ([tok_spec] if has_query else [])
                + [wspec(w) for w in weight_args])
    # TODO(synk): constant-index weight specs are still double-buffered by default;
    # pipeline_mode=pl.Buffered(1) would halve their VMEM footprint (matters most on v7x).

    # Scheduler hint so XLA can overlap surrounding ops with the kernel.
    flops = 2 * N * L * (4 * E * E + 2 * E * mlp) + 4 * N * L * L * E
    transcendentals = N * L * mlp + N * nhead * L * L
    weight_bytes = sum(int(w.nbytes) for w in weight_args)
    io_bytes = (2 + (1 if has_query else 0)) * N * L * E * 4
    cost = pl.CostEstimate(flops=int(flops), transcendentals=int(transcendentals),
                           bytes_accessed=int(weight_bytes + io_bytes))

    # VMEM budget: resident weights (x2 for default double-buffering) + double-buffered token
    # blocks + f32/bf16 intermediates.  Floor 32 MiB (lifts v5e's 16 MiB default scoped
    # limit), ceiling 48 MiB so the 64 MiB-VMEM v7x keeps internal-scratch headroom.
    block_bytes = (2 + (2 if has_query else 0) + 2) * BN * L * E * 4
    interm_bytes = BN * L * (16 * E + 6 * mlp)
    vmem_limit = int(min(48 << 20,
                         max(32 << 20, 2 * weight_bytes + block_bytes + 2 * interm_bytes)))

    return pl.pallas_call(
        kernel,
        out_shape=jax.ShapeDtypeStruct((N, L, E), jnp.float32),
        grid=(N // BN,),
        in_specs=in_specs,
        out_specs=tok_spec,
        compiler_params=pltpu.CompilerParams(
            dimension_semantics=("parallel",),        # batch blocks independent -> megacore
            vmem_limit_bytes=vmem_limit),
        cost_estimate=cost,
    )(*in_args)


# ----------------------------- parameters & wrapper --------------------------

def init_params(key, E, n_layers=4, mlp=MLP_DIM):
    """Deterministic synthetic parameters (same shapes as the PyTorch module), pre-packed for
    the kernel: Q weight with 1/sqrt(d) folded in, fused (E, 2E) K/V weight, per-head-stacked
    output-projection weight (nhead, d, E), all Linear weights pre-transposed to (in, out)
    and cast to bf16 (f32 MXU accumulation)."""
    def u(k, shape, scale):
        return jax.random.uniform(k, shape, jnp.float32, -1.0, 1.0) * scale

    params = []
    for i in range(n_layers):
        nhead = 2 ** min(3, i)
        d = E // nhead
        scale = 1.0 / math.sqrt(d)
        ks = jax.random.split(jax.random.fold_in(key, i), 12)
        wq = u(ks[0], (E, E), 1.0 / math.sqrt(E))             # torch Linear: (out, in)
        wk = u(ks[1], (E, E), 1.0 / math.sqrt(E))
        wv = u(ks[2], (E, E), 1.0 / math.sqrt(E))
        bq, bk, bv = u(ks[3], (1, E), 0.1), u(ks[4], (1, E), 0.1), u(ks[5], (1, E), 0.1)
        wo = u(ks[6], (E, E), 1.0 / math.sqrt(E))
        w1 = u(ks[8], (mlp, E), 1.0 / math.sqrt(E))           # linear1: (mlp_dim, E)
        w2 = u(ks[10], (E, mlp), 1.0 / math.sqrt(mlp))        # linear2: (E, mlp_dim)
        params.append(dict(
            nhead=nhead,
            wq_t=(wq.T * scale).astype(jnp.bfloat16),
            bq=bq * scale,
            wkv_t=jnp.concatenate([wk.T, wv.T], axis=1).astype(jnp.bfloat16),
            bkv=jnp.concatenate([bk, bv], axis=1),
            wo_heads=wo.T.reshape(nhead, d, E).astype(jnp.bfloat16),
            bo=u(ks[7], (1, E), 0.1),
            w1_t=w1.T.astype(jnp.bfloat16), b1=u(ks[9], (1, mlp), 0.1),
            w2_t=w2.T.astype(jnp.bfloat16), b2=u(ks[11], (1, E), 0.1),
            n1g=jnp.ones((1, E), jnp.float32), n1b=jnp.zeros((1, E), jnp.float32),
            n2g=jnp.ones((1, E), jnp.float32), n2b=jnp.zeros((1, E), jnp.float32),
        ))
    return params


def transformer_forward(feature1, feature2, params, *, batch_major=True):
    """feature1/feature2: (N, L, E) batch-major f32 by default (keeps features batch-major
    upstream so no wrapper transposes are needed).  Pass batch_major=False for PyTorch's
    seq-major (L, N, E) layout; that costs one transpose each way."""
    if not batch_major:
        feature1 = jnp.transpose(feature1, (1, 0, 2))
        feature2 = None if feature2 is None else jnp.transpose(feature2, (1, 0, 2))
    N, L, E = feature1.shape
    gelu_bf16 = _bf16_gelu_ok()

    # PyTorch quirk kept faithfully: Transformer.forward feeds the ORIGINAL feature1 to every
    # layer and returns only the LAST layer's output -> layers 0..n-2 are dead work; execute
    # only the final layer (bit-identical output, no wasted kernel launches / weight DMA).
    i = len(params) - 1
    out = run_layer(feature1, feature2, params[i], params[i]["nhead"], N, L, E, gelu_bf16)
    return out if batch_major else jnp.transpose(out, (1, 0, 2))


# ----------------------------- demo ------------------------------------------

if __name__ == "__main__":
    key = jax.random.PRNGKey(0)
    in_dim = 32    # embed dim, divisible by the max nhead (8)
    N, L = 2, 8    # batch, sequence length
    n_layers = 4

    params = init_params(key, in_dim, n_layers=n_layers)
    feature1 = jax.random.normal(jax.random.fold_in(key, 1000), (N, L, in_dim), jnp.float32)

    out = transformer_forward(feature1, None, params)
    out = jax.block_until_ready(out)
    assert out.shape == (N, L, in_dim) and out.dtype == jnp.float32
    print("KERNEL_OK")
</pallas_src>

<mosaic_0001>
module attributes {stable_mosaic.version = 11 : i64} {
  func.func @kernel(%arg0: i32, %arg1: memref<2x8x32xf32, #tpu.memory_space<vmem>>, %arg2: memref<1x32xf32, #tpu.memory_space<vmem>>, %arg3: memref<1x32xf32, #tpu.memory_space<vmem>>, %arg4: memref<32x32xbf16, #tpu.memory_space<vmem>>, %arg5: memref<1x32xf32, #tpu.memory_space<vmem>>, %arg6: memref<32x64xbf16, #tpu.memory_space<vmem>>, %arg7: memref<1x64xf32, #tpu.memory_space<vmem>>, %arg8: memref<8x4x32xbf16, #tpu.memory_space<vmem>>, %arg9: memref<1x32xf32, #tpu.memory_space<vmem>>, %arg10: memref<1x32xf32, #tpu.memory_space<vmem>>, %arg11: memref<1x32xf32, #tpu.memory_space<vmem>>, %arg12: memref<32x2048xbf16, #tpu.memory_space<vmem>>, %arg13: memref<1x2048xf32, #tpu.memory_space<vmem>>, %arg14: memref<2048x32xbf16, #tpu.memory_space<vmem>>, %arg15: memref<1x32xf32, #tpu.memory_space<vmem>>, %arg16: memref<2x8x32xf32, #tpu.memory_space<vmem>>) attributes {dimension_semantics = [#tpu.dimension_semantics<parallel>], iteration_bounds = array<i64: 1>, scalar_prefetch = 0 : i64, scratch_operands = 0 : i64, tpu.core_type = #tpu.core_type<tc>, window_params = [{transform_indices = @transform_0, window_bounds = array<i64: 2, 8, 32>}, {pipeline_mode = #tpu.pipeline_mode<synchronous>, transform_indices = @transform_1, window_bounds = array<i64: 1, 32>}, {pipeline_mode = #tpu.pipeline_mode<synchronous>, transform_indices = @transform_2, window_bounds = array<i64: 1, 32>}, {pipeline_mode = #tpu.pipeline_mode<synchronous>, transform_indices = @transform_3, window_bounds = array<i64: 32, 32>}, {pipeline_mode = #tpu.pipeline_mode<synchronous>, transform_indices = @transform_4, window_bounds = array<i64: 1, 32>}, {pipeline_mode = #tpu.pipeline_mode<synchronous>, transform_indices = @transform_5, window_bounds = array<i64: 32, 64>}, {pipeline_mode = #tpu.pipeline_mode<synchronous>, transform_indices = @transform_6, window_bounds = array<i64: 1, 64>}, {pipeline_mode = #tpu.pipeline_mode<synchronous>, transform_indices = @transform_7, window_bounds = array<i64: 8, 4, 32>}, {pipeline_mode = #tpu.pipeline_mode<synchronous>, transform_indices = @transform_8, window_bounds = array<i64: 1, 32>}, {pipeline_mode = #tpu.pipeline_mode<synchronous>, transform_indices = @transform_9, window_bounds = array<i64: 1, 32>}, {pipeline_mode = #tpu.pipeline_mode<synchronous>, transform_indices = @transform_10, window_bounds = array<i64: 1, 32>}, {pipeline_mode = #tpu.pipeline_mode<synchronous>, transform_indices = @transform_11, window_bounds = array<i64: 32, 2048>}, {pipeline_mode = #tpu.pipeline_mode<synchronous>, transform_indices = @transform_12, window_bounds = array<i64: 1, 2048>}, {pipeline_mode = #tpu.pipeline_mode<synchronous>, transform_indices = @transform_13, window_bounds = array<i64: 2048, 32>}, {pipeline_mode = #tpu.pipeline_mode<synchronous>, transform_indices = @transform_14, window_bounds = array<i64: 1, 32>}, {transform_indices = @transform_15, window_bounds = array<i64: 2, 8, 32>}]} {
    %c0 = arith.constant 0 : index
    %c0_0 = arith.constant 0 : index
    %c0_1 = arith.constant 0 : index
    %0 = vector.load %arg1[%c0, %c0_0, %c0_1] : memref<2x8x32xf32, #tpu.memory_space<vmem>>, vector<2x8x32xf32>
    %1 = vector.shape_cast %0 : vector<2x8x32xf32> to vector<16x32xf32>
    %c0_2 = arith.constant 0 : index
    %c0_3 = arith.constant 0 : index
    %2 = vector.load %arg2[%c0_2, %c0_3] : memref<1x32xf32, #tpu.memory_space<vmem>>, vector<1x32xf32>
    %c0_4 = arith.constant 0 : index
    %c0_5 = arith.constant 0 : index
    %3 = vector.load %arg3[%c0_4, %c0_5] : memref<1x32xf32, #tpu.memory_space<vmem>>, vector<1x32xf32>
    %cst = arith.constant dense<0.000000e+00> : vector<16xf32>
    %4 = vector.multi_reduction <add>, %1, %cst [1] : vector<16x32xf32> to vector<16xf32>
    %5 = vector.shape_cast %4 : vector<16xf32> to vector<16x1xf32>
    %cst_6 = arith.constant 3.200000e+01 : f32
    %6 = vector.broadcast %cst_6 : f32 to vector<16x1xf32>
    %7 = arith.divf %5, %6 : vector<16x1xf32>
    %8 = vector.broadcast %7 : vector<16x1xf32> to vector<16x32xf32>
    %9 = arith.subf %1, %8 : vector<16x32xf32>
    %10 = arith.mulf %9, %9 : vector<16x32xf32>
    %cst_7 = arith.constant dense<0.000000e+00> : vector<16xf32>
    %11 = vector.multi_reduction <add>, %10, %cst_7 [1] : vector<16x32xf32> to vector<16xf32>
    %12 = vector.shape_cast %11 : vector<16xf32> to vector<16x1xf32>
    %cst_8 = arith.constant 3.200000e+01 : f32
    %13 = vector.broadcast %cst_8 : f32 to vector<16x1xf32>
    %14 = arith.divf %12, %13 : vector<16x1xf32>
    %15 = vector.broadcast %7 : vector<16x1xf32> to vector<16x32xf32>
    %16 = arith.subf %1, %15 : vector<16x32xf32>
    %cst_9 = arith.constant 9.99999974E-6 : f32
    %17 = vector.broadcast %cst_9 : f32 to vector<16x1xf32>
    %18 = arith.addf %14, %17 : vector<16x1xf32>
    %19 = math.rsqrt %18 : vector<16x1xf32>
    %20 = vector.broadcast %19 : vector<16x1xf32> to vector<16x32xf32>
    %21 = arith.mulf %16, %20 : vector<16x32xf32>
    %22 = vector.broadcast %2 : vector<1x32xf32> to vector<16x32xf32>
    %23 = arith.mulf %21, %22 : vector<16x32xf32>
    %24 = vector.broadcast %3 : vector<1x32xf32> to vector<16x32xf32>
    %25 = arith.addf %23, %24 : vector<16x32xf32>
    %26 = arith.truncf %25 : vector<16x32xf32> to vector<16x32xbf16>
    %c0_10 = arith.constant 0 : index
    %c0_11 = arith.constant 0 : index
    %27 = vector.load %arg6[%c0_10, %c0_11] : memref<32x64xbf16, #tpu.memory_space<vmem>>, vector<32x64xbf16>
    %cst_12 = arith.constant dense<0.000000e+00> : vector<16x64xf32>
    %28 = tpu.matmul %26, %27, %cst_12 {dimension_numbers = #tpu.dot_dimension_numbers<[1], [0], [0], [1], [0, 0, 1, 1], [], []>} : vector<16x32xbf16>, vector<32x64xbf16>, vector<16x64xf32> -> vector<16x64xf32>
    %c0_13 = arith.constant 0 : index
    %c0_14 = arith.constant 0 : index
    %29 = vector.load %arg7[%c0_13, %c0_14] : memref<1x64xf32, #tpu.memory_space<vmem>>, vector<1x64xf32>
    %30 = vector.broadcast %29 : vector<1x64xf32> to vector<16x64xf32>
    %31 = arith.addf %28, %30 : vector<16x64xf32>
    %c0_15 = arith.constant 0 : index
    %c0_16 = arith.constant 0 : index
    %32 = vector.load %arg4[%c0_15, %c0_16] : memref<32x32xbf16, #tpu.memory_space<vmem>>, vector<32x32xbf16>
    %cst_17 = arith.constant dense<0.000000e+00> : vector<16x32xf32>
    %33 = tpu.matmul %26, %32, %cst_17 {dimension_numbers = #tpu.dot_dimension_numbers<[1], [0], [0], [1], [0, 0, 1, 1], [], []>} : vector<16x32xbf16>, vector<32x32xbf16>, vector<16x32xf32> -> vector<16x32xf32>
    %c0_18 = arith.constant 0 : index
    %c0_19 = arith.constant 0 : index
    %34 = vector.load %arg5[%c0_18, %c0_19] : memref<1x32xf32, #tpu.memory_space<vmem>>, vector<1x32xf32>
    %35 = vector.broadcast %34 : vector<1x32xf32> to vector<16x32xf32>
    %36 = arith.addf %33, %35 : vector<16x32xf32>
    %37 = vector.shape_cast %36 : vector<16x32xf32> to vector<2x8x32xf32>
    %38 = arith.truncf %37 : vector<2x8x32xf32> to vector<2x8x32xbf16>
    %39 = vector.extract_strided_slice %31 {offsets = [0, 0], sizes = [16, 32], strides = [1, 1]} : vector<16x64xf32> to vector<16x32xf32>
    %40 = vector.shape_cast %39 : vector<16x32xf32> to vector<2x8x32xf32>
    %41 = arith.truncf %40 : vector<2x8x32xf32> to vector<2x8x32xbf16>
    %42 = vector.extract_strided_slice %31 {offsets = [0, 32], sizes = [16, 32], strides = [1, 1]} : vector<16x64xf32> to vector<16x32xf32>
    %43 = vector.shape_cast %42 : vector<16x32xf32> to vector<2x8x32xf32>
    %44 = arith.truncf %43 : vector<2x8x32xf32> to vector<2x8x32xbf16>
    %cst_20 = arith.constant 0.000000e+00 : f32
    %45 = vector.broadcast %cst_20 : f32 to vector<16x32xf32>
    %46 = vector.extract_strided_slice %38 {offsets = [0, 0, 0], sizes = [2, 8, 4], strides = [1, 1, 1]} : vector<2x8x32xbf16> to vector<2x8x4xbf16>
    %47 = vector.extract_strided_slice %41 {offsets = [0, 0, 0], sizes = [2, 8, 4], strides = [1, 1, 1]} : vector<2x8x32xbf16> to vector<2x8x4xbf16>
    "tpu.trace_start"() <{level = 10 : i32, message = "bld,bmd->blm"}> : () -> ()
    %cst_21 = arith.constant dense<0.000000e+00> : vector<2x8x8xf32>
    %48 = tpu.matmul %46, %47, %cst_21 {dimension_numbers = #tpu.dot_dimension_numbers<[2], [2], [1], [1], [0, 0, 0, 1, 1, 1], [0], [0]>} : vector<2x8x4xbf16>, vector<2x8x4xbf16>, vector<2x8x8xf32> -> vector<2x8x8xf32>
    "tpu.trace_stop"() : () -> ()
    %cst_22 = arith.constant dense<0xFF800000> : vector<2x8xf32>
    %49 = vector.multi_reduction <maximumf>, %48, %cst_22 [2] : vector<2x8x8xf32> to vector<2x8xf32>
    %50 = vector.shape_cast %49 : vector<2x8xf32> to vector<2x8x1xf32>
    %51 = vector.broadcast %50 : vector<2x8x1xf32> to vector<2x8x8xf32>
    %52 = arith.subf %48, %51 : vector<2x8x8xf32>
    %53 = math.exp %52 : vector<2x8x8xf32>
    %cst_23 = arith.constant dense<0.000000e+00> : vector<2x8xf32>
    %54 = vector.multi_reduction <add>, %53, %cst_23 [2] : vector<2x8x8xf32> to vector<2x8xf32>
    %55 = vector.shape_cast %54 : vector<2x8xf32> to vector<2x8x1xf32>
    %56 = tpu.reciprocal %55 {approx = true} : vector<2x8x1xf32> -> vector<2x8x1xf32>
    %57 = vector.broadcast %56 : vector<2x8x1xf32> to vector<2x8x8xf32>
    %58 = arith.mulf %53, %57 : vector<2x8x8xf32>
    %59 = arith.truncf %58 : vector<2x8x8xf32> to vector<2x8x8xbf16>
    %60 = vector.extract_strided_slice %44 {offsets = [0, 0, 0], sizes = [2, 8, 4], strides = [1, 1, 1]} : vector<2x8x32xbf16> to vector<2x8x4xbf16>
    "tpu.trace_start"() <{level = 10 : i32, message = "blm,bmd->bld"}> : () -> ()
    %cst_24 = arith.constant dense<0.000000e+00> : vector<2x8x4xf32>
    %61 = tpu.matmul %59, %60, %cst_24 {dimension_numbers = #tpu.dot_dimension_numbers<[2], [1], [1], [2], [0, 0, 0, 1, 1, 2], [0], [0]>} : vector<2x8x8xbf16>, vector<2x8x4xbf16>, vector<2x8x4xf32> -> vector<2x8x4xf32>
    "tpu.trace_stop"() : () -> ()
    %62 = vector.shape_cast %61 : vector<2x8x4xf32> to vector<16x4xf32>
    %63 = arith.truncf %62 : vector<16x4xf32> to vector<16x4xbf16>
    %c0_25 = arith.constant 0 : index
    %c0_26 = arith.constant 0 : index
    %c0_27 = arith.constant 0 : index
    %64 = vector.load %arg8[%c0_25, %c0_26, %c0_27] : memref<8x4x32xbf16, #tpu.memory_space<vmem>>, vector<1x4x32xbf16>
    %65 = vector.shape_cast %64 : vector<1x4x32xbf16> to vector<4x32xbf16>
    %cst_28 = arith.constant dense<0.000000e+00> : vector<16x32xf32>
    %66 = tpu.matmul %63, %65, %cst_28 {dimension_numbers = #tpu.dot_dimension_numbers<[1], [0], [0], [1], [0, 0, 1, 1], [], []>} : vector<16x4xbf16>, vector<4x32xbf16>, vector<16x32xf32> -> vector<16x32xf32>
    %67 = arith.addf %45, %66 : vector<16x32xf32>
    %68 = vector.extract_strided_slice %38 {offsets = [0, 0, 4], sizes = [2, 8, 4], strides = [1, 1, 1]} : vector<2x8x32xbf16> to vector<2x8x4xbf16>
    %69 = vector.extract_strided_slice %41 {offsets = [0, 0, 4], sizes = [2, 8, 4], strides = [1, 1, 1]} : vector<2x8x32xbf16> to vector<2x8x4xbf16>
    "tpu.trace_start"() <{level = 10 : i32, message = "bld,bmd->blm"}> : () -> ()
    %cst_29 = arith.constant dense<0.000000e+00> : vector<2x8x8xf32>
    %70 = tpu.matmul %68, %69, %cst_29 {dimension_numbers = #tpu.dot_dimension_numbers<[2], [2], [1], [1], [0, 0, 0, 1, 1, 1], [0], [0]>} : vector<2x8x4xbf16>, vector<2x8x4xbf16>, vector<2x8x8xf32> -> vector<2x8x8xf32>
    "tpu.trace_stop"() : () -> ()
    %cst_30 = arith.constant dense<0xFF800000> : vector<2x8xf32>
    %71 = vector.multi_reduction <maximumf>, %70, %cst_30 [2] : vector<2x8x8xf32> to vector<2x8xf32>
    %72 = vector.shape_cast %71 : vector<2x8xf32> to vector<2x8x1xf32>
    %73 = vector.broadcast %72 : vector<2x8x1xf32> to vector<2x8x8xf32>
    %74 = arith.subf %70, %73 : vector<2x8x8xf32>
    %75 = math.exp %74 : vector<2x8x8xf32>
    %cst_31 = arith.constant dense<0.000000e+00> : vector<2x8xf32>
    %76 = vector.multi_reduction <add>, %75, %cst_31 [2] : vector<2x8x8xf32> to vector<2x8xf32>
    %77 = vector.shape_cast %76 : vector<2x8xf32> to vector<2x8x1xf32>
    %78 = tpu.reciprocal %77 {approx = true} : vector<2x8x1xf32> -> vector<2x8x1xf32>
    %79 = vector.broadcast %78 : vector<2x8x1xf32> to vector<2x8x8xf32>
    %80 = arith.mulf %75, %79 : vector<2x8x8xf32>
    %81 = arith.truncf %80 : vector<2x8x8xf32> to vector<2x8x8xbf16>
    %82 = vector.extract_strided_slice %44 {offsets = [0, 0, 4], sizes = [2, 8, 4], strides = [1, 1, 1]} : vector<2x8x32xbf16> to vector<2x8x4xbf16>
    "tpu.trace_start"() <{level = 10 : i32, message = "blm,bmd->bld"}> : () -> ()
    %cst_32 = arith.constant dense<0.000000e+00> : vector<2x8x4xf32>
    %83 = tpu.matmul %81, %82, %cst_32 {dimension_numbers = #tpu.dot_dimension_numbers<[2], [1], [1], [2], [0, 0, 0, 1, 1, 2], [0], [0]>} : vector<2x8x8xbf16>, vector<2x8x4xbf16>, vector<2x8x4xf32> -> vector<2x8x4xf32>
    "tpu.trace_stop"() : () -> ()
    %84 = vector.shape_cast %83 : vector<2x8x4xf32> to vector<16x4xf32>
    %85 = arith.truncf %84 : vector<16x4xf32> to vector<16x4xbf16>
    %c1 = arith.constant 1 : index
    %c0_33 = arith.constant 0 : index
    %c0_34 = arith.constant 0 : index
    %86 = vector.load %arg8[%c1, %c0_33, %c0_34] : memref<8x4x32xbf16, #tpu.memory_space<vmem>>, vector<1x4x32xbf16>
    %87 = vector.shape_cast %86 : vector<1x4x32xbf16> to vector<4x32xbf16>
    %cst_35 = arith.constant dense<0.000000e+00> : vector<16x32xf32>
    %88 = tpu.matmul %85, %87, %cst_35 {dimension_numbers = #tpu.dot_dimension_numbers<[1], [0], [0], [1], [0, 0, 1, 1], [], []>} : vector<16x4xbf16>, vector<4x32xbf16>, vector<16x32xf32> -> vector<16x32xf32>
    %89 = arith.addf %67, %88 : vector<16x32xf32>
    %90 = vector.extract_strided_slice %38 {offsets = [0, 0, 8], sizes = [2, 8, 4], strides = [1, 1, 1]} : vector<2x8x32xbf16> to vector<2x8x4xbf16>
    %91 = vector.extract_strided_slice %41 {offsets = [0, 0, 8], sizes = [2, 8, 4], strides = [1, 1, 1]} : vector<2x8x32xbf16> to vector<2x8x4xbf16>
    "tpu.trace_start"() <{level = 10 : i32, message = "bld,bmd->blm"}> : () -> ()
    %cst_36 = arith.constant dense<0.000000e+00> : vector<2x8x8xf32>
    %92 = tpu.matmul %90, %91, %cst_36 {dimension_numbers = #tpu.dot_dimension_numbers<[2], [2], [1], [1], [0, 0, 0, 1, 1, 1], [0], [0]>} : vector<2x8x4xbf16>, vector<2x8x4xbf16>, vector<2x8x8xf32> -> vector<2x8x8xf32>
    "tpu.trace_stop"() : () -> ()
    %cst_37 = arith.constant dense<0xFF800000> : vector<2x8xf32>
    %93 = vector.multi_reduction <maximumf>, %92, %cst_37 [2] : vector<2x8x8xf32> to vector<2x8xf32>
    %94 = vector.shape_cast %93 : vector<2x8xf32> to vector<2x8x1xf32>
    %95 = vector.broadcast %94 : vector<2x8x1xf32> to vector<2x8x8xf32>
    %96 = arith.subf %92, %95 : vector<2x8x8xf32>
    %97 = math.exp %96 : vector<2x8x8xf32>
    %cst_38 = arith.constant dense<0.000000e+00> : vector<2x8xf32>
    %98 = vector.multi_reduction <add>, %97, %cst_38 [2] : vector<2x8x8xf32> to vector<2x8xf32>
    %99 = vector.shape_cast %98 : vector<2x8xf32> to vector<2x8x1xf32>
    %100 = tpu.reciprocal %99 {approx = true} : vector<2x8x1xf32> -> vector<2x8x1xf32>
    %101 = vector.broadcast %100 : vector<2x8x1xf32> to vector<2x8x8xf32>
    %102 = arith.mulf %97, %101 : vector<2x8x8xf32>
    %103 = arith.truncf %102 : vector<2x8x8xf32> to vector<2x8x8xbf16>
    %104 = vector.extract_strided_slice %44 {offsets = [0, 0, 8], sizes = [2, 8, 4], strides = [1, 1, 1]} : vector<2x8x32xbf16> to vector<2x8x4xbf16>
    "tpu.trace_start"() <{level = 10 : i32, message = "blm,bmd->bld"}> : () -> ()
    %cst_39 = arith.constant dense<0.000000e+00> : vector<2x8x4xf32>
    %105 = tpu.matmul %103, %104, %cst_39 {dimension_numbers = #tpu.dot_dimension_numbers<[2], [1], [1], [2], [0, 0, 0, 1, 1, 2], [0], [0]>} : vector<2x8x8xbf16>, vector<2x8x4xbf16>, vector<2x8x4xf32> -> vector<2x8x4xf32>
    "tpu.trace_stop"() : () -> ()
    %106 = vector.shape_cast %105 : vector<2x8x4xf32> to vector<16x4xf32>
    %107 = arith.truncf %106 : vector<16x4xf32> to vector<16x4xbf16>
    %c2 = arith.constant 2 : index
    %c0_40 = arith.constant 0 : index
    %c0_41 = arith.constant 0 : index
    %108 = vector.load %arg8[%c2, %c0_40, %c0_41] : memref<8x4x32xbf16, #tpu.memory_space<vmem>>, vector<1x4x32xbf16>
    %109 = vector.shape_cast %108 : vector<1x4x32xbf16> to vector<4x32xbf16>
    %cst_42 = arith.constant dense<0.000000e+00> : vector<16x32xf32>
    %110 = tpu.matmul %107, %109, %cst_42 {dimension_numbers = #tpu.dot_dimension_numbers<[1], [0], [0], [1], [0, 0, 1, 1], [], []>} : vector<16x4xbf16>, vector<4x32xbf16>, vector<16x32xf32> -> vector<16x32xf32>
    %111 = arith.addf %89, %110 : vector<16x32xf32>
    %112 = vector.extract_strided_slice %38 {offsets = [0, 0, 12], sizes = [2, 8, 4], strides = [1, 1, 1]} : vector<2x8x32xbf16> to vector<2x8x4xbf16>
    %113 = vector.extract_strided_slice %41 {offsets = [0, 0, 12], sizes = [2, 8, 4], strides = [1, 1, 1]} : vector<2x8x32xbf16> to vector<2x8x4xbf16>
    "tpu.trace_start"() <{level = 10 : i32, message = "bld,bmd->blm"}> : () -> ()
    %cst_43 = arith.constant dense<0.000000e+00> : vector<2x8x8xf32>
    %114 = tpu.matmul %112, %113, %cst_43 {dimension_numbers = #tpu.dot_dimension_numbers<[2], [2], [1], [1], [0, 0, 0, 1, 1, 1], [0], [0]>} : vector<2x8x4xbf16>, vector<2x8x4xbf16>, vector<2x8x8xf32> -> vector<2x8x8xf32>
    "tpu.trace_stop"() : () -> ()
    %cst_44 = arith.constant dense<0xFF800000> : vector<2x8xf32>
    %115 = vector.multi_reduction <maximumf>, %114, %cst_44 [2] : vector<2x8x8xf32> to vector<2x8xf32>
    %116 = vector.shape_cast %115 : vector<2x8xf32> to vector<2x8x1xf32>
    %117 = vector.broadcast %116 : vector<2x8x1xf32> to vector<2x8x8xf32>
    %118 = arith.subf %114, %117 : vector<2x8x8xf32>
    %119 = math.exp %118 : vector<2x8x8xf32>
    %cst_45 = arith.constant dense<0.000000e+00> : vector<2x8xf32>
    %120 = vector.multi_reduction <add>, %119, %cst_45 [2] : vector<2x8x8xf32> to vector<2x8xf32>
    %121 = vector.shape_cast %120 : vector<2x8xf32> to vector<2x8x1xf32>
    %122 = tpu.reciprocal %121 {approx = true} : vector<2x8x1xf32> -> vector<2x8x1xf32>
    %123 = vector.broadcast %122 : vector<2x8x1xf32> to vector<2x8x8xf32>
    %124 = arith.mulf %119, %123 : vector<2x8x8xf32>
    %125 = arith.truncf %124 : vector<2x8x8xf32> to vector<2x8x8xbf16>
    %126 = vector.extract_strided_slice %44 {offsets = [0, 0, 12], sizes = [2, 8, 4], strides = [1, 1, 1]} : vector<2x8x32xbf16> to vector<2x8x4xbf16>
    "tpu.trace_start"() <{level = 10 : i32, message = "blm,bmd->bld"}> : () -> ()
    %cst_46 = arith.constant dense<0.000000e+00> : vector<2x8x4xf32>
    %127 = tpu.matmul %125, %126, %cst_46 {dimension_numbers = #tpu.dot_dimension_numbers<[2], [1], [1], [2], [0, 0, 0, 1, 1, 2], [0], [0]>} : vector<2x8x8xbf16>, vector<2x8x4xbf16>, vector<2x8x4xf32> -> vector<2x8x4xf32>
    "tpu.trace_stop"() : () -> ()
    %128 = vector.shape_cast %127 : vector<2x8x4xf32> to vector<16x4xf32>
    %129 = arith.truncf %128 : vector<16x4xf32> to vector<16x4xbf16>
    %c3 = arith.constant 3 : index
    %c0_47 = arith.constant 0 : index
    %c0_48 = arith.constant 0 : index
    %130 = vector.load %arg8[%c3, %c0_47, %c0_48] : memref<8x4x32xbf16, #tpu.memory_space<vmem>>, vector<1x4x32xbf16>
    %131 = vector.shape_cast %130 : vector<1x4x32xbf16> to vector<4x32xbf16>
    %cst_49 = arith.constant dense<0.000000e+00> : vector<16x32xf32>
    %132 = tpu.matmul %129, %131, %cst_49 {dimension_numbers = #tpu.dot_dimension_numbers<[1], [0], [0], [1], [0, 0, 1, 1], [], []>} : vector<16x4xbf16>, vector<4x32xbf16>, vector<16x32xf32> -> vector<16x32xf32>
    %133 = arith.addf %111, %132 : vector<16x32xf32>
    %134 = vector.extract_strided_slice %38 {offsets = [0, 0, 16], sizes = [2, 8, 4], strides = [1, 1, 1]} : vector<2x8x32xbf16> to vector<2x8x4xbf16>
    %135 = vector.extract_strided_slice %41 {offsets = [0, 0, 16], sizes = [2, 8, 4], strides = [1, 1, 1]} : vector<2x8x32xbf16> to vector<2x8x4xbf16>
    "tpu.trace_start"() <{level = 10 : i32, message = "bld,bmd->blm"}> : () -> ()
    %cst_50 = arith.constant dense<0.000000e+00> : vector<2x8x8xf32>
    %136 = tpu.matmul %134, %135, %cst_50 {dimension_numbers = #tpu.dot_dimension_numbers<[2], [2], [1], [1], [0, 0, 0, 1, 1, 1], [0], [0]>} : vector<2x8x4xbf16>, vector<2x8x4xbf16>, vector<2x8x8xf32> -> vector<2x8x8xf32>
    "tpu.trace_stop"() : () -> ()
    %cst_51 = arith.constant dense<0xFF800000> : vector<2x8xf32>
    %137 = vector.multi_reduction <maximumf>, %136, %cst_51 [2] : vector<2x8x8xf32> to vector<2x8xf32>
    %138 = vector.shape_cast %137 : vector<2x8xf32> to vector<2x8x1xf32>
    %139 = vector.broadcast %138 : vector<2x8x1xf32> to vector<2x8x8xf32>
    %140 = arith.subf %136, %139 : vector<2x8x8xf32>
    %141 = math.exp %140 : vector<2x8x8xf32>
    %cst_52 = arith.constant dense<0.000000e+00> : vector<2x8xf32>
    %142 = vector.multi_reduction <add>, %141, %cst_52 [2] : vector<2x8x8xf32> to vector<2x8xf32>
    %143 = vector.shape_cast %142 : vector<2x8xf32> to vector<2x8x1xf32>
    %144 = tpu.reciprocal %143 {approx = true} : vector<2x8x1xf32> -> vector<2x8x1xf32>
    %145 = vector.broadcast %144 : vector<2x8x1xf32> to vector<2x8x8xf32>
    %146 = arith.mulf %141, %145 : vector<2x8x8xf32>
    %147 = arith.truncf %146 : vector<2x8x8xf32> to vector<2x8x8xbf16>
    %148 = vector.extract_strided_slice %44 {offsets = [0, 0, 16], sizes = [2, 8, 4], strides = [1, 1, 1]} : vector<2x8x32xbf16> to vector<2x8x4xbf16>
    "tpu.trace_start"() <{level = 10 : i32, message = "blm,bmd->bld"}> : () -> ()
    %cst_53 = arith.constant dense<0.000000e+00> : vector<2x8x4xf32>
    %149 = tpu.matmul %147, %148, %cst_53 {dimension_numbers = #tpu.dot_dimension_numbers<[2], [1], [1], [2], [0, 0, 0, 1, 1, 2], [0], [0]>} : vector<2x8x8xbf16>, vector<2x8x4xbf16>, vector<2x8x4xf32> -> vector<2x8x4xf32>
    "tpu.trace_stop"() : () -> ()
    %150 = vector.shape_cast %149 : vector<2x8x4xf32> to vector<16x4xf32>
    %151 = arith.truncf %150 : vector<16x4xf32> to vector<16x4xbf16>
    %c4 = arith.constant 4 : index
    %c0_54 = arith.constant 0 : index
    %c0_55 = arith.constant 0 : index
    %152 = vector.load %arg8[%c4, %c0_54, %c0_55] : memref<8x4x32xbf16, #tpu.memory_space<vmem>>, vector<1x4x32xbf16>
    %153 = vector.shape_cast %152 : vector<1x4x32xbf16> to vector<4x32xbf16>
    %cst_56 = arith.constant dense<0.000000e+00> : vector<16x32xf32>
    %154 = tpu.matmul %151, %153, %cst_56 {dimension_numbers = #tpu.dot_dimension_numbers<[1], [0], [0], [1], [0, 0, 1, 1], [], []>} : vector<16x4xbf16>, vector<4x32xbf16>, vector<16x32xf32> -> vector<16x32xf32>
    %155 = arith.addf %133, %154 : vector<16x32xf32>
    %156 = vector.extract_strided_slice %38 {offsets = [0, 0, 20], sizes = [2, 8, 4], strides = [1, 1, 1]} : vector<2x8x32xbf16> to vector<2x8x4xbf16>
    %157 = vector.extract_strided_slice %41 {offsets = [0, 0, 20], sizes = [2, 8, 4], strides = [1, 1, 1]} : vector<2x8x32xbf16> to vector<2x8x4xbf16>
    "tpu.trace_start"() <{level = 10 : i32, message = "bld,bmd->blm"}> : () -> ()
    %cst_57 = arith.constant dense<0.000000e+00> : vector<2x8x8xf32>
    %158 = tpu.matmul %156, %157, %cst_57 {dimension_numbers = #tpu.dot_dimension_numbers<[2], [2], [1], [1], [0, 0, 0, 1, 1, 1], [0], [0]>} : vector<2x8x4xbf16>, vector<2x8x4xbf16>, vector<2x8x8xf32> -> vector<2x8x8xf32>
    "tpu.trace_stop"() : () -> ()
    %cst_58 = arith.constant dense<0xFF800000> : vector<2x8xf32>
    %159 = vector.multi_reduction <maximumf>, %158, %cst_58 [2] : vector<2x8x8xf32> to vector<2x8xf32>
    %160 = vector.shape_cast %159 : vector<2x8xf32> to vector<2x8x1xf32>
    %161 = vector.broadcast %160 : vector<2x8x1xf32> to vector<2x8x8xf32>
    %162 = arith.subf %158, %161 : vector<2x8x8xf32>
    %163 = math.exp %162 : vector<2x8x8xf32>
    %cst_59 = arith.constant dense<0.000000e+00> : vector<2x8xf32>
    %164 = vector.multi_reduction <add>, %163, %cst_59 [2] : vector<2x8x8xf32> to vector<2x8xf32>
    %165 = vector.shape_cast %164 : vector<2x8xf32> to vector<2x8x1xf32>
    %166 = tpu.reciprocal %165 {approx = true} : vector<2x8x1xf32> -> vector<2x8x1xf32>
    %167 = vector.broadcast %166 : vector<2x8x1xf32> to vector<2x8x8xf32>
    %168 = arith.mulf %163, %167 : vector<2x8x8xf32>
    %169 = arith.truncf %168 : vector<2x8x8xf32> to vector<2x8x8xbf16>
    %170 = vector.extract_strided_slice %44 {offsets = [0, 0, 20], sizes = [2, 8, 4], strides = [1, 1, 1]} : vector<2x8x32xbf16> to vector<2x8x4xbf16>
    "tpu.trace_start"() <{level = 10 : i32, message = "blm,bmd->bld"}> : () -> ()
    %cst_60 = arith.constant dense<0.000000e+00> : vector<2x8x4xf32>
    %171 = tpu.matmul %169, %170, %cst_60 {dimension_numbers = #tpu.dot_dimension_numbers<[2], [1], [1], [2], [0, 0, 0, 1, 1, 2], [0], [0]>} : vector<2x8x8xbf16>, vector<2x8x4xbf16>, vector<2x8x4xf32> -> vector<2x8x4xf32>
    "tpu.trace_stop"() : () -> ()
    %172 = vector.shape_cast %171 : vector<2x8x4xf32> to vector<16x4xf32>
    %173 = arith.truncf %172 : vector<16x4xf32> to vector<16x4xbf16>
    %c5 = arith.constant 5 : index
    %c0_61 = arith.constant 0 : index
    %c0_62 = arith.constant 0 : index
    %174 = vector.load %arg8[%c5, %c0_61, %c0_62] : memref<8x4x32xbf16, #tpu.memory_space<vmem>>, vector<1x4x32xbf16>
    %175 = vector.shape_cast %174 : vector<1x4x32xbf16> to vector<4x32xbf16>
    %cst_63 = arith.constant dense<0.000000e+00> : vector<16x32xf32>
    %176 = tpu.matmul %173, %175, %cst_63 {dimension_numbers = #tpu.dot_dimension_numbers<[1], [0], [0], [1], [0, 0, 1, 1], [], []>} : vector<16x4xbf16>, vector<4x32xbf16>, vector<16x32xf32> -> vector<16x32xf32>
    %177 = arith.addf %155, %176 : vector<16x32xf32>
    %178 = vector.extract_strided_slice %38 {offsets = [0, 0, 24], sizes = [2, 8, 4], strides = [1, 1, 1]} : vector<2x8x32xbf16> to vector<2x8x4xbf16>
    %179 = vector.extract_strided_slice %41 {offsets = [0, 0, 24], sizes = [2, 8, 4], strides = [1, 1, 1]} : vector<2x8x32xbf16> to vector<2x8x4xbf16>
    "tpu.trace_start"() <{level = 10 : i32, message = "bld,bmd->blm"}> : () -> ()
    %cst_64 = arith.constant dense<0.000000e+00> : vector<2x8x8xf32>
    %180 = tpu.matmul %178, %179, %cst_64 {dimension_numbers = #tpu.dot_dimension_numbers<[2], [2], [1], [1], [0, 0, 0, 1, 1, 1], [0], [0]>} : vector<2x8x4xbf16>, vector<2x8x4xbf16>, vector<2x8x8xf32> -> vector<2x8x8xf32>
    "tpu.trace_stop"() : () -> ()
    %cst_65 = arith.constant dense<0xFF800000> : vector<2x8xf32>
    %181 = vector.multi_reduction <maximumf>, %180, %cst_65 [2] : vector<2x8x8xf32> to vector<2x8xf32>
    %182 = vector.shape_cast %181 : vector<2x8xf32> to vector<2x8x1xf32>
    %183 = vector.broadcast %182 : vector<2x8x1xf32> to vector<2x8x8xf32>
    %184 = arith.subf %180, %183 : vector<2x8x8xf32>
    %185 = math.exp %184 : vector<2x8x8xf32>
    %cst_66 = arith.constant dense<0.000000e+00> : vector<2x8xf32>
    %186 = vector.multi_reduction <add>, %185, %cst_66 [2] : vector<2x8x8xf32> to vector<2x8xf32>
    %187 = vector.shape_cast %186 : vector<2x8xf32> to vector<2x8x1xf32>
    %188 = tpu.reciprocal %187 {approx = true} : vector<2x8x1xf32> -> vector<2x8x1xf32>
    %189 = vector.broadcast %188 : vector<2x8x1xf32> to vector<2x8x8xf32>
    %190 = arith.mulf %185, %189 : vector<2x8x8xf32>
    %191 = arith.truncf %190 : vector<2x8x8xf32> to vector<2x8x8xbf16>
    %192 = vector.extract_strided_slice %44 {offsets = [0, 0, 24], sizes = [2, 8, 4], strides = [1, 1, 1]} : vector<2x8x32xbf16> to vector<2x8x4xbf16>
    "tpu.trace_start"() <{level = 10 : i32, message = "blm,bmd->bld"}> : () -> ()
    %cst_67 = arith.constant dense<0.000000e+00> : vector<2x8x4xf32>
    %193 = tpu.matmul %191, %192, %cst_67 {dimension_numbers = #tpu.dot_dimension_numbers<[2], [1], [1], [2], [0, 0, 0, 1, 1, 2], [0], [0]>} : vector<2x8x8xbf16>, vector<2x8x4xbf16>, vector<2x8x4xf32> -> vector<2x8x4xf32>
    "tpu.trace_stop"() : () -> ()
    %194 = vector.shape_cast %193 : vector<2x8x4xf32> to vector<16x4xf32>
    %195 = arith.truncf %194 : vector<16x4xf32> to vector<16x4xbf16>
    %c6 = arith.constant 6 : index
    %c0_68 = arith.constant 0 : index
    %c0_69 = arith.constant 0 : index
    %196 = vector.load %arg8[%c6, %c0_68, %c0_69] : memref<8x4x32xbf16, #tpu.memory_space<vmem>>, vector<1x4x32xbf16>
    %197 = vector.shape_cast %196 : vector<1x4x32xbf16> to vector<4x32xbf16>
    %cst_70 = arith.constant dense<0.000000e+00> : vector<16x32xf32>
    %198 = tpu.matmul %195, %197, %cst_70 {dimension_numbers = #tpu.dot_dimension_numbers<[1], [0], [0], [1], [0, 0, 1, 1], [], []>} : vector<16x4xbf16>, vector<4x32xbf16>, vector<16x32xf32> -> vector<16x32xf32>
    %199 = arith.addf %177, %198 : vector<16x32xf32>
    %200 = vector.extract_strided_slice %38 {offsets = [0, 0, 28], sizes = [2, 8, 4], strides = [1, 1, 1]} : vector<2x8x32xbf16> to vector<2x8x4xbf16>
    %201 = vector.extract_strided_slice %41 {offsets = [0, 0, 28], sizes = [2, 8, 4], strides = [1, 1, 1]} : vector<2x8x32xbf16> to vector<2x8x4xbf16>
    "tpu.trace_start"() <{level = 10 : i32, message = "bld,bmd->blm"}> : () -> ()
    %cst_71 = arith.constant dense<0.000000e+00> : vector<2x8x8xf32>
    %202 = tpu.matmul %200, %201, %cst_71 {dimension_numbers = #tpu.dot_dimension_numbers<[2], [2], [1], [1], [0, 0, 0, 1, 1, 1], [0], [0]>} : vector<2x8x4xbf16>, vector<2x8x4xbf16>, vector<2x8x8xf32> -> vector<2x8x8xf32>
    "tpu.trace_stop"() : () -> ()
    %cst_72 = arith.constant dense<0xFF800000> : vector<2x8xf32>
    %203 = vector.multi_reduction <maximumf>, %202, %cst_72 [2] : vector<2x8x8xf32> to vector<2x8xf32>
    %204 = vector.shape_cast %203 : vector<2x8xf32> to vector<2x8x1xf32>
    %205 = vector.broadcast %204 : vector<2x8x1xf32> to vector<2x8x8xf32>
    %206 = arith.subf %202, %205 : vector<2x8x8xf32>
    %207 = math.exp %206 : vector<2x8x8xf32>
    %cst_73 = arith.constant dense<0.000000e+00> : vector<2x8xf32>
    %208 = vector.multi_reduction <add>, %207, %cst_73 [2] : vector<2x8x8xf32> to vector<2x8xf32>
    %209 = vector.shape_cast %208 : vector<2x8xf32> to vector<2x8x1xf32>
    %210 = tpu.reciprocal %209 {approx = true} : vector<2x8x1xf32> -> vector<2x8x1xf32>
    %211 = vector.broadcast %210 : vector<2x8x1xf32> to vector<2x8x8xf32>
    %212 = arith.mulf %207, %211 : vector<2x8x8xf32>
    %213 = arith.truncf %212 : vector<2x8x8xf32> to vector<2x8x8xbf16>
    %214 = vector.extract_strided_slice %44 {offsets = [0, 0, 28], sizes = [2, 8, 4], strides = [1, 1, 1]} : vector<2x8x32xbf16> to vector<2x8x4xbf16>
    "tpu.trace_start"() <{level = 10 : i32, message = "blm,bmd->bld"}> : () -> ()
    %cst_74 = arith.constant dense<0.000000e+00> : vector<2x8x4xf32>
    %215 = tpu.matmul %213, %214, %cst_74 {dimension_numbers = #tpu.dot_dimension_numbers<[2], [1], [1], [2], [0, 0, 0, 1, 1, 2], [0], [0]>} : vector<2x8x8xbf16>, vector<2x8x4xbf16>, vector<2x8x4xf32> -> vector<2x8x4xf32>
    "tpu.trace_stop"() : () -> ()
    %216 = vector.shape_cast %215 : vector<2x8x4xf32> to vector<16x4xf32>
    %217 = arith.truncf %216 : vector<16x4xf32> to vector<16x4xbf16>
    %c7 = arith.constant 7 : index
    %c0_75 = arith.constant 0 : index
    %c0_76 = arith.constant 0 : index
    %218 = vector.load %arg8[%c7, %c0_75, %c0_76] : memref<8x4x32xbf16, #tpu.memory_space<vmem>>, vector<1x4x32xbf16>
    %219 = vector.shape_cast %218 : vector<1x4x32xbf16> to vector<4x32xbf16>
    %cst_77 = arith.constant dense<0.000000e+00> : vector<16x32xf32>
    %220 = tpu.matmul %217, %219, %cst_77 {dimension_numbers = #tpu.dot_dimension_numbers<[1], [0], [0], [1], [0, 0, 1, 1], [], []>} : vector<16x4xbf16>, vector<4x32xbf16>, vector<16x32xf32> -> vector<16x32xf32>
    %221 = arith.addf %199, %220 : vector<16x32xf32>
    %222 = arith.addf %1, %221 : vector<16x32xf32>
    %c0_78 = arith.constant 0 : index
    %c0_79 = arith.constant 0 : index
    %223 = vector.load %arg9[%c0_78, %c0_79] : memref<1x32xf32, #tpu.memory_space<vmem>>, vector<1x32xf32>
    %224 = vector.broadcast %223 : vector<1x32xf32> to vector<16x32xf32>
    %225 = arith.addf %222, %224 : vector<16x32xf32>
    %c0_80 = arith.constant 0 : index
    %c0_81 = arith.constant 0 : index
    %226 = vector.load %arg10[%c0_80, %c0_81] : memref<1x32xf32, #tpu.memory_space<vmem>>, vector<1x32xf32>
    %c0_82 = arith.constant 0 : index
    %c0_83 = arith.constant 0 : index
    %227 = vector.load %arg11[%c0_82, %c0_83] : memref<1x32xf32, #tpu.memory_space<vmem>>, vector<1x32xf32>
    %cst_84 = arith.constant dense<0.000000e+00> : vector<16xf32>
    %228 = vector.multi_reduction <add>, %225, %cst_84 [1] : vector<16x32xf32> to vector<16xf32>
    %229 = vector.shape_cast %228 : vector<16xf32> to vector<16x1xf32>
    %cst_85 = arith.constant 3.200000e+01 : f32
    %230 = vector.broadcast %cst_85 : f32 to vector<16x1xf32>
    %231 = arith.divf %229, %230 : vector<16x1xf32>
    %232 = vector.broadcast %231 : vector<16x1xf32> to vector<16x32xf32>
    %233 = arith.subf %225, %232 : vector<16x32xf32>
    %234 = arith.mulf %233, %233 : vector<16x32xf32>
    %cst_86 = arith.constant dense<0.000000e+00> : vector<16xf32>
    %235 = vector.multi_reduction <add>, %234, %cst_86 [1] : vector<16x32xf32> to vector<16xf32>
    %236 = vector.shape_cast %235 : vector<16xf32> to vector<16x1xf32>
    %cst_87 = arith.constant 3.200000e+01 : f32
    %237 = vector.broadcast %cst_87 : f32 to vector<16x1xf32>
    %238 = arith.divf %236, %237 : vector<16x1xf32>
    %239 = vector.broadcast %231 : vector<16x1xf32> to vector<16x32xf32>
    %240 = arith.subf %225, %239 : vector<16x32xf32>
    %cst_88 = arith.constant 9.99999974E-6 : f32
    %241 = vector.broadcast %cst_88 : f32 to vector<16x1xf32>
    %242 = arith.addf %238, %241 : vector<16x1xf32>
    %243 = math.rsqrt %242 : vector<16x1xf32>
    %244 = vector.broadcast %243 : vector<16x1xf32> to vector<16x32xf32>
    %245 = arith.mulf %240, %244 : vector<16x32xf32>
    %246 = vector.broadcast %226 : vector<1x32xf32> to vector<16x32xf32>
    %247 = arith.mulf %245, %246 : vector<16x32xf32>
    %248 = vector.broadcast %227 : vector<1x32xf32> to vector<16x32xf32>
    %249 = arith.addf %247, %248 : vector<16x32xf32>
    %250 = arith.truncf %249 : vector<16x32xf32> to vector<16x32xbf16>
    %c0_89 = arith.constant 0 : index
    %c0_90 = arith.constant 0 : index
    %251 = vector.load %arg12[%c0_89, %c0_90] : memref<32x2048xbf16, #tpu.memory_space<vmem>>, vector<32x2048xbf16>
    %cst_91 = arith.constant dense<0.000000e+00> : vector<16x2048xf32>
    %252 = tpu.matmul %250, %251, %cst_91 {dimension_numbers = #tpu.dot_dimension_numbers<[1], [0], [0], [1], [0, 0, 1, 1], [], []>} : vector<16x32xbf16>, vector<32x2048xbf16>, vector<16x2048xf32> -> vector<16x2048xf32>
    %c0_92 = arith.constant 0 : index
    %c0_93 = arith.constant 0 : index
    %253 = vector.load %arg13[%c0_92, %c0_93] : memref<1x2048xf32, #tpu.memory_space<vmem>>, vector<1x2048xf32>
    %254 = vector.broadcast %253 : vector<1x2048xf32> to vector<16x2048xf32>
    %255 = arith.addf %252, %254 : vector<16x2048xf32>
    %256 = arith.truncf %255 : vector<16x2048xf32> to vector<16x2048xbf16>
    %cst_94 = arith.constant 5.000000e-01 : bf16
    %257 = vector.broadcast %cst_94 : bf16 to vector<16x2048xbf16>
    %258 = arith.mulf %257, %256 : vector<16x2048xbf16>
    %cst_95 = arith.constant 4.467770e-02 : bf16
    %259 = vector.broadcast %cst_95 : bf16 to vector<16x2048xbf16>
    %260 = arith.mulf %259, %256 : vector<16x2048xbf16>
    %261 = arith.mulf %260, %256 : vector<16x2048xbf16>
    %262 = arith.mulf %261, %256 : vector<16x2048xbf16>
    %263 = arith.addf %256, %262 : vector<16x2048xbf16>
    %cst_96 = arith.constant 7.968750e-01 : bf16
    %264 = vector.broadcast %cst_96 : bf16 to vector<16x2048xbf16>
    %265 = arith.mulf %264, %263 : vector<16x2048xbf16>
    %266 = math.tanh %265 : vector<16x2048xbf16>
    %cst_97 = arith.constant 1.000000e+00 : bf16
    %267 = vector.broadcast %cst_97 : bf16 to vector<16x2048xbf16>
    %268 = arith.addf %267, %266 : vector<16x2048xbf16>
    %269 = arith.mulf %258, %268 : vector<16x2048xbf16>
    %c0_98 = arith.constant 0 : index
    %c0_99 = arith.constant 0 : index
    %270 = vector.load %arg14[%c0_98, %c0_99] : memref<2048x32xbf16, #tpu.memory_space<vmem>>, vector<2048x32xbf16>
    %cst_100 = arith.constant dense<0.000000e+00> : vector<16x32xf32>
    %271 = tpu.matmul %269, %270, %cst_100 {dimension_numbers = #tpu.dot_dimension_numbers<[1], [0], [0], [1], [0, 0, 1, 1], [], []>} : vector<16x2048xbf16>, vector<2048x32xbf16>, vector<16x32xf32> -> vector<16x32xf32>
    %c0_101 = arith.constant 0 : index
    %c0_102 = arith.constant 0 : index
    %272 = vector.load %arg15[%c0_101, %c0_102] : memref<1x32xf32, #tpu.memory_space<vmem>>, vector<1x32xf32>
    %273 = vector.broadcast %272 : vector<1x32xf32> to vector<16x32xf32>
    %274 = arith.addf %271, %273 : vector<16x32xf32>
    %275 = arith.addf %225, %274 : vector<16x32xf32>
    %276 = vector.shape_cast %275 : vector<16x32xf32> to vector<2x8x32xf32>
    %c0_103 = arith.constant 0 : index
    %c0_104 = arith.constant 0 : index
    %c0_105 = arith.constant 0 : index
    %277 = vector.load %arg16[%c0_103, %c0_104, %c0_105] : memref<2x8x32xf32, #tpu.memory_space<vmem>>, vector<2x8x32xf32>
    tpu.vector_store %arg16[%c0_103, %c0_104, %c0_105], %276 {strides = array<i32>} : memref<2x8x32xf32, #tpu.memory_space<vmem>>, vector<2x8x32xf32>,
    return
  }
  func.func @transform_0(%arg0: i32) -> (i32, i32, i32) {
    %c0_i32 = arith.constant 0 : i32
    %c0_i32_0 = arith.constant 0 : i32
    %c0_i32_1 = arith.constant 0 : i32
    return %arg0, %c0_i32, %c0_i32_0 : i32, i32, i32
  }
  func.func @transform_1(%arg0: i32) -> (i32, i32) {
    %c0_i32 = arith.constant 0 : i32
    %c0_i32_0 = arith.constant 0 : i32
    %c0_i32_1 = arith.constant 0 : i32
    return %c0_i32, %c0_i32_0 : i32, i32
  }
  func.func @transform_2(%arg0: i32) -> (i32, i32) {
    %c0_i32 = arith.constant 0 : i32
    %c0_i32_0 = arith.constant 0 : i32
    %c0_i32_1 = arith.constant 0 : i32
    return %c0_i32, %c0_i32_0 : i32, i32
  }
  func.func @transform_3(%arg0: i32) -> (i32, i32) {
    %c0_i32 = arith.constant 0 : i32
    %c0_i32_0 = arith.constant 0 : i32
    %c0_i32_1 = arith.constant 0 : i32
    return %c0_i32, %c0_i32_0 : i32, i32
  }
  func.func @transform_4(%arg0: i32) -> (i32, i32) {
    %c0_i32 = arith.constant 0 : i32
    %c0_i32_0 = arith.constant 0 : i32
    %c0_i32_1 = arith.constant 0 : i32
    return %c0_i32, %c0_i32_0 : i32, i32
  }
  func.func @transform_5(%arg0: i32) -> (i32, i32) {
    %c0_i32 = arith.constant 0 : i32
    %c0_i32_0 = arith.constant 0 : i32
    %c0_i32_1 = arith.constant 0 : i32
    return %c0_i32, %c0_i32_0 : i32, i32
  }
  func.func @transform_6(%arg0: i32) -> (i32, i32) {
    %c0_i32 = arith.constant 0 : i32
    %c0_i32_0 = arith.constant 0 : i32
    %c0_i32_1 = arith.constant 0 : i32
    return %c0_i32, %c0_i32_0 : i32, i32
  }
  func.func @transform_7(%arg0: i32) -> (i32, i32, i32) {
    %c0_i32 = arith.constant 0 : i32
    %c0_i32_0 = arith.constant 0 : i32
    %c0_i32_1 = arith.constant 0 : i32
    %c0_i32_2 = arith.constant 0 : i32
    return %c0_i32, %c0_i32_0, %c0_i32_1 : i32, i32, i32
  }
  func.func @transform_8(%arg0: i32) -> (i32, i32) {
    %c0_i32 = arith.constant 0 : i32
    %c0_i32_0 = arith.constant 0 : i32
    %c0_i32_1 = arith.constant 0 : i32
    return %c0_i32, %c0_i32_0 : i32, i32
  }
  func.func @transform_9(%arg0: i32) -> (i32, i32) {
    %c0_i32 = arith.constant 0 : i32
    %c0_i32_0 = arith.constant 0 : i32
    %c0_i32_1 = arith.constant 0 : i32
    return %c0_i32, %c0_i32_0 : i32, i32
  }
  func.func @transform_10(%arg0: i32) -> (i32, i32) {
    %c0_i32 = arith.constant 0 : i32
    %c0_i32_0 = arith.constant 0 : i32
    %c0_i32_1 = arith.constant 0 : i32
    return %c0_i32, %c0_i32_0 : i32, i32
  }
  func.func @transform_11(%arg0: i32) -> (i32, i32) {
    %c0_i32 = arith.constant 0 : i32
    %c0_i32_0 = arith.constant 0 : i32
    %c0_i32_1 = arith.constant 0 : i32
    return %c0_i32, %c0_i32_0 : i32, i32
  }
  func.func @transform_12(%arg0: i32) -> (i32, i32) {
    %c0_i32 = arith.constant 0 : i32
    %c0_i32_0 = arith.constant 0 : i32
    %c0_i32_1 = arith.constant 0 : i32
    return %c0_i32, %c0_i32_0 : i32, i32
  }
  func.func @transform_13(%arg0: i32) -> (i32, i32) {
    %c0_i32 = arith.constant 0 : i32
    %c0_i32_0 = arith.constant 0 : i32
    %c0_i32_1 = arith.constant 0 : i32
    return %c0_i32, %c0_i32_0 : i32, i32
  }
  func.func @transform_14(%arg0: i32) -> (i32, i32) {
    %c0_i32 = arith.constant 0 : i32
    %c0_i32_0 = arith.constant 0 : i32
    %c0_i32_1 = arith.constant 0 : i32
    return %c0_i32, %c0_i32_0 : i32, i32
  }
  func.func @transform_15(%arg0: i32) -> (i32, i32, i32) {
    %c0_i32 = arith.constant 0 : i32
    %c0_i32_0 = arith.constant 0 : i32
    %c0_i32_1 = arith.constant 0 : i32
    return %arg0, %c0_i32, %c0_i32_0 : i32, i32, i32
  }
}

</mosaic_0001>

<bundles_post_ra>
// kernel: tpu_custom_call.1
= control target key start
LH: loop header
LB: loop body
LE: loop exit
PB: predicated region body
PF: predicated region fallthrough
CT: control target
= control target key end

     0   :  { %vm60_vm0 = vcmask 261120   ;;  %s6919_s0 = inlined_call_operand.vmem [shape: f32[2,8,32], index: 0, kind: input, shape index: {}]   ;;  %s6920_s1 = inlined_call_operand.vmem [shape: f32[1,32], index: 1, kind: input, shape index: {}]   ;;  %s6921_s2 = inlined_call_operand.vmem [shape: f32[1,32], index: 2, kind: input, shape index: {}]   ;;  %s6922_s3 = inlined_call_operand.vmem [shape: bf16[32,32], index: 3, kind: input, shape index: {}]   ;;  %s6923_s4 = inlined_call_operand.vmem [shape: f32[1,32], index: 4, kind: input, shape index: {}]   ;;  %s6924_s5 = inlined_call_operand.vmem [shape: bf16[32,64], index: 5, kind: input, shape index: {}]   ;;  %s6925_s6 = inlined_call_operand.vmem [shape: f32[1,64], index: 6, kind: input, shape index: {}]   ;;  %s6926_s7 = inlined_call_operand.vmem [shape: bf16[8,4,32], index: 7, kind: input, shape index: {}]   ;;  %s6927_s8 = inlined_call_operand.vmem [shape: f32[1,32], index: 8, kind: input, shape index: {}]   ;;  %s6928_s9 = inlined_call_operand.vmem [shape: f32[1,32], index: 9, kind: input, shape index: {}]   ;;  %s6929_s10 = inlined_call_operand.vmem [shape: f32[1,32], index: 10, kind: input, shape index: {}]   ;;  %s6930_s11 = inlined_call_operand.vmem [shape: bf16[32,2048], index: 11, kind: input, shape index: {}]   ;;  %s6931_s12 = inlined_call_operand.vmem [shape: f32[1,2048], index: 12, kind: input, shape index: {}]   ;;  %s6932_s13 = inlined_call_operand.vmem [shape: bf16[2048,32], index: 13, kind: input, shape index: {}]   ;;  %s6933_s14 = inlined_call_operand.vmem [shape: f32[1,32], index: 14, kind: input, shape index: {}]   ;;  %s6934_s15 = inlined_call_operand.hbm [shape: f32[2,8,32], index: 15, kind: output, shape index: {}]  }
   0x1   :  { %v56_v0 = vld [vmem:[%s6919_s0] sm:$0xff]  ;;  %v57_v1 = vld [vmem:[%s6919_s0 + $0x8] sm:$0xff] }
   0x2   :  { %v61_v2 = vsel %vm60_vm0, %v56_v0, 0.0  ;;  %v64_v3 = vsel %vm60_vm0, %v57_v1, 0.0 }
   0x3   :  { %62 = vadd.xlane.f32.xlu0 %v61_v2 }
   0x7   :  { %65 = vadd.xlane.f32.xlu0 %v64_v3 }
   0x8   :  { %20 = vsyncpa [#allocation3], 0  ;;  %v5397_v14 = vld [vmem:[%s6924_s5 + $0x8] sm:$0xff]   ;;  %v5657_v16 = vmov 0.0   ;;  %v5399_v17 = vld [vmem:[%s6924_s5] sm:$0xff]   ;;  %vm5658_vm1 = vmmov 0  }
   0x9   :  { %v5398_v15 = vld [vmem:[%s6922_s3 + $0x8] sm:$0xff]   ;;  %5120 = vmatprep.subr.bf16.mxu0 %v5657_v16  ;;  %5128 = vmatprep.subr.bf16.mxu1 %v5657_v16  ;;  %v5400_v18 = vld [vmem:[%s6922_s3] sm:$0xff]   ;;  %vm240_vm2 = vcmask 31744   ;;  %vm333_vm3 = vcmask 64512   ;;  %vm364_vm4 = vcmask 1043456   ;;  %s5661_s19 = smov 92  }
   0xa   :  { %5121 = vmatpush3.bf16.msra.mxu0 %v5397_v14  ;;  %5129 = vmatpush3.bf16.msra.mxu1 %v5398_v15  ;;  %v4629_v27 = vld [vmem:[%s6920_s1] ss:$0 sm:$0xff]  ;;  %s5662_s20 = smov 120   ;;  %vm687_vm5 = vcmask 1041408   ;;  %s5663_s25 = smov 88  }
   0xb   :  { %5122 = vmatprep.subr.bf16.mxu0 %v5657_v16  ;;  %5130 = vmatprep.subr.bf16.mxu1 %v5657_v16  ;;  %v4630_v31 = vld [vmem:[%s6921_s2] ss:$0 sm:$0xff]  ;;  %s5664_s26 = smov 116   ;;  %s5665_s29 = smov 84  }
   0xc   :  { %5124 = vmatprep.mubr.msk.bf16.mxu0 %vm5658_vm1, %v5657_v16  ;;  %5132 = vmatprep.mubr.msk.bf16.mxu1 %vm5658_vm1, %v5657_v16  ;;  %v4631_v36 = vld [vmem:[%s6925_s6] ss:$0 sm:$0xff]  ;;  %s5660_s6 = smov 124   ;;  %s5666_s3 = smov 112  }
   0xd   :  { %v4635_v43 = vld [vmem:[%s6923_s4] ss:$0 sm:$0xff]  ;;  %s5659_s4 = smov 96   ;;  %s5667_s16 = smov 80  }
   0xe   :  { %5123 = vmatpush3.bf16.msra.mxu0 %v5399_v17  ;;  %5131 = vmatpush3.bf16.msra.mxu1 %v5400_v18  ;;  %s5668_s1 = smov 108   ;;  %s5669_s18 = smov 76  }
   0xf   :  { %5136 = vmatprep.subr.bf16.mxu0 %v5657_v16  ;;  %5142 = vmatprep.subr.bf16.mxu1 %v5657_v16  ;;  %s5672_s21 = smov 100   ;;  %s5673_s24 = smov 68  }
  0x8c   :  { %v63_v4 = vpop.xlane.xlu0 %62 }
  0x8d   :  { %v68_v5 = vmul.f32 0.03125, %v63_v4 }
  0x8f   :  { %v70_v6 = vsub.f32 %v56_v0, %v68_v5 }
  0x90   :  { %v66_v7 = vpop.xlane.xlu0 %65 }
  0x91   :  { %v69_v8 = vmul.f32 0.03125, %v66_v7  ;;  %v72_v9 = vmul.f32 %v70_v6, %v70_v6 }
  0x93   :  { %v71_v10 = vsub.f32 %v57_v1, %v69_v8  ;;  %v74_v11 = vsel %vm60_vm0, %v72_v9, 0.0 }
  0x94   :  { %75 = vadd.xlane.f32.xlu1 %v74_v11 }
  0x95   :  { %v73_v12 = vmul.f32 %v71_v10, %v71_v10 }
  0x97   :  { %v77_v13 = vsel %vm60_vm0, %v73_v12, 0.0 }
  0x98   :  { %78 = vadd.xlane.f32.xlu1 %v77_v13 }
 0x11d   :  { %v76_v19 = vpop.xlane.xlu1 %75 }
 0x11e   :  { %v80_v20 = vmul.f32 0.03125, %v76_v19 }
 0x120   :  { %v82_v21 = vadd.f32 1e-05, %v80_v20 }
 0x121   :  { %v79_v22 = vpop.xlane.xlu1 %78 }
 0x122   :  { %5529 = vrsqrt.f32 %v82_v21  ;;  %v81_v23 = vmul.f32 0.03125, %v79_v22 }
 0x124   :  { %v83_v24 = vadd.f32 1e-05, %v81_v23 }
 0x126   :  { %5531 = vrsqrt.f32 %v83_v24 }
 0x12f   :  { %v5530_v25 = vpop.eup %5529 }
 0x130   :  { %v86_v26 = vmul.f32 %v5530_v25, %v70_v6 }
 0x132   :  { %v94_v30 = vmul.f32 %v4629_v27, %v86_v26 }
 0x133   :  { %v5532_v28 = vpop.eup %5531 }
 0x134   :  { %v87_v29 = vmul.f32 %v5532_v28, %v71_v10  ;;  %v102_v33 = vadd.f32 %v4630_v31, %v94_v30 }
 0x136   :  { %v95_v32 = vmul.f32 %v4629_v27, %v87_v29 }
 0x138   :  { %v103_v34 = vadd.f32 %v4630_v31, %v95_v32 }
 0x13a   :  { %v104_v35 = vpack.c.bf16 %v103_v34, %v102_v33 }
 0x13c   :  { %5125 = vmatmul.mubr.msk.bf16.vlgmr.msra.gmra.mxu0 %vm60_vm0, %v104_v35  ;;  %5133 = vmatmul.mubr.msk.bf16.vlgmr.msra.gmra.mxu1 %vm60_vm0, %v104_v35 }
 0x13d   :  { %5138 = vmatprep.mubr.msk.bf16.mxu0 %vm5658_vm1, %v5657_v16  ;;  %5144 = vmatprep.mubr.msk.bf16.mxu1 %vm5658_vm1, %v5657_v16 }
 0x1fc   :  { %v165_v37 = vpop.f32.mrf.mxu0  ;;  %v229_v38 = vpop.f32.mrf.mxu1 }
 0x1fd   :  { %v166_v39 = vadd.f32 %v4631_v36, %v165_v37  ;;  %v230_v50 = vadd.f32 %v4635_v43, %v229_v38 }
 0x1fe   :  { %v5126_v40 = vpop.f32.mrf.mxu0  ;;  %v5134_v41 = vpop.f32.mrf.mxu1 }
 0x1ff   :  { %v5805_v42 = vpack.c.bf16 %v166_v39, %v166_v39  ;;  %v5817_v53 = vpack.c.bf16 %v230_v50, %v230_v50 }
 0x200   :  { %v168_v44 = vpop.f32.mrf.mxu0  ;;  %v232_v45 = vpop.f32.mrf.mxu1 }
 0x201   :  { %v169_v46 = vadd.f32 %v4631_v36, %v168_v44  ;;  %v245_v47 = vsel %vm240_vm2, %v5805_v42, 0  ;;  %v233_v54 = vadd.f32 %v4635_v43, %v232_v45 }
 0x202   :  { %v5127_v48 = vpop.f32.mrf.mxu0  ;;  %v5135_v49 = vpop.f32.mrf.mxu1  ;;  %5137 = vmatpush3.bf16.xpose.msra.mxu0 %v245_v47 }
 0x203   :  { %v5812_v51 = vpack.c.bf16 %v169_v46, %v169_v46  ;;  %5148 = vmatprep.subr.bf16.mxu0 %v5657_v16  ;;  %v5824_v55 = vpack.c.bf16 %v233_v54, %v233_v54 }
 0x205   :  { %v291_v52 = vsel %vm240_vm2, %v5812_v51, 0 }
 0x206   :  { %5143 = vmatpush3.bf16.xpose.msra.mxu1 %v291_v52 }
 0x207   :  { %5154 = vmatprep.subr.bf16.mxu1 %v5657_v16 }
 0x209   :  { %5139 = vmatmul.mubr.msk.bf16.vlgmr.msra.gmra.mxu0 %vm240_vm2, %v5817_v53 }
 0x20a   :  { %5150 = vmatprep.mubr.msk.bf16.mxu0 %vm5658_vm1, %v5657_v16 }
 0x20d   :  { %5145 = vmatmul.mubr.msk.bf16.vlgmr.msra.gmra.mxu1 %vm240_vm2, %v5824_v55 }
 0x20e   :  { %5156 = vmatprep.mubr.msk.bf16.mxu1 %vm5658_vm1, %v5657_v16 }
 0x2c9   :  { %v281_v56 = vpop.f32.mrf.mxu0 }
 0x2ca   :  { %v334_v57 = vsel %vm333_vm3, %v281_v56, -inf }
 0x2cb   :  { %335 = vmax.xlane.f32.xlu0 %v334_v57  ;;  %v5140_v58 = vpop.f32.mrf.mxu0 }
 0x2cd   :  { %v284_v59 = vpop.f32.mrf.mxu0  ;;  %v327_v60 = vpop.f32.mrf.mxu1 }
 0x2ce   :  { %v337_v61 = vsel %vm333_vm3, %v327_v60, -inf }
 0x2cf   :  { %338 = vmax.xlane.f32.xlu1 %v337_v61  ;;  %v5141_v62 = vpop.f32.mrf.mxu0  ;;  %v5146_v63 = vpop.f32.mrf.mxu1 }
 0x2d1   :  { %v330_v0 = vpop.f32.mrf.mxu1 }
 0x2d3   :  { %v5147_v1 = vpop.f32.mrf.mxu1 }
 0x2e0   :  { %409 = vrot.lane.b32.xlu1 %v5812_v51, %s5659_s4 }
 0x2e4   :  { %462 = vrot.lane.b32.xlu1 %v5805_v42, %s5660_s6 }
 0x354   :  { %v336_v2 = vpop.xlane.xlu0 %335 }
 0x355   :  { %v340_v3 = vsub.f32 %v281_v56, %v336_v2 }
 0x357   :  { %v342_v4 = vmul.f32 1.442695, %v340_v3 }
 0x358   :  { %v339_v5 = vpop.xlane.xlu1 %338 }
 0x359   :  { %5533 = vpow2.f32 %v342_v4  ;;  %v341_v6 = vsub.f32 %v327_v60, %v339_v5 }
 0x35b   :  { %v344_v7 = vmul.f32 1.442695, %v341_v6 }
 0x35c   :  { %v410_v8 = vpop.permute.xlu1 %409 }
 0x35d   :  { %5535 = vpow2.f32 %v344_v7  ;;  %v415_v9 = vsel %vm364_vm4, %v410_v8, 0 }
 0x35e   :  { %5155 = vmatpush3.bf16.msra.mxu1 %v415_v9 }
 0x35f   :  { %5166 = vmatprep.subr.bf16.mxu1 %v5657_v16 }
 0x360   :  { %v463_v14 = vpop.permute.xlu1 %462 }
 0x361   :  { %v468_v24 = vsel %vm240_vm2, %v463_v14, 0 }
 0x366   :  { %v5534_v10 = vpop.eup %5533 }
 0x367   :  { %v346_v11 = vsel %vm333_vm3, %v5534_v10, 0.0 }
 0x368   :  { %347 = vadd.xlane.f32.xlu0 %v346_v11 }
 0x36a   :  { %v5536_v12 = vpop.eup %5535 }
 0x36b   :  { %v349_v13 = vsel %vm333_vm3, %v5536_v12, 0.0 }
 0x36c   :  { %350 = vadd.xlane.f32.xlu1 %v349_v13 }
 0x37d   :  { %513 = vrot.lane.b32.xlu1 %v5812_v51, %s5660_s6 }
 0x37e   :  { %359 = vrot.lane.b32.xlu0 %v5805_v42, %s5659_s4  ;;  %s5670_s4 = smov 104  }
 0x381   :  { %511 = vrot.lane.b32.xlu1 %v5824_v55, %s5660_s6 }
 0x382   :  { %460 = vrot.lane.b32.xlu0 %v5817_v53, %s5660_s6 }
 0x3f1   :  { %v348_v15 = vpop.xlane.xlu0 %347 }
 0x3f2   :  { %5537 = vrcp.f32 %v348_v15 }
 0x3f5   :  { %v351_v17 = vpop.xlane.xlu1 %350  ;;  %v360_v18 = vpop.permute.xlu0 %359 }
 0x3f6   :  { %5539 = vrcp.f32 %v351_v17  ;;  %v366_v19 = vsel %vm364_vm4, %v360_v18, 0 }
 0x3f7   :  { %5149 = vmatpush3.bf16.msra.mxu0 %v366_v19  ;;  %v4647_v19 = vld [vmem:[%s6926_s7 + $0x2] sm:$0x3] }
 0x3f8   :  { %5160 = vmatprep.subr.bf16.mxu0 %v5657_v16 }
 0x3f9   :  { %v514_v26 = vpop.permute.xlu1 %513  ;;  %v461_v29 = vpop.permute.xlu0 %460 }
 0x3fa   :  { %v519_v28 = vsel %vm240_vm2, %v514_v26, 0 }
 0x3fd   :  { %v512_v30 = vpop.permute.xlu1 %511 }
 0x3ff   :  { %v5538_v20 = vpop.eup %5537 }
 0x400   :  { %v354_v21 = vmul.f32 %v5538_v20, %v5534_v10  ;;  %v458_v10 = vld [vmem:[%s6926_s7] sm:$0x3]  ;;  %v689_v20 = vsel %vm687_vm5, %v4647_v19, 0 }
 0x401   :  { %v736_v13 = vsel %vm687_vm5, %v458_v10, 0 }
 0x402   :  { %v356_v22 = vpack.c.bf16 %v354_v21, %v354_v21 }
 0x403   :  { %v5540_v23 = vpop.eup %5539 }
 0x404   :  { %5151 = vmatmul.mubr.msk.bf16.vlgmr.msra.gmra.mxu0 %vm333_vm3, %v356_v22  ;;  %v355_v25 = vmul.f32 %v5540_v23, %v5536_v12 }
 0x405   :  { %5161 = vmatpush3.bf16.xpose.msra.mxu0 %v468_v24  ;;  %5162 = vmatprep.mubr.msk.bf16.mxu0 %vm5658_vm1, %v5657_v16 }
 0x406   :  { %v357_v27 = vpack.c.bf16 %v355_v25, %v355_v25  ;;  %5172 = vmatprep.subr.bf16.mxu0 %v5657_v16 }
 0x408   :  { %5157 = vmatmul.mubr.msk.bf16.vlgmr.msra.gmra.mxu1 %vm333_vm3, %v357_v27 }
 0x409   :  { %5167 = vmatpush3.bf16.xpose.msra.mxu1 %v519_v28  ;;  %5168 = vmatprep.mubr.msk.bf16.mxu1 %vm5658_vm1, %v5657_v16 }
 0x40a   :  { %5178 = vmatprep.subr.bf16.mxu1 %v5657_v16 }
 0x40c   :  { %5163 = vmatmul.mubr.msk.bf16.vlgmr.msra.gmra.mxu0 %vm240_vm2, %v461_v29 }
 0x40d   :  { %5174 = vmatprep.mubr.msk.bf16.mxu0 %vm5658_vm1, %v5657_v16 }
 0x410   :  { %5169 = vmatmul.mubr.msk.bf16.vlgmr.msra.gmra.mxu1 %vm240_vm2, %v512_v30 }
 0x411   :  { %5180 = vmatprep.mubr.msk.bf16.mxu1 %vm5658_vm1, %v5657_v16 }
 0x4c4   :  { %v5860_v31 = vpop.f32.mrf.mxu0 }
 0x4c6   :  { %v5152_v32 = vpop.f32.mrf.mxu0 }
 0x4c8   :  { %v405_v33 = vpop.f32.mrf.mxu0  ;;  %v5862_v34 = vpop.f32.mrf.mxu1 }
 0x4c9   :  { %v457_v35 = vpack.c.bf16 %v5862_v34, %v5860_v31 }
 0x4ca   :  { %v5153_v36 = vpop.f32.mrf.mxu0  ;;  %v5158_v37 = vpop.f32.mrf.mxu1 }
 0x4cc   :  { %v454_v38 = vpop.f32.mrf.mxu1  ;;  %v504_v39 = vpop.f32.mrf.mxu0 }
 0x4cd   :  { %v561_v40 = vsel %vm333_vm3, %v504_v39, -inf }
 0x4ce   :  { %v5159_v41 = vpop.f32.mrf.mxu1  ;;  %562 = vmax.xlane.f32.xlu0 %v561_v40  ;;  %v5164_v43 = vpop.f32.mrf.mxu0 }
 0x4d0   :  { %v507_v44 = vpop.f32.mrf.mxu0  ;;  %v555_v45 = vpop.f32.mrf.mxu1 }
 0x4d1   :  { %v564_v46 = vsel %vm333_vm3, %v555_v45, -inf }
 0x4d2   :  { %565 = vmax.xlane.f32.xlu1 %v564_v46  ;;  %v5165_v47 = vpop.f32.mrf.mxu0  ;;  %v5170_v48 = vpop.f32.mrf.mxu1 }
 0x4d4   :  { %v558_v49 = vpop.f32.mrf.mxu1 }
 0x4d6   :  { %v5171_v50 = vpop.f32.mrf.mxu1 }
 0x4e3   :  { %633 = vrot.lane.b32.xlu1 %v5812_v51, %s5661_s19 }
 0x4e7   :  { %781 = vrot.lane.b32.xlu1 %v5805_v42, %s5662_s20 }
 0x4eb   :  { %831 = vrot.lane.b32.xlu1 %v5812_v51, %s5662_s20 }
 0x4ef   :  { %829 = vrot.lane.b32.xlu1 %v5824_v55, %s5662_s20 }
 0x557   :  { %v563_v52 = vpop.xlane.xlu0 %562 }
 0x558   :  { %v567_v54 = vsub.f32 %v504_v39, %v563_v52 }
 0x55a   :  { %v569_v56 = vmul.f32 1.442695, %v567_v54 }
 0x55b   :  { %v566_v57 = vpop.xlane.xlu1 %565 }
 0x55c   :  { %5541 = vpow2.f32 %v569_v56  ;;  %v568_v58 = vsub.f32 %v555_v45, %v566_v57 }
 0x55e   :  { %v571_v59 = vmul.f32 1.442695, %v568_v58 }
 0x55f   :  { %v634_v60 = vpop.permute.xlu1 %633 }
 0x560   :  { %5543 = vpow2.f32 %v571_v59  ;;  %v639_v61 = vsel %vm364_vm4, %v634_v60, 0 }
 0x561   :  { %5179 = vmatpush3.bf16.msra.mxu1 %v639_v61 }
 0x562   :  { %5190 = vmatprep.subr.bf16.mxu1 %v5657_v16 }
 0x563   :  { %v782_v14 = vpop.permute.xlu1 %781 }
 0x564   :  { %v787_v28 = vsel %vm240_vm2, %v782_v14, 0 }
 0x567   :  { %v832_v15 = vpop.permute.xlu1 %831 }
 0x568   :  { %v837_v17 = vsel %vm240_vm2, %v832_v15, 0 }
 0x569   :  { %v5542_v62 = vpop.eup %5541 }
 0x56a   :  { %v573_v63 = vsel %vm333_vm3, %v5542_v62, 0.0 }
 0x56b   :  { %574 = vadd.xlane.f32.xlu0 %v573_v63  ;;  %v830_v18 = vpop.permute.xlu1 %829 }
 0x56d   :  { %v5544_v0 = vpop.eup %5543 }
 0x56e   :  { %v576_v1 = vsel %vm333_vm3, %v5544_v0, 0.0 }
 0x56f   :  { %577 = vadd.xlane.f32.xlu0 %v576_v1 }
 0x585   :  { %585 = vrot.lane.b32.xlu0 %v5805_v42, %s5661_s19 }
 0x589   :  { %779 = vrot.lane.b32.xlu0 %v5817_v53, %s5662_s20  ;;  %s5671_s20 = smov 72  }
 0x5f4   :  { %v575_v2 = vpop.xlane.xlu0 %574 }
 0x5f5   :  { %5545 = vrcp.f32 %v575_v2 }
 0x5f8   :  { %v578_v3 = vpop.xlane.xlu0 %577 }
 0x5f9   :  { %5547 = vrcp.f32 %v578_v3 }
 0x5fc   :  { %v586_v4 = vpop.permute.xlu0 %585 }
 0x5fd   :  { %v591_v5 = vsel %vm364_vm4, %v586_v4, 0 }
 0x5fe   :  { %5173 = vmatpush3.bf16.msra.mxu0 %v591_v5 }
 0x5ff   :  { %5184 = vmatprep.subr.bf16.mxu0 %v5657_v16 }
 0x600   :  { %v780_v32 = vpop.permute.xlu0 %779 }
 0x602   :  { %v5546_v6 = vpop.eup %5545 }
 0x603   :  { %v581_v7 = vmul.f32 %v5546_v6, %v5542_v62 }
 0x605   :  { %v583_v8 = vpack.c.bf16 %v581_v7, %v581_v7 }
 0x606   :  { %v5548_v9 = vpop.eup %5547 }
 0x607   :  { %5175 = vmatmul.mubr.msk.bf16.vlgmr.msra.gmra.mxu0 %vm333_vm3, %v583_v8  ;;  %v582_v11 = vmul.f32 %v5548_v9, %v5544_v0 }
 0x608   :  { %5186 = vmatprep.mubr.msk.bf16.mxu0 %vm5658_vm1, %v5657_v16  ;;  %5185 = vmatpush3.bf16.msra.mxu0 %v689_v20  ;;  %v4654_v20 = vld [vmem:[%s6926_s7 + $0x4] sm:$0x3] }
 0x609   :  { %v584_v12 = vpack.c.bf16 %v582_v11, %v582_v11  ;;  %5196 = vmatprep.subr.bf16.mxu0 %v5657_v16 }
 0x60b   :  { %5181 = vmatmul.mubr.msk.bf16.vlgmr.msra.gmra.mxu1 %vm333_vm3, %v584_v12 }
 0x60c   :  { %5191 = vmatpush3.bf16.msra.mxu1 %v736_v13  ;;  %5192 = vmatprep.mubr.msk.bf16.mxu1 %vm5658_vm1, %v5657_v16 }
 0x60d   :  { %5202 = vmatprep.subr.bf16.mxu1 %v5657_v16 }
 0x613   :  { %5193 = vmatmul.mubr.msk.bf16.vlgmr.msra.gmra.mxu1 %vm240_vm2, %v457_v35 }
 0x614   :  { %5203 = vmatpush3.bf16.xpose.msra.mxu1 %v837_v17  ;;  %5204 = vmatprep.mubr.msk.bf16.mxu1 %vm5658_vm1, %v5657_v16 }
 0x615   :  { %5214 = vmatprep.subr.bf16.mxu1 %v5657_v16 }
 0x61b   :  { %5205 = vmatmul.mubr.msk.bf16.vlgmr.msra.gmra.mxu1 %vm240_vm2, %v830_v18 }
 0x61c   :  { %5216 = vmatprep.mubr.msk.bf16.mxu1 %vm5658_vm1, %v5657_v16 }
 0x6c7   :  { %v627_v21 = vpop.f32.mrf.mxu0 }
 0x6c9   :  { %v5176_v22 = vpop.f32.mrf.mxu0 }
 0x6cb   :  { %v630_v23 = vpop.f32.mrf.mxu0  ;;  %v675_v24 = vpop.f32.mrf.mxu1 }
 0x6cc   :  { %v681_v25 = vpack.c.bf16 %v675_v24, %v627_v21  ;;  %v1006_v21 = vsel %vm687_vm5, %v4654_v20, 0 }
 0x6cd   :  { %v5177_v26 = vpop.f32.mrf.mxu0  ;;  %v5182_v27 = vpop.f32.mrf.mxu1 }
 0x6ce   :  { %5187 = vmatmul.mubr.msk.bf16.vlgmr.msra.gmra.mxu0 %vm240_vm2, %v681_v25 }
 0x6cf   :  { %5197 = vmatpush3.bf16.xpose.msra.mxu0 %v787_v28  ;;  %v678_v29 = vpop.f32.mrf.mxu1  ;;  %5198 = vmatprep.mubr.msk.bf16.mxu0 %vm5658_vm1, %v5657_v16 }
 0x6d0   :  { %5208 = vmatprep.subr.bf16.mxu0 %v5657_v16 }
 0x6d1   :  { %v5183_v30 = vpop.f32.mrf.mxu1 }
 0x6d3   :  { %v5912_v31 = vpop.f32.mrf.mxu1 }
 0x6d5   :  { %v5194_v33 = vpop.f32.mrf.mxu1 }
 0x6d6   :  { %5199 = vmatmul.mubr.msk.bf16.vlgmr.msra.gmra.mxu0 %vm240_vm2, %v780_v32 }
 0x6d7   :  { %v5915_v34 = vpop.f32.mrf.mxu1  ;;  %5210 = vmatprep.mubr.msk.bf16.mxu0 %vm5658_vm1, %v5657_v16 }
 0x6d9   :  { %v5195_v35 = vpop.f32.mrf.mxu1 }
 0x6db   :  { %v873_v36 = vpop.f32.mrf.mxu1 }
 0x6dc   :  { %v882_v37 = vsel %vm333_vm3, %v873_v36, -inf }
 0x6dd   :  { %883 = vmax.xlane.f32.xlu1 %v882_v37  ;;  %v5206_v38 = vpop.f32.mrf.mxu1 }
 0x6df   :  { %v876_v39 = vpop.f32.mrf.mxu1 }
 0x6e1   :  { %v5207_v40 = vpop.f32.mrf.mxu1 }
 0x6ee   :  { %951 = vrot.lane.b32.xlu1 %v5812_v51, %s5663_s25 }
 0x6f2   :  { %1053 = vrot.lane.b32.xlu1 %v5805_v42, %s5664_s26 }
 0x6f6   :  { %1103 = vrot.lane.b32.xlu1 %v5812_v51, %s5664_s26 }
 0x6fa   :  { %1101 = vrot.lane.b32.xlu1 %v5824_v55, %s5664_s26 }
 0x766   :  { %v884_v41 = vpop.xlane.xlu1 %883 }
 0x767   :  { %v886_v45 = vsub.f32 %v873_v36, %v884_v41 }
 0x769   :  { %v889_v46 = vmul.f32 1.442695, %v886_v45 }
 0x76a   :  { %v952_v43 = vpop.permute.xlu1 %951 }
 0x76b   :  { %v957_v44 = vsel %vm364_vm4, %v952_v43, 0  ;;  %5549 = vpow2.f32 %v889_v46 }
 0x76c   :  { %5215 = vmatpush3.bf16.msra.mxu1 %v957_v44 }
 0x76d   :  { %5226 = vmatprep.subr.bf16.mxu1 %v5657_v16 }
 0x76e   :  { %v1054_v5 = vpop.permute.xlu1 %1053 }
 0x76f   :  { %v1059_v7 = vsel %vm240_vm2, %v1054_v5, 0 }
 0x772   :  { %v1104_v27 = vpop.permute.xlu1 %1103 }
 0x773   :  { %v1109_v32 = vsel %vm240_vm2, %v1104_v27, 0 }
 0x776   :  { %v1102_v36 = vpop.permute.xlu1 %1101 }
 0x778   :  { %v5550_v56 = vpop.eup %5549 }
 0x779   :  { %v894_v59 = vsel %vm333_vm3, %v5550_v56, 0.0 }
 0x78e   :  { %v5930_v47 = vpop.f32.mrf.mxu0 }
 0x78f   :  { %v773_v43 = vadd.f32 %v5912_v31, %v5930_v47 }
 0x790   :  { %v5188_v48 = vpop.f32.mrf.mxu0 }
 0x792   :  { %v5932_v49 = vpop.f32.mrf.mxu0 }
 0x793   :  { %v776_v48 = vadd.f32 %v5915_v34, %v5932_v49 }
 0x794   :  { %v5189_v50 = vpop.f32.mrf.mxu0 }
 0x796   :  { %v823_v52 = vpop.f32.mrf.mxu0 }
 0x797   :  { %v879_v54 = vsel %vm333_vm3, %v823_v52, -inf }
 0x798   :  { %880 = vmax.xlane.f32.xlu0 %v879_v54  ;;  %v5200_v57 = vpop.f32.mrf.mxu0 }
 0x79a   :  { %v826_v58 = vpop.f32.mrf.mxu0 }
 0x79c   :  { %895 = vadd.xlane.f32.xlu0 %v894_v59  ;;  %v5201_v60 = vpop.f32.mrf.mxu0 }
 0x821   :  { %v881_v61 = vpop.xlane.xlu0 %880 }
 0x822   :  { %v885_v62 = vsub.f32 %v823_v52, %v881_v61 }
 0x824   :  { %v887_v63 = vmul.f32 1.442695, %v885_v62 }
 0x825   :  { %v896_v0 = vpop.xlane.xlu0 %895 }
 0x826   :  { %5551 = vpow2.f32 %v887_v63 }
 0x827   :  { %5553 = vrcp.f32 %v896_v0 }
 0x833   :  { %v5552_v1 = vpop.eup %5551 }
 0x834   :  { %v5554_v2 = vpop.eup %5553  ;;  %v891_v3 = vsel %vm333_vm3, %v5552_v1, 0.0 }
 0x835   :  { %892 = vadd.xlane.f32.xlu0 %v891_v3  ;;  %v900_v4 = vmul.f32 %v5554_v2, %v5550_v56 }
 0x837   :  { %v902_v6 = vpack.c.bf16 %v900_v4, %v900_v4 }
 0x839   :  { %5217 = vmatmul.mubr.msk.bf16.vlgmr.msra.gmra.mxu1 %vm333_vm3, %v902_v6 }
 0x83a   :  { %5227 = vmatpush3.bf16.xpose.msra.mxu1 %v1059_v7  ;;  %5228 = vmatprep.mubr.msk.bf16.mxu1 %vm5658_vm1, %v5657_v16 }
 0x83b   :  { %5238 = vmatprep.subr.bf16.mxu1 %v5657_v16 }
 0x84b   :  { %903 = vrot.lane.b32.xlu0 %v5805_v42, %s5663_s25 }
 0x84f   :  { %1051 = vrot.lane.b32.xlu0 %v5817_v53, %s5664_s26 }
 0x8be   :  { %v893_v8 = vpop.xlane.xlu0 %892 }
 0x8bf   :  { %5555 = vrcp.f32 %v893_v8 }
 0x8c2   :  { %v904_v9 = vpop.permute.xlu0 %903 }
 0x8c3   :  { %v909_v10 = vsel %vm364_vm4, %v904_v9, 0 }
 0x8c4   :  { %5209 = vmatpush3.bf16.msra.mxu0 %v909_v10 }
 0x8c5   :  { %5220 = vmatprep.subr.bf16.mxu0 %v5657_v16 }
 0x8c6   :  { %v1052_v11 = vpop.permute.xlu0 %1051 }
 0x8c7   :  { %5229 = vmatmul.mubr.msk.bf16.vlgmr.msra.gmra.mxu1 %vm240_vm2, %v1052_v11 }
 0x8c8   :  { %5240 = vmatprep.mubr.msk.bf16.mxu1 %vm5658_vm1, %v5657_v16 }
 0x8cc   :  { %v5556_v12 = vpop.eup %5555 }
 0x8cd   :  { %v899_v13 = vmul.f32 %v5556_v12, %v5552_v1 }
 0x8cf   :  { %v901_v14 = vpack.c.bf16 %v899_v13, %v899_v13  ;;  %v4660_v13 = vld [vmem:[%s6926_s7 + $0x6] sm:$0x3] }
 0x8d1   :  { %5211 = vmatmul.mubr.msk.bf16.vlgmr.msra.gmra.mxu0 %vm333_vm3, %v901_v14  ;;  %v1278_v14 = vsel %vm687_vm5, %v4660_v13, 0 }
 0x8d2   :  { %5222 = vmatprep.mubr.msk.bf16.mxu0 %vm5658_vm1, %v5657_v16  ;;  %5221 = vmatpush3.bf16.msra.mxu0 %v1006_v21 }
 0x8d3   :  { %5232 = vmatprep.subr.bf16.mxu0 %v5657_v16 }
 0x8f9   :  { %v993_v15 = vpop.f32.mrf.mxu1 }
 0x8fb   :  { %v5218_v17 = vpop.f32.mrf.mxu1 }
 0x8fd   :  { %v996_v18 = vpop.f32.mrf.mxu1 }
 0x8ff   :  { %v5219_v19 = vpop.f32.mrf.mxu1 }
 0x987   :  { %v1095_v22 = vpop.f32.mrf.mxu1 }
 0x988   :  { %v1151_v23 = vsel %vm333_vm3, %v1095_v22, -inf }
 0x989   :  { %1152 = vmax.xlane.f32.xlu0 %v1151_v23  ;;  %v5230_v24 = vpop.f32.mrf.mxu1 }
 0x98b   :  { %v1098_v25 = vpop.f32.mrf.mxu1 }
 0x98d   :  { %v5231_v26 = vpop.f32.mrf.mxu1 }
 0x991   :  { %v945_v28 = vpop.f32.mrf.mxu0 }
 0x992   :  { %v999_v29 = vpack.c.bf16 %v993_v15, %v945_v28 }
 0x993   :  { %v5212_v30 = vpop.f32.mrf.mxu0 }
 0x994   :  { %5223 = vmatmul.mubr.msk.bf16.vlgmr.msra.gmra.mxu0 %vm240_vm2, %v999_v29 }
 0x995   :  { %5233 = vmatpush3.bf16.xpose.msra.mxu0 %v1109_v32  ;;  %v948_v33 = vpop.f32.mrf.mxu0  ;;  %5234 = vmatprep.mubr.msk.bf16.mxu0 %vm5658_vm1, %v5657_v16 }
 0x996   :  { %5244 = vmatprep.subr.bf16.mxu0 %v5657_v16 }
 0x997   :  { %v5213_v35 = vpop.f32.mrf.mxu0 }
 0x99c   :  { %5235 = vmatmul.mubr.msk.bf16.vlgmr.msra.gmra.mxu0 %vm240_vm2, %v1102_v36 }
 0x99d   :  { %5246 = vmatprep.mubr.msk.bf16.mxu0 %vm5658_vm1, %v5657_v16 }
 0xa12   :  { %v1153_v37 = vpop.xlane.xlu0 %1152 }
 0xa13   :  { %v1157_v38 = vsub.f32 %v1095_v22, %v1153_v37 }
 0xa15   :  { %v1159_v39 = vmul.f32 1.442695, %v1157_v38 }
 0xa17   :  { %5557 = vpow2.f32 %v1159_v39 }
 0xa24   :  { %v5558_v40 = vpop.eup %5557 }
 0xa25   :  { %v1163_v41 = vsel %vm333_vm3, %v5558_v40, 0.0 }
 0xa26   :  { %1164 = vadd.xlane.f32.xlu0 %v1163_v41 }
 0xa54   :  { %v1042_v44 = vpop.f32.mrf.mxu0 }
 0xa55   :  { %v5971_v45 = vadd.f32 %v1042_v44, %v773_v43 }
 0xa56   :  { %v5224_v46 = vpop.f32.mrf.mxu0 }
 0xa58   :  { %v1045_v50 = vpop.f32.mrf.mxu0 }
 0xa59   :  { %v5975_v52 = vadd.f32 %v1045_v50, %v776_v48 }
 0xa5a   :  { %v5225_v54 = vpop.f32.mrf.mxu0 }
 0xa5c   :  { %v1145_v56 = vpop.f32.mrf.mxu0 }
 0xa5d   :  { %v1154_v57 = vsel %vm333_vm3, %v1145_v56, -inf }
 0xa5e   :  { %1155 = vmax.xlane.f32.xlu1 %v1154_v57  ;;  %v5236_v58 = vpop.f32.mrf.mxu0 }
 0xa60   :  { %v1148_v59 = vpop.f32.mrf.mxu0 }
 0xa62   :  { %v5237_v60 = vpop.f32.mrf.mxu0 }
 0xa6f   :  { %1223 = vrot.lane.b32.xlu1 %v5812_v51, %s5665_s29 }
 0xa73   :  { %1325 = vrot.lane.b32.xlu1 %v5805_v42, %s5666_s3 }
 0xa77   :  { %1375 = vrot.lane.b32.xlu1 %v5812_v51, %s5666_s3 }
 0xa7b   :  { %1373 = vrot.lane.b32.xlu1 %v5824_v55, %s5666_s3 }
 0xaaf   :  { %v1165_v0 = vpop.xlane.xlu0 %1164 }
 0xae7   :  { %v1156_v31 = vpop.xlane.xlu1 %1155 }
 0xae8   :  { %v1158_v34 = vsub.f32 %v1145_v56, %v1156_v31 }
 0xaea   :  { %v1161_v47 = vmul.f32 1.442695, %v1158_v34 }
 0xaeb   :  { %v1224_v49 = vpop.permute.xlu1 %1223 }
 0xaec   :  { %5559 = vpow2.f32 %v1161_v47  ;;  %v1229_v61 = vsel %vm364_vm4, %v1224_v49, 0 }
 0xaed   :  { %5245 = vmatpush3.bf16.msra.mxu0 %v1229_v61  ;;  %5561 = vrcp.f32 %v1165_v0 }
 0xaee   :  { %5256 = vmatprep.subr.bf16.mxu0 %v5657_v16 }
 0xaef   :  { %v1326_v9 = vpop.permute.xlu1 %1325 }
 0xaf0   :  { %v1331_v11 = vsel %vm240_vm2, %v1326_v9, 0  ;;  %v4666_v9 = vld [vmem:[%s6926_s7 + $0x8] sm:$0x3] }
 0xaf3   :  { %v1376_v20 = vpop.permute.xlu1 %1375 }
 0xaf4   :  { %v1381_v24 = vsel %vm240_vm2, %v1376_v20, 0 }
 0xaf7   :  { %v1374_v29 = vpop.permute.xlu1 %1373 }
 0xaf9   :  { %v5560_v62 = vpop.eup %5559 }
 0xafa   :  { %v1166_v63 = vsel %vm333_vm3, %v5560_v62, 0.0  ;;  %v5562_v1 = vpop.eup %5561 }
 0xafb   :  { %1167 = vadd.xlane.f32.xlu0 %v1166_v63  ;;  %v1171_v3 = vmul.f32 %v5562_v1, %v5558_v40 }
 0xafd   :  { %v1173_v6 = vpack.c.bf16 %v1171_v3, %v1171_v3 }
 0xb11   :  { %1175 = vrot.lane.b32.xlu0 %v5805_v42, %s5665_s29 }
 0xb15   :  { %1323 = vrot.lane.b32.xlu0 %v5817_v53, %s5666_s3 }
 0xb84   :  { %v1168_v2 = vpop.xlane.xlu0 %1167 }
 0xb85   :  { %5563 = vrcp.f32 %v1168_v2 }
 0xb88   :  { %v1176_v4 = vpop.permute.xlu0 %1175 }
 0xb89   :  { %v1181_v5 = vsel %vm364_vm4, %v1176_v4, 0 }
 0xb8a   :  { %5239 = vmatpush3.bf16.msra.mxu1 %v1181_v5 }
 0xb8b   :  { %5250 = vmatprep.subr.bf16.mxu1 %v5657_v16 }
 0xb8c   :  { %v1324_v12 = vpop.permute.xlu0 %1323 }
 0xb8d   :  { %5241 = vmatmul.mubr.msk.bf16.vlgmr.msra.gmra.mxu1 %vm333_vm3, %v1173_v6 }
 0xb8e   :  { %5252 = vmatprep.mubr.msk.bf16.mxu1 %vm5658_vm1, %v5657_v16  ;;  %5251 = vmatpush3.bf16.msra.mxu1 %v1278_v14 }
 0xb8f   :  { %5262 = vmatprep.subr.bf16.mxu1 %v5657_v16 }
 0xb92   :  { %v5564_v7 = vpop.eup %5563 }
 0xb93   :  { %v1172_v8 = vmul.f32 %v5564_v7, %v5560_v62 }
 0xb95   :  { %v1174_v10 = vpack.c.bf16 %v1172_v8, %v1172_v8 }
 0xb97   :  { %5247 = vmatmul.mubr.msk.bf16.vlgmr.msra.gmra.mxu0 %vm333_vm3, %v1174_v10  ;;  %v1550_v10 = vsel %vm687_vm5, %v4666_v9, 0 }
 0xb98   :  { %5257 = vmatpush3.bf16.xpose.msra.mxu0 %v1331_v11  ;;  %5258 = vmatprep.mubr.msk.bf16.mxu0 %vm5658_vm1, %v5657_v16 }
 0xb99   :  { %5268 = vmatprep.subr.bf16.mxu0 %v5657_v16 }
 0xb9f   :  { %5259 = vmatmul.mubr.msk.bf16.vlgmr.msra.gmra.mxu0 %vm240_vm2, %v1324_v12 }
 0xba0   :  { %5270 = vmatprep.mubr.msk.bf16.mxu0 %vm5658_vm1, %v5657_v16 }
 0xc4d   :  { %v1217_v15 = vpop.f32.mrf.mxu1 }
 0xc4f   :  { %v5242_v17 = vpop.f32.mrf.mxu1 }
 0xc51   :  { %v1220_v18 = vpop.f32.mrf.mxu1 }
 0xc53   :  { %v5243_v19 = vpop.f32.mrf.mxu1 }
 0xc57   :  { %v1265_v21 = vpop.f32.mrf.mxu0 }
 0xc58   :  { %v1271_v22 = vpack.c.bf16 %v1265_v21, %v1217_v15 }
 0xc59   :  { %v5248_v23 = vpop.f32.mrf.mxu0 }
 0xc5a   :  { %5253 = vmatmul.mubr.msk.bf16.vlgmr.msra.gmra.mxu1 %vm240_vm2, %v1271_v22 }
 0xc5b   :  { %5263 = vmatpush3.bf16.xpose.msra.mxu1 %v1381_v24  ;;  %v1268_v25 = vpop.f32.mrf.mxu0  ;;  %5264 = vmatprep.mubr.msk.bf16.mxu1 %vm5658_vm1, %v5657_v16 }
 0xc5c   :  { %5274 = vmatprep.subr.bf16.mxu1 %v5657_v16 }
 0xc5d   :  { %v5249_v26 = vpop.f32.mrf.mxu0 }
 0xc5f   :  { %v1367_v27 = vpop.f32.mrf.mxu0 }
 0xc60   :  { %v1423_v28 = vsel %vm333_vm3, %v1367_v27, -inf }
 0xc61   :  { %1424 = vmax.xlane.f32.xlu0 %v1423_v28  ;;  %v5260_v30 = vpop.f32.mrf.mxu0 }
 0xc62   :  { %5265 = vmatmul.mubr.msk.bf16.vlgmr.msra.gmra.mxu1 %vm240_vm2, %v1374_v29 }
 0xc63   :  { %v1370_v32 = vpop.f32.mrf.mxu0  ;;  %5276 = vmatprep.mubr.msk.bf16.mxu1 %vm5658_vm1, %v5657_v16 }
 0xc65   :  { %v5261_v33 = vpop.f32.mrf.mxu0 }
 0xcea   :  { %v1425_v35 = vpop.xlane.xlu0 %1424 }
 0xceb   :  { %v1429_v36 = vsub.f32 %v1367_v27, %v1425_v35 }
 0xced   :  { %v1431_v37 = vmul.f32 1.442695, %v1429_v36 }
 0xcef   :  { %5565 = vpow2.f32 %v1431_v37 }
 0xcfc   :  { %v5566_v38 = vpop.eup %5565 }
 0xcfd   :  { %v1435_v39 = vsel %vm333_vm3, %v5566_v38, 0.0 }
 0xcfe   :  { %1436 = vadd.xlane.f32.xlu0 %v1435_v39 }
 0xd1a   :  { %v1314_v40 = vpop.f32.mrf.mxu1 }
 0xd1b   :  { %v6016_v41 = vadd.f32 %v1314_v40, %v5971_v45 }
 0xd1c   :  { %v5254_v43 = vpop.f32.mrf.mxu1 }
 0xd1e   :  { %v1317_v44 = vpop.f32.mrf.mxu1 }
 0xd1f   :  { %v6019_v46 = vadd.f32 %v1317_v44, %v5975_v52 }
 0xd20   :  { %v5255_v48 = vpop.f32.mrf.mxu1 }
 0xd22   :  { %v1417_v50 = vpop.f32.mrf.mxu1 }
 0xd23   :  { %v1426_v54 = vsel %vm333_vm3, %v1417_v50, -inf }
 0xd24   :  { %1427 = vmax.xlane.f32.xlu1 %v1426_v54  ;;  %v5266_v56 = vpop.f32.mrf.mxu1 }
 0xd26   :  { %v1420_v57 = vpop.f32.mrf.mxu1 }
 0xd28   :  { %v5267_v58 = vpop.f32.mrf.mxu1 }
 0xd35   :  { %1495 = vrot.lane.b32.xlu1 %v5812_v51, %s5667_s16 }
 0xd39   :  { %1597 = vrot.lane.b32.xlu1 %v5805_v42, %s5668_s1 }
 0xd3d   :  { %1647 = vrot.lane.b32.xlu1 %v5812_v51, %s5668_s1 }
 0xd41   :  { %1645 = vrot.lane.b32.xlu1 %v5824_v55, %s5668_s1 }
 0xd87   :  { %v1437_v49 = vpop.xlane.xlu0 %1436 }
 0xdad   :  { %v1428_v45 = vpop.xlane.xlu1 %1427 }
 0xdae   :  { %v1430_v52 = vsub.f32 %v1417_v50, %v1428_v45 }
 0xdb0   :  { %v1433_v59 = vmul.f32 1.442695, %v1430_v52 }
 0xdb1   :  { %v1496_v60 = vpop.permute.xlu1 %1495 }
 0xdb2   :  { %5567 = vpow2.f32 %v1433_v59  ;;  %v1501_v31 = vsel %vm364_vm4, %v1496_v60, 0 }
 0xdb3   :  { %5275 = vmatpush3.bf16.msra.mxu1 %v1501_v31  ;;  %5569 = vrcp.f32 %v1437_v49 }
 0xdb4   :  { %5286 = vmatprep.subr.bf16.mxu1 %v5657_v16 }
 0xdb5   :  { %v1598_v5 = vpop.permute.xlu1 %1597 }
 0xdb6   :  { %v1603_v7 = vsel %vm240_vm2, %v1598_v5, 0  ;;  %v4672_v5 = vld [vmem:[%s6926_s7 + $0xa] sm:$0x3] }
 0xdb9   :  { %v1648_v15 = vpop.permute.xlu1 %1647 }
 0xdba   :  { %v1653_v20 = vsel %vm240_vm2, %v1648_v15, 0 }
 0xdbd   :  { %v1646_v25 = vpop.permute.xlu1 %1645 }
 0xdbf   :  { %v5568_v34 = vpop.eup %5567 }
 0xdc0   :  { %v1438_v47 = vsel %vm333_vm3, %v5568_v34, 0.0  ;;  %v5570_v61 = vpop.eup %5569 }
 0xdc1   :  { %1439 = vadd.xlane.f32.xlu0 %v1438_v47  ;;  %v1443_v63 = vmul.f32 %v5570_v61, %v5566_v38 }
 0xdc3   :  { %v1445_v2 = vpack.c.bf16 %v1443_v63, %v1443_v63 }
 0xdd7   :  { %1447 = vrot.lane.b32.xlu0 %v5805_v42, %s5667_s16 }
 0xddb   :  { %1595 = vrot.lane.b32.xlu0 %v5817_v53, %s5668_s1 }
 0xe4a   :  { %v1440_v62 = vpop.xlane.xlu0 %1439 }
 0xe4b   :  { %5571 = vrcp.f32 %v1440_v62 }
 0xe4e   :  { %v1448_v0 = vpop.permute.xlu0 %1447 }
 0xe4f   :  { %v1453_v1 = vsel %vm364_vm4, %v1448_v0, 0 }
 0xe50   :  { %5269 = vmatpush3.bf16.msra.mxu0 %v1453_v1 }
 0xe51   :  { %5280 = vmatprep.subr.bf16.mxu0 %v5657_v16 }
 0xe52   :  { %v1596_v8 = vpop.permute.xlu0 %1595 }
 0xe53   :  { %5271 = vmatmul.mubr.msk.bf16.vlgmr.msra.gmra.mxu0 %vm333_vm3, %v1445_v2 }
 0xe54   :  { %5282 = vmatprep.mubr.msk.bf16.mxu0 %vm5658_vm1, %v5657_v16  ;;  %5281 = vmatpush3.bf16.msra.mxu0 %v1550_v10 }
 0xe55   :  { %5292 = vmatprep.subr.bf16.mxu0 %v5657_v16 }
 0xe58   :  { %v5572_v3 = vpop.eup %5571 }
 0xe59   :  { %v1444_v4 = vmul.f32 %v5572_v3, %v5568_v34 }
 0xe5b   :  { %v1446_v6 = vpack.c.bf16 %v1444_v4, %v1444_v4 }
 0xe5d   :  { %5277 = vmatmul.mubr.msk.bf16.vlgmr.msra.gmra.mxu1 %vm333_vm3, %v1446_v6  ;;  %v1822_v6 = vsel %vm687_vm5, %v4672_v5, 0 }
 0xe5e   :  { %5287 = vmatpush3.bf16.xpose.msra.mxu1 %v1603_v7  ;;  %5288 = vmatprep.mubr.msk.bf16.mxu1 %vm5658_vm1, %v5657_v16 }
 0xe5f   :  { %5298 = vmatprep.subr.bf16.mxu1 %v5657_v16 }
 0xe65   :  { %5289 = vmatmul.mubr.msk.bf16.vlgmr.msra.gmra.mxu1 %vm240_vm2, %v1596_v8 }
 0xe66   :  { %5300 = vmatprep.mubr.msk.bf16.mxu1 %vm5658_vm1, %v5657_v16 }
 0xf13   :  { %v1489_v11 = vpop.f32.mrf.mxu0 }
 0xf15   :  { %v5272_v12 = vpop.f32.mrf.mxu0 }
 0xf17   :  { %v1492_v13 = vpop.f32.mrf.mxu0 }
 0xf19   :  { %v5273_v14 = vpop.f32.mrf.mxu0 }
 0xf1d   :  { %v1537_v17 = vpop.f32.mrf.mxu1 }
 0xf1e   :  { %v1543_v18 = vpack.c.bf16 %v1537_v17, %v1489_v11 }
 0xf1f   :  { %v5278_v19 = vpop.f32.mrf.mxu1 }
 0xf20   :  { %5283 = vmatmul.mubr.msk.bf16.vlgmr.msra.gmra.mxu0 %vm240_vm2, %v1543_v18 }
 0xf21   :  { %5293 = vmatpush3.bf16.xpose.msra.mxu0 %v1653_v20  ;;  %v1540_v21 = vpop.f32.mrf.mxu1  ;;  %5294 = vmatprep.mubr.msk.bf16.mxu0 %vm5658_vm1, %v5657_v16 }
 0xf22   :  { %5304 = vmatprep.subr.bf16.mxu0 %v5657_v16 }
 0xf23   :  { %v5279_v22 = vpop.f32.mrf.mxu1 }
 0xf25   :  { %v1639_v23 = vpop.f32.mrf.mxu1 }
 0xf26   :  { %v1695_v24 = vsel %vm333_vm3, %v1639_v23, -inf }
 0xf27   :  { %1696 = vmax.xlane.f32.xlu0 %v1695_v24  ;;  %v5290_v26 = vpop.f32.mrf.mxu1 }
 0xf28   :  { %5295 = vmatmul.mubr.msk.bf16.vlgmr.msra.gmra.mxu0 %vm240_vm2, %v1646_v25 }
 0xf29   :  { %v1642_v27 = vpop.f32.mrf.mxu1  ;;  %5306 = vmatprep.mubr.msk.bf16.mxu0 %vm5658_vm1, %v5657_v16 }
 0xf2b   :  { %v5291_v28 = vpop.f32.mrf.mxu1 }
 0xfb0   :  { %v1697_v29 = vpop.xlane.xlu0 %1696 }
 0xfb1   :  { %v1701_v30 = vsub.f32 %v1639_v23, %v1697_v29 }
 0xfb3   :  { %v1703_v32 = vmul.f32 1.442695, %v1701_v30 }
 0xfb5   :  { %5573 = vpow2.f32 %v1703_v32 }
 0xfc2   :  { %v5574_v33 = vpop.eup %5573 }
 0xfc3   :  { %v1707_v35 = vsel %vm333_vm3, %v5574_v33, 0.0 }
 0xfc4   :  { %1708 = vadd.xlane.f32.xlu0 %v1707_v35 }
 0xfe0   :  { %v1586_v36 = vpop.f32.mrf.mxu0 }
 0xfe1   :  { %v6060_v37 = vadd.f32 %v1586_v36, %v6016_v41 }
 0xfe2   :  { %v5284_v38 = vpop.f32.mrf.mxu0 }
 0xfe4   :  { %v1589_v39 = vpop.f32.mrf.mxu0 }
 0xfe5   :  { %v6063_v40 = vadd.f32 %v1589_v39, %v6019_v46 }
 0xfe6   :  { %v5285_v43 = vpop.f32.mrf.mxu0 }
 0xfe8   :  { %v1689_v44 = vpop.f32.mrf.mxu0 }
 0xfe9   :  { %v1698_v48 = vsel %vm333_vm3, %v1689_v44, -inf }
 0xfea   :  { %1699 = vmax.xlane.f32.xlu1 %v1698_v48  ;;  %v5296_v50 = vpop.f32.mrf.mxu0 }
 0xfec   :  { %v1692_v54 = vpop.f32.mrf.mxu0 }
 0xfee   :  { %v5297_v56 = vpop.f32.mrf.mxu0 }
 0xffb   :  { %1767 = vrot.lane.b32.xlu1 %v5812_v51, %s5669_s18 }
 0xfff   :  { %1869 = vrot.lane.b32.xlu1 %v5805_v42, %s5670_s4 }
0x1003   :  { %1919 = vrot.lane.b32.xlu1 %v5812_v51, %s5670_s4 }
0x1007   :  { %1917 = vrot.lane.b32.xlu1 %v5824_v55, %s5670_s4 }
0x104d   :  { %v1709_v60 = vpop.xlane.xlu0 %1708 }
0x1073   :  { %v1700_v41 = vpop.xlane.xlu1 %1699 }
0x1074   :  { %v1702_v46 = vsub.f32 %v1689_v44, %v1700_v41 }
0x1076   :  { %v1705_v57 = vmul.f32 1.442695, %v1702_v46 }
0x1077   :  { %v1768_v58 = vpop.permute.xlu1 %1767 }
0x1078   :  { %5575 = vpow2.f32 %v1705_v57  ;;  %v1773_v45 = vsel %vm364_vm4, %v1768_v58, 0 }
0x1079   :  { %5305 = vmatpush3.bf16.msra.mxu0 %v1773_v45  ;;  %5577 = vrcp.f32 %v1709_v60 }
0x107a   :  { %5316 = vmatprep.subr.bf16.mxu0 %v5657_v16 }
0x107b   :  { %v1870_v1 = vpop.permute.xlu1 %1869 }
0x107c   :  { %v1875_v3 = vsel %vm240_vm2, %v1870_v1, 0 }
0x107f   :  { %v1920_v11 = vpop.permute.xlu1 %1919 }
0x1080   :  { %v1925_v15 = vsel %vm240_vm2, %v1920_v11, 0 }
0x1083   :  { %v1918_v21 = vpop.permute.xlu1 %1917 }
0x1085   :  { %v5576_v52 = vpop.eup %5575 }
0x1086   :  { %v1710_v59 = vsel %vm333_vm3, %v5576_v52, 0.0  ;;  %v5578_v31 = vpop.eup %5577 }
0x1087   :  { %1711 = vadd.xlane.f32.xlu0 %v1710_v59  ;;  %v1715_v47 = vmul.f32 %v5578_v31, %v5574_v33 }
0x1089   :  { %v1717_v62 = vpack.c.bf16 %v1715_v47, %v1715_v47 }
0x109d   :  { %1719 = vrot.lane.b32.xlu0 %v5805_v42, %s5669_s18 }
0x10a1   :  { %1867 = vrot.lane.b32.xlu0 %v5817_v53, %s5670_s4 }
0x1110   :  { %v1712_v34 = vpop.xlane.xlu0 %1711 }
0x1111   :  { %5579 = vrcp.f32 %v1712_v34 }
0x1114   :  { %v1720_v49 = vpop.permute.xlu0 %1719 }
0x1115   :  { %v1725_v61 = vsel %vm364_vm4, %v1720_v49, 0 }
0x1116   :  { %5299 = vmatpush3.bf16.msra.mxu1 %v1725_v61 }
0x1117   :  { %5310 = vmatprep.subr.bf16.mxu1 %v5657_v16 }
0x1118   :  { %v1868_v4 = vpop.permute.xlu0 %1867 }
0x1119   :  { %5301 = vmatmul.mubr.msk.bf16.vlgmr.msra.gmra.mxu1 %vm333_vm3, %v1717_v62 }
0x111a   :  { %5312 = vmatprep.mubr.msk.bf16.mxu1 %vm5658_vm1, %v5657_v16  ;;  %5311 = vmatpush3.bf16.msra.mxu1 %v1822_v6 }
0x111b   :  { %5322 = vmatprep.subr.bf16.mxu1 %v5657_v16 }
0x111e   :  { %v5580_v63 = vpop.eup %5579 }
0x111f   :  { %v1716_v0 = vmul.f32 %v5580_v63, %v5576_v52  ;;  %v4678_v63 = vld [vmem:[%s6926_s7 + $0xc] sm:$0x3] }
0x1121   :  { %v1718_v2 = vpack.c.bf16 %v1716_v0, %v1716_v0  ;;  %v2094_v0 = vsel %vm687_vm5, %v4678_v63, 0 }
0x1123   :  { %5307 = vmatmul.mubr.msk.bf16.vlgmr.msra.gmra.mxu0 %vm333_vm3, %v1718_v2 }
0x1124   :  { %5317 = vmatpush3.bf16.xpose.msra.mxu0 %v1875_v3  ;;  %5318 = vmatprep.mubr.msk.bf16.mxu0 %vm5658_vm1, %v5657_v16 }
0x1125   :  { %5328 = vmatprep.subr.bf16.mxu0 %v5657_v16 }
0x112b   :  { %5319 = vmatmul.mubr.msk.bf16.vlgmr.msra.gmra.mxu0 %vm240_vm2, %v1868_v4 }
0x112c   :  { %5330 = vmatprep.mubr.msk.bf16.mxu0 %vm5658_vm1, %v5657_v16 }
0x11d9   :  { %v1761_v7 = vpop.f32.mrf.mxu1 }
0x11db   :  { %v5302_v8 = vpop.f32.mrf.mxu1 }
0x11dd   :  { %v1764_v9 = vpop.f32.mrf.mxu1 }
0x11df   :  { %v5303_v10 = vpop.f32.mrf.mxu1 }
0x11e3   :  { %v1809_v12 = vpop.f32.mrf.mxu0 }
0x11e4   :  { %v1815_v13 = vpack.c.bf16 %v1809_v12, %v1761_v7 }
0x11e5   :  { %v5308_v14 = vpop.f32.mrf.mxu0 }
0x11e6   :  { %5313 = vmatmul.mubr.msk.bf16.vlgmr.msra.gmra.mxu1 %vm240_vm2, %v1815_v13 }
0x11e7   :  { %5323 = vmatpush3.bf16.xpose.msra.mxu1 %v1925_v15  ;;  %v1812_v17 = vpop.f32.mrf.mxu0  ;;  %5324 = vmatprep.mubr.msk.bf16.mxu1 %vm5658_vm1, %v5657_v16 }
0x11e8   :  { %5334 = vmatprep.subr.bf16.mxu1 %v5657_v16 }
0x11e9   :  { %v5309_v18 = vpop.f32.mrf.mxu0 }
0x11eb   :  { %v1911_v19 = vpop.f32.mrf.mxu0 }
0x11ec   :  { %v1967_v20 = vsel %vm333_vm3, %v1911_v19, -inf }
0x11ed   :  { %1968 = vmax.xlane.f32.xlu0 %v1967_v20  ;;  %v5320_v22 = vpop.f32.mrf.mxu0 }
0x11ee   :  { %5325 = vmatmul.mubr.msk.bf16.vlgmr.msra.gmra.mxu1 %vm240_vm2, %v1918_v21 }
0x11ef   :  { %v1914_v23 = vpop.f32.mrf.mxu0  ;;  %5336 = vmatprep.mubr.msk.bf16.mxu1 %vm5658_vm1, %v5657_v16 }
0x11f1   :  { %v5321_v24 = vpop.f32.mrf.mxu0 }
0x1276   :  { %v1969_v25 = vpop.xlane.xlu0 %1968 }
0x1277   :  { %v1973_v26 = vsub.f32 %v1911_v19, %v1969_v25 }
0x1279   :  { %v1975_v27 = vmul.f32 1.442695, %v1973_v26 }
0x127b   :  { %5581 = vpow2.f32 %v1975_v27 }
0x1288   :  { %v5582_v28 = vpop.eup %5581 }
0x1289   :  { %v1979_v29 = vsel %vm333_vm3, %v5582_v28, 0.0 }
0x128a   :  { %1980 = vadd.xlane.f32.xlu0 %v1979_v29 }
0x12a6   :  { %v1858_v30 = vpop.f32.mrf.mxu1 }
0x12a7   :  { %v6104_v32 = vadd.f32 %v1858_v30, %v6060_v37 }
0x12a8   :  { %v5314_v33 = vpop.f32.mrf.mxu1 }
0x12aa   :  { %v1861_v35 = vpop.f32.mrf.mxu1 }
0x12ab   :  { %v6107_v36 = vadd.f32 %v1861_v35, %v6063_v40 }
0x12ac   :  { %v5315_v38 = vpop.f32.mrf.mxu1 }
0x12ae   :  { %v1961_v39 = vpop.f32.mrf.mxu1 }
0x12af   :  { %v1970_v43 = vsel %vm333_vm3, %v1961_v39, -inf }
0x12b0   :  { %1971 = vmax.xlane.f32.xlu1 %v1970_v43  ;;  %v5326_v44 = vpop.f32.mrf.mxu1 }
0x12b2   :  { %v1964_v48 = vpop.f32.mrf.mxu1 }
0x12b4   :  { %v5327_v50 = vpop.f32.mrf.mxu1 }
0x12c1   :  { %2039 = vrot.lane.b32.xlu1 %v5812_v51, %s5671_s20 }
0x12c5   :  { %2141 = vrot.lane.b32.xlu1 %v5805_v42, %s5672_s21 }
0x12c9   :  { %2191 = vrot.lane.b32.xlu1 %v5812_v51, %s5672_s21 }
0x12cd   :  { %2189 = vrot.lane.b32.xlu1 %v5824_v55, %s5672_s21 }
0x1313   :  { %v1981_v58 = vpop.xlane.xlu0 %1980 }
0x1339   :  { %v1972_v37 = vpop.xlane.xlu1 %1971 }
0x133a   :  { %v1974_v40 = vsub.f32 %v1961_v39, %v1972_v37 }
0x133c   :  { %v1977_v54 = vmul.f32 1.442695, %v1974_v40 }
0x133d   :  { %v2040_v56 = vpop.permute.xlu1 %2039 }
0x133e   :  { %5583 = vpow2.f32 %v1977_v54  ;;  %v2045_v41 = vsel %vm364_vm4, %v2040_v56, 0 }
0x133f   :  { %5335 = vmatpush3.bf16.msra.mxu1 %v2045_v41  ;;  %5585 = vrcp.f32 %v1981_v58 }
0x1340   :  { %5346 = vmatprep.subr.bf16.mxu1 %v5657_v16 }
0x1341   :  { %v2142_v47 = vpop.permute.xlu1 %2141 }
0x1342   :  { %v2147_v61 = vsel %vm240_vm2, %v2142_v47, 0 }
0x1345   :  { %v2192_v5 = vpop.permute.xlu1 %2191 }
0x1346   :  { %v2197_v9 = vsel %vm240_vm2, %v2192_v5, 0 }
0x1349   :  { %v2190_v14 = vpop.permute.xlu1 %2189 }
0x134b   :  { %v5584_v46 = vpop.eup %5583 }
0x134c   :  { %v1982_v57 = vsel %vm333_vm3, %v5584_v46, 0.0  ;;  %v5586_v55 = vpop.eup %5585 }
0x134d   :  { %1983 = vadd.xlane.f32.xlu0 %v1982_v57  ;;  %v1987_v52 = vmul.f32 %v5586_v55, %v5582_v28 }
0x134f   :  { %v1989_v31 = vpack.c.bf16 %v1987_v52, %v1987_v52 }
0x1363   :  { %1991 = vrot.lane.b32.xlu0 %v5805_v42, %s5671_s20 }
0x1367   :  { %2139 = vrot.lane.b32.xlu0 %v5817_v53, %s5672_s21 }
0x13d6   :  { %v1984_v45 = vpop.xlane.xlu0 %1983 }
0x13d7   :  { %5587 = vrcp.f32 %v1984_v45  ;;  %v4684_v45 = vld [vmem:[%s6926_s7 + $0xe] sm:$0x3] }
0x13d8   :  { %v2366_v52 = vsel %vm687_vm5, %v4684_v45, 0 }
0x13da   :  { %v1992_v59 = vpop.permute.xlu0 %1991 }
0x13db   :  { %v1997_v60 = vsel %vm364_vm4, %v1992_v59, 0 }
0x13dc   :  { %5329 = vmatpush3.bf16.msra.mxu0 %v1997_v60 }
0x13dd   :  { %5340 = vmatprep.subr.bf16.mxu0 %v5657_v16 }
0x13de   :  { %v2140_v62 = vpop.permute.xlu0 %2139 }
0x13df   :  { %5331 = vmatmul.mubr.msk.bf16.vlgmr.msra.gmra.mxu0 %vm333_vm3, %v1989_v31 }
0x13e0   :  { %5342 = vmatprep.mubr.msk.bf16.mxu0 %vm5658_vm1, %v5657_v16  ;;  %5341 = vmatpush3.bf16.msra.mxu0 %v2094_v0  ;;  %v4686_v0 = vld [vmem:[%s6927_s8] ss:$0 sm:$0xff] }
0x13e1   :  { %5352 = vmatprep.subr.bf16.mxu0 %v5657_v16 }
0x13e4   :  { %v5588_v34 = vpop.eup %5587 }
0x13e5   :  { %v1988_v53 = vmul.f32 %v5588_v34, %v5584_v46 }
0x13e7   :  { %v1990_v49 = vpack.c.bf16 %v1988_v53, %v1988_v53 }
0x13e9   :  { %5337 = vmatmul.mubr.msk.bf16.vlgmr.msra.gmra.mxu1 %vm333_vm3, %v1990_v49 }
0x13ea   :  { %5347 = vmatpush3.bf16.xpose.msra.mxu1 %v2147_v61  ;;  %5348 = vmatprep.mubr.msk.bf16.mxu1 %vm5658_vm1, %v5657_v16 }
0x13eb   :  { %5358 = vmatprep.subr.bf16.mxu1 %v5657_v16 }
0x13f1   :  { %5349 = vmatmul.mubr.msk.bf16.vlgmr.msra.gmra.mxu1 %vm240_vm2, %v2140_v62 }
0x13f2   :  { %5360 = vmatprep.mubr.msk.bf16.mxu1 %vm5658_vm1, %v5657_v16 }
0x149f   :  { %v2033_v1 = vpop.f32.mrf.mxu0 }
0x14a1   :  { %v5332_v2 = vpop.f32.mrf.mxu0 }
0x14a2   :  { %v5633_v2 = vld [vmem:[%s6919_s0] sm:$0xff] }
0x14a3   :  { %v2036_v3 = vpop.f32.mrf.mxu0 }
0x14a5   :  { %v5333_v4 = vpop.f32.mrf.mxu0 }
0x14a9   :  { %v2081_v6 = vpop.f32.mrf.mxu1 }
0x14aa   :  { %v2087_v7 = vpack.c.bf16 %v2081_v6, %v2033_v1 }
0x14ab   :  { %v5338_v8 = vpop.f32.mrf.mxu1 }
0x14ac   :  { %5343 = vmatmul.mubr.msk.bf16.vlgmr.msra.gmra.mxu0 %vm240_vm2, %v2087_v7  ;;  %v5634_v8 = vld [vmem:[%s6919_s0 + $0x8] sm:$0xff] }
0x14ad   :  { %5353 = vmatpush3.bf16.xpose.msra.mxu0 %v2197_v9  ;;  %v2084_v10 = vpop.f32.mrf.mxu1  ;;  %5354 = vmatprep.mubr.msk.bf16.mxu0 %vm5658_vm1, %v5657_v16 }
0x14ae   :  { %5364 = vmatprep.subr.bf16.mxu0 %v5657_v16 }
0x14af   :  { %v5339_v11 = vpop.f32.mrf.mxu1 }
0x14b1   :  { %v2183_v12 = vpop.f32.mrf.mxu1 }
0x14b2   :  { %v2239_v13 = vsel %vm333_vm3, %v2183_v12, -inf }
0x14b3   :  { %2240 = vmax.xlane.f32.xlu0 %v2239_v13  ;;  %v5350_v15 = vpop.f32.mrf.mxu1 }
0x14b4   :  { %5355 = vmatmul.mubr.msk.bf16.vlgmr.msra.gmra.mxu0 %vm240_vm2, %v2190_v14 }
0x14b5   :  { %v2186_v17 = vpop.f32.mrf.mxu1  ;;  %5366 = vmatprep.mubr.msk.bf16.mxu0 %vm5658_vm1, %v5657_v16 }
0x14b7   :  { %v5351_v18 = vpop.f32.mrf.mxu1 }
0x153c   :  { %v2241_v19 = vpop.xlane.xlu0 %2240 }
0x153d   :  { %v2245_v20 = vsub.f32 %v2183_v12, %v2241_v19 }
0x153f   :  { %v2247_v21 = vmul.f32 1.442695, %v2245_v20 }
0x1541   :  { %5589 = vpow2.f32 %v2247_v21 }
0x154e   :  { %v5590_v22 = vpop.eup %5589 }
0x154f   :  { %v2251_v23 = vsel %vm333_vm3, %v5590_v22, 0.0 }
0x1550   :  { %2252 = vadd.xlane.f32.xlu0 %v2251_v23 }
0x156c   :  { %v2130_v24 = vpop.f32.mrf.mxu0 }
0x156d   :  { %v2137_v25 = vadd.f32 %v2130_v24, %v6104_v32  ;;  %v2483_v24 = vld [vmem:[%s6930_s11 + $0x80] sm:$0xff] }
0x156e   :  { %v5344_v26 = vpop.f32.mrf.mxu0 }
0x156f   :  { %v2484_v26 = vld [vmem:[%s6930_s11 + $0x88] sm:$0xff] }
0x1570   :  { %v2133_v27 = vpop.f32.mrf.mxu0 }
0x1571   :  { %v2138_v28 = vadd.f32 %v2133_v27, %v6107_v36 }
0x1572   :  { %v5345_v29 = vpop.f32.mrf.mxu0 }
0x1574   :  { %v2233_v30 = vpop.f32.mrf.mxu0 }
0x1575   :  { %v2242_v33 = vsel %vm333_vm3, %v2233_v30, -inf }
0x1576   :  { %2243 = vmax.xlane.f32.xlu1 %v2242_v33  ;;  %v5356_v35 = vpop.f32.mrf.mxu0 }
0x1577   :  { %v2467_v35 = vld [vmem:[%s6930_s11] sm:$0xff] }
0x1578   :  { %v2236_v38 = vpop.f32.mrf.mxu0 }
0x1579   :  { %v2475_v38 = vld [vmem:[%s6930_s11 + $0x40] sm:$0xff] }
0x157a   :  { %v5357_v39 = vpop.f32.mrf.mxu0 }
0x157b   :  { %v2468_v39 = vld [vmem:[%s6930_s11 + $0x8] sm:$0xff] }
0x1587   :  { %2311 = vrot.lane.b32.xlu1 %v5812_v51, %s5673_s24 }
0x15d9   :  { %v2253_v40 = vpop.xlane.xlu0 %2252 }
0x15ff   :  { %v2244_v43 = vpop.xlane.xlu1 %2243 }
0x1600   :  { %v2246_v44 = vsub.f32 %v2233_v30, %v2244_v43  ;;  %v4690_v43 = vcombine.high %v2467_v35, %v2475_v38 }
0x1602   :  { %v2249_v48 = vmul.f32 1.442695, %v2246_v44  ;;  %v2476_v44 = vld [vmem:[%s6930_s11 + $0x48] sm:$0xff] }
0x1603   :  { %v2312_v50 = vpop.permute.xlu1 %2311 }
0x1604   :  { %5591 = vpow2.f32 %v2249_v48  ;;  %v2317_v32 = vsel %vm364_vm4, %v2312_v50, 0  ;;  %v4689_v48 = vcombine.low %v2467_v35, %v2475_v38  ;;  %v4691_v50 = vcombine.low %v2468_v39, %v2476_v44 }
0x1605   :  { %5365 = vmatpush3.bf16.msra.mxu0 %v2317_v32  ;;  %5593 = vrcp.f32 %v2253_v40  ;;  %v4692_v32 = vcombine.high %v2468_v39, %v2476_v44  ;;  %v2486_v40 = vld [vmem:[%s6930_s11 + $0x98] sm:$0xff]  ;;  %v2473_v39 = vld [vmem:[%s6930_s11 + $0x30] sm:$0xff] }
0x1606   :  { %v2474_v44 = vld [vmem:[%s6930_s11 + $0x38] sm:$0xff] }
0x1611   :  { %v5592_v36 = vpop.eup %5591 }
0x1612   :  { %v2254_v37 = vsel %vm333_vm3, %v5592_v36, 0.0  ;;  %v5594_v54 = vpop.eup %5593 }
0x1613   :  { %2255 = vadd.xlane.f32.xlu0 %v2254_v37  ;;  %v2259_v51 = vmul.f32 %v5594_v54, %v5590_v22  ;;  %v2493_v37 = vld [vmem:[%s6930_s11 + $0xd0] sm:$0xff]  ;;  %v5674_v54 = vmov 0  }
0x1615   :  { %v2261_v57 = vpack.c.bf16 %v2259_v51, %v2259_v51 }
0x1629   :  { %2263 = vrot.lane.b32.xlu0 %v5805_v42, %s5673_s24 }
0x169c   :  { %v2256_v56 = vpop.xlane.xlu0 %2255 }
0x169d   :  { %5595 = vrcp.f32 %v2256_v56 }
0x16a0   :  { %v2264_v41 = vpop.permute.xlu0 %2263 }
0x16a1   :  { %v2269_v46 = vsel %vm364_vm4, %v2264_v41, 0  ;;  %v2494_v41 = vld [vmem:[%s6930_s11 + $0xd8] sm:$0xff] }
0x16a2   :  { %5359 = vmatpush3.bf16.msra.mxu1 %v2269_v46  ;;  %v4711_v46 = vcombine.low %v2486_v40, %v2494_v41 }
0x16a3   :  { %5370 = vmatprep.subr.bf16.mxu1 %v5657_v16 }
0x16a5   :  { %5361 = vmatmul.mubr.msk.bf16.vlgmr.msra.gmra.mxu1 %vm333_vm3, %v2261_v57  ;;  %v4712_v57 = vcombine.high %v2486_v40, %v2494_v41  ;;  %v5402_v41 = vld [vmem:[%s6932_s13 + $0xf8] sm:$0xff]  }
0x16a6   :  { %5372 = vmatprep.mubr.msk.bf16.mxu1 %vm5658_vm1, %v5657_v16  ;;  %5371 = vmatpush3.bf16.msra.mxu1 %v2366_v52 }
0x16aa   :  { %v5596_v58 = vpop.eup %5595 }
0x16ab   :  { %v2260_v42 = vmul.f32 %v5596_v58, %v5592_v36  ;;  %v2485_v36 = vld [vmem:[%s6930_s11 + $0x90] sm:$0xff] }
0x16ac   :  { %v4709_v56 = vcombine.low %v2485_v36, %v2493_v37  ;;  %v4710_v51 = vcombine.high %v2485_v36, %v2493_v37 }
0x16ad   :  { %v2262_v55 = vpack.c.bf16 %v2260_v42, %v2260_v42 }
0x16af   :  { %5367 = vmatmul.mubr.msk.bf16.vlgmr.msra.gmra.mxu0 %vm333_vm3, %v2262_v55 }
0x16b0   :  { %2778 = vmatprep.mubr.bf16.mxu0 %v5674_v54 }
0x1765   :  { %v2305_v59 = vpop.f32.mrf.mxu1 }
0x1767   :  { %v5362_v60 = vpop.f32.mrf.mxu1 }
0x1769   :  { %v2308_v31 = vpop.f32.mrf.mxu1 }
0x176b   :  { %v5363_v34 = vpop.f32.mrf.mxu1 }
0x176c   :  { %v4687_v34 = vld [vmem:[%s6928_s9] ss:$0 sm:$0xff] }
0x176f   :  { %v2353_v53 = vpop.f32.mrf.mxu0 }
0x1770   :  { %v2359_v47 = vpack.c.bf16 %v2353_v53, %v2305_v59 }
0x1771   :  { %v5368_v49 = vpop.f32.mrf.mxu0 }
0x1772   :  { %5373 = vmatmul.mubr.msk.bf16.vlgmr.msra.gmra.mxu1 %vm240_vm2, %v2359_v47 }
0x1773   :  { %v2356_v16 = vpop.f32.mrf.mxu0  ;;  %2821 = vmatprep.mubr.bf16.mxu1 %v5674_v54 }
0x1774   :  { %v4688_v16 = vld [vmem:[%s6929_s10] ss:$0 sm:$0xff] }
0x1775   :  { %v5369_v61 = vpop.f32.mrf.mxu0 }
0x1832   :  { %v2402_v62 = vpop.f32.mrf.mxu1 }
0x1833   :  { %v2409_v63 = vadd.f32 %v2402_v62, %v2137_v25  ;;  %v2491_v25 = vld [vmem:[%s6930_s11 + $0xc0] sm:$0xff]  ;;  %v2469_v62 = vld [vmem:[%s6930_s11 + $0x10] sm:$0xff] }
0x1834   :  { %v5374_v1 = vpop.f32.mrf.mxu1  ;;  %v4706_v27 = vcombine.high %v2483_v24, %v2491_v25  ;;  %v4705_v29 = vcombine.low %v2483_v24, %v2491_v25 }
0x1835   :  { %v2411_v3 = vadd.f32 %v5633_v2, %v2409_v63  ;;  %v2477_v63 = vld [vmem:[%s6930_s11 + $0x50] sm:$0xff]  ;;  %v2478_v1 = vld [vmem:[%s6930_s11 + $0x58] sm:$0xff] }
0x1836   :  { %v2405_v4 = vpop.f32.mrf.mxu1  ;;  %2758 = vmatprep.subr.bf16.mxu0 %v4706_v27  ;;  %v2497_v27 = vld [vmem:[%s6930_s11 + $0xf0] sm:$0xff] }
0x1837   :  { %v6171_v5 = vadd.f32 %v4686_v0, %v2411_v3  ;;  %v2410_v6 = vadd.f32 %v2405_v4, %v2138_v28  ;;  %v2492_v28 = vld [vmem:[%s6930_s11 + $0xc8] sm:$0xff]  ;;  %2759 = vmatpush1.bf16.msra.mxu0 %v4705_v29  ;;  %v2498_v29 = vld [vmem:[%s6930_s11 + $0xf8] sm:$0xff] }
0x1838   :  { %v5375_v7 = vpop.f32.mrf.mxu1  ;;  %v4707_v30 = vcombine.low %v2484_v26, %v2492_v28  ;;  %v4708_v33 = vcombine.high %v2484_v26, %v2492_v28  ;;  %2760 = vmatprep.subr.bf16.mxu0 %v4690_v43  ;;  %v2489_v26 = vld [vmem:[%s6930_s11 + $0xb0] sm:$0xff]  ;;  %v2490_v28 = vld [vmem:[%s6930_s11 + $0xb8] sm:$0xff] }
0x1839   :  { %v2412_v9 = vadd.f32 %v5634_v8, %v2410_v6  ;;  %v2424_v10 = vsel %vm60_vm0, %v6171_v5, 0.0  ;;  %v4694_v6 = vcombine.high %v2469_v62, %v2477_v63  ;;  %v2487_v8 = vld [vmem:[%s6930_s11 + $0xa0] sm:$0xff]  ;;  %v4718_v35 = vcombine.high %v2489_v26, %v2497_v27  ;;  %v2481_v43 = vld [vmem:[%s6930_s11 + $0x70] sm:$0xff] }
0x183a   :  { %2425 = vadd.xlane.f32.xlu1 %v2424_v10  ;;  %2801 = vmatprep.subr.bf16.mxu1 %v4708_v33  ;;  %v2488_v10 = vld [vmem:[%s6930_s11 + $0xa8] sm:$0xff]  ;;  %v4720_v38 = vcombine.high %v2490_v28, %v2498_v29  ;;  %v4702_v36 = vcombine.high %v2473_v39, %v2481_v43  ;;  %v4701_v40 = vcombine.low %v2473_v39, %v2481_v43 }
0x183b   :  { %v6178_v11 = vadd.f32 %v4686_v0, %v2412_v9  ;;  %2802 = vmatpush1.bf16.msra.mxu1 %v4707_v30  ;;  %2761 = vmatpush1.bf16.msra.mxu0 %v4689_v48  ;;  %v2470_v0 = vld [vmem:[%s6930_s11 + $0x18] sm:$0xff]  ;;  %v2495_v9 = vld [vmem:[%s6930_s11 + $0xe0] sm:$0xff] }
0x183c   :  { %2803 = vmatprep.subr.bf16.mxu1 %v4692_v32  ;;  %2844 = vmatprep.subr.bf16.mxu0 %v4710_v51  ;;  %v4696_v7 = vcombine.high %v2470_v0, %v2478_v1  ;;  %v2482_v48 = vld [vmem:[%s6930_s11 + $0x78] sm:$0xff]  ;;  %v4719_v32 = vcombine.low %v2490_v28, %v2498_v29 }
0x183d   :  { %v2427_v12 = vsel %vm60_vm0, %v6178_v11, 0.0  ;;  %v4704_v37 = vcombine.high %v2474_v44, %v2482_v48  ;;  %v5401_v51 = vld [vmem:[%s6932_s13 + $0x78] sm:$0xff]  }
0x183e   :  { %2428 = vadd.xlane.f32.xlu0 %v2427_v12  ;;  %v2496_v12 = vld [vmem:[%s6930_s11 + $0xe8] sm:$0xff] }
0x183f   :  { %2804 = vmatpush1.bf16.msra.mxu1 %v4691_v50  ;;  %v4717_v50 = vcombine.low %v2489_v26, %v2497_v27 }
0x1840   :  { %2887 = vmatprep.subr.bf16.mxu1 %v4712_v57  ;;  %v5405_v57 = vld [vmem:[%s6932_s13 + $0x70] sm:$0xff]  }
0x18c3   :  { %v2426_v13 = vpop.xlane.xlu1 %2425 }
0x18c4   :  { %v2430_v14 = vmul.f32 0.03125, %v2426_v13  ;;  %v4693_v13 = vcombine.low %v2469_v62, %v2477_v63  ;;  %v6368_v62 = vld [vmem:[%s6931_s12 + $0x8] sm:$0xff]  ;;  %v5417_v63 = vld [vmem:[%s6932_s13 + $0x58] sm:$0xff]  }
0x18c6   :  { %v2432_v15 = vsub.f32 %v6171_v5, %v2430_v14  ;;  %v4695_v14 = vcombine.low %v2470_v0, %v2478_v1  ;;  %v5418_v0 = vld [vmem:[%s6932_s13 + $0xd8] sm:$0xff]  }
0x18c7   :  { %v2429_v17 = vpop.xlane.xlu0 %2428 }
0x18c8   :  { %v2431_v18 = vmul.f32 0.03125, %v2429_v17  ;;  %v2434_v19 = vmul.f32 %v2432_v15, %v2432_v15  ;;  %v4716_v17 = vcombine.high %v2488_v10, %v2496_v12 }
0x18ca   :  { %v2433_v20 = vsub.f32 %v6178_v11, %v2431_v18  ;;  %v2436_v21 = vsel %vm60_vm0, %v2434_v19, 0.0  ;;  %v2471_v18 = vld [vmem:[%s6930_s11 + $0x20] sm:$0xff] }
0x18cb   :  { %2437 = vadd.xlane.f32.xlu0 %v2436_v21  ;;  %v2479_v19 = vld [vmem:[%s6930_s11 + $0x60] sm:$0xff]  ;;  %v2480_v21 = vld [vmem:[%s6930_s11 + $0x68] sm:$0xff] }
0x18cc   :  { %v2435_v22 = vmul.f32 %v2433_v20, %v2433_v20  ;;  %v4698_v24 = vcombine.high %v2471_v18, %v2479_v19  ;;  %v4697_v30 = vcombine.low %v2471_v18, %v2479_v19  ;;  %v5432_v18 = vld [vmem:[%s6932_s13 + $0x80] sm:$0xff]   ;;  %v5433_v19 = vld [vmem:[%s6932_s13 + $0x178] sm:$0xff]  }
0x18ce   :  { %v2439_v23 = vsel %vm60_vm0, %v2435_v22, 0.0  ;;  %v4713_v22 = vcombine.low %v2487_v8, %v2495_v9 }
0x18cf   :  { %2440 = vadd.xlane.f32.xlu1 %v2439_v23  ;;  %v4715_v23 = vcombine.low %v2488_v10, %v2496_v12  ;;  %v5426_v10 = vld [vmem:[%s6932_s13 + $0xc8] sm:$0xff]  }
0x18d0   :  { %v5427_v12 = vld [vmem:[%s6932_s13 + $0x8] sm:$0xff]  }
0x1954   :  { %v2438_v58 = vpop.xlane.xlu0 %2437 }
0x1955   :  { %v2442_v42 = vmul.f32 0.03125, %v2438_v58  ;;  %v5406_v58 = vld [vmem:[%s6932_s13 + $0xf0] sm:$0xff]  }
0x1957   :  { %v2444_v55 = vadd.f32 1e-05, %v2442_v42  ;;  %v5407_v42 = vld [vmem:[%s6932_s13 + $0x30] sm:$0xff]  }
0x1958   :  { %v2441_v45 = vpop.xlane.xlu1 %2440 }
0x1959   :  { %5597 = vrsqrt.f32 %v2444_v55  ;;  %v2443_v52 = vmul.f32 0.03125, %v2441_v45  ;;  %v5408_v55 = vld [vmem:[%s6932_s13 + $0xb0] sm:$0xff]   ;;  %v5409_v45 = vld [vmem:[%s6932_s13 + $0x68] sm:$0xff]  }
0x195b   :  { %v2445_v59 = vadd.f32 1e-05, %v2443_v52  ;;  %v5410_v52 = vld [vmem:[%s6932_s13 + $0xe8] sm:$0xff]  }
0x195d   :  { %5599 = vrsqrt.f32 %v2445_v59  ;;  %v2503_v59 = vlaneseq }
0x1966   :  { %v5598_v60 = vpop.eup %5597 }
0x1967   :  { %v2448_v31 = vmul.f32 %v5598_v60, %v2432_v15  ;;  %v4714_v15 = vcombine.high %v2487_v8, %v2495_v9  ;;  %v5411_v60 = vld [vmem:[%s6932_s13 + $0x28] sm:$0xff]   ;;  %v5424_v8 = vld [vmem:[%s6932_s13 + $0x90] sm:$0xff]  }
0x1968   :  { %v5425_v9 = vld [vmem:[%s6932_s13 + $0x48] sm:$0xff]  }
0x1969   :  { %v2456_v47 = vmul.f32 %v4687_v34, %v2448_v31  ;;  %v5412_v31 = vld [vmem:[%s6932_s13 + $0xa8] sm:$0xff]  }
0x196a   :  { %v5600_v53 = vpop.eup %5599 }
0x196b   :  { %v2449_v49 = vmul.f32 %v5600_v53, %v2433_v20  ;;  %v2464_v2 = vadd.f32 %v4688_v16, %v2456_v47  ;;  %v2472_v20 = vld [vmem:[%s6930_s11 + $0x28] sm:$0xff]  ;;  %v5414_v53 = vld [vmem:[%s6932_s13 + $0xe0] sm:$0xff]   ;;  %v6356_v47 = vshrl.u32 %v2503_v59, 7 }
0x196c   :  { %v4700_v25 = vcombine.high %v2472_v20, %v2480_v21  ;;  %v4699_v33 = vcombine.low %v2472_v20, %v2480_v21  ;;  %v5434_v20 = vld [vmem:[%s6932_s13 + $0x1f8] sm:$0xff]  }
0x196d   :  { %v2457_v61 = vmul.f32 %v4687_v34, %v2449_v49  ;;  %v5413_v34 = vld [vmem:[%s6932_s13 + $0x60] sm:$0xff]   ;;  %v2505_v21 = vsub.s32 0, %v6356_v47 }
0x196e   :  { %v5415_v49 = vld [vmem:[%s6932_s13 + $0x20] sm:$0xff]  }
0x196f   :  { %v2465_v3 = vadd.f32 %v4688_v16, %v2457_v61  ;;  %v5416_v16 = vld [vmem:[%s6932_s13 + $0xa0] sm:$0xff]   ;;  %v2529_v61 = vsub.s32 6, %v6356_v47 }
0x1971   :  { %v6242_v4 = vpack.c.bf16 %v2465_v3, %v2464_v2  ;;  %v6379_v1 = vrot.slane %v6368_v62, %v2529_v61  ;;  %v5419_v2 = vld [vmem:[%s6932_s13 + $0x18] sm:$0xff]  }
0x1972   :  { %v5420_v3 = vld [vmem:[%s6932_s13 + $0x98] sm:$0xff]  }
0x1973   :  { %4721 = vmatmul.mubr.msk.bf16.vlgmr.msra.gmra.mxu0 %vm60_vm0, %v6242_v4  ;;  %4722 = vmatmul.mubr.msk.bf16.vlgmr.msra.gmra.mxu1 %vm60_vm0, %v6242_v4 }
0x1974   :  { %2845 = vmatpush1.bf16.msra.mxu0 %v4709_v56  ;;  %2888 = vmatpush1.bf16.msra.mxu1 %v4711_v46  ;;  %v4703_v56 = vcombine.low %v2474_v44, %v2482_v48  ;;  %v5404_v46 = vld [vmem:[%s6932_s13 + $0xb8] sm:$0xff]  }
0x1975   :  { %2846 = vmatprep.subr.bf16.mxu0 %v4694_v6  ;;  %2889 = vmatprep.subr.bf16.mxu1 %v4696_v7  ;;  %v5422_v6 = vld [vmem:[%s6932_s13 + $0xd0] sm:$0xff]  }
0x1976   :  { %2864 = vmatprep.mubr.bf16.mxu0 %v5674_v54  ;;  %2907 = vmatprep.mubr.bf16.mxu1 %v5674_v54  ;;  %v5423_v7 = vld [vmem:[%s6932_s13 + $0x10] sm:$0xff]  }
0x1978   :  { %2847 = vmatpush1.bf16.msra.mxu0 %v4693_v13  ;;  %2890 = vmatpush1.bf16.msra.mxu1 %v4695_v14  ;;  %v5428_v13 = vld [vmem:[%s6932_s13 + $0x88] sm:$0xff]   ;;  %v5429_v14 = vld [vmem:[%s6932_s13 + $0x40] sm:$0xff]  }
0x1979   :  { %2930 = vmatprep.subr.bf16.mxu0 %v4714_v15  ;;  %2973 = vmatprep.subr.bf16.mxu1 %v4716_v17  ;;  %v5430_v15 = vld [vmem:[%s6932_s13 + $0xc0] sm:$0xff]  }
0x197a   :  { %v5431_v17 = vld [vmem:[%s6932_s13] sm:$0xff]  }
0x197b   :  { %4723 = vmatmul.mubr.msk.bf16.vlgmr.msra.gmra.mxu0 %vm60_vm0, %v6242_v4  ;;  %4724 = vmatmul.mubr.msk.bf16.vlgmr.msra.gmra.mxu1 %vm60_vm0, %v6242_v4 }
0x197c   :  { %2931 = vmatpush1.bf16.msra.mxu0 %v4713_v22  ;;  %2974 = vmatpush1.bf16.msra.mxu1 %v4715_v23  ;;  %v2513_v22 = vsub.s32 2, %v6356_v47  ;;  %v6434_v23 = vld [vmem:[%s6931_s12] sm:$0xff] }
0x197d   :  { %2932 = vmatprep.subr.bf16.mxu0 %v4698_v24  ;;  %2975 = vmatprep.subr.bf16.mxu1 %v4700_v25  ;;  %v2509_v24 = vsub.s32 1, %v6356_v47  ;;  %v2517_v25 = vsub.s32 3, %v6356_v47  ;;  %v2506_v28 = vrot.slane %v6434_v23, %v2505_v21 }
0x197e   :  { %2950 = vmatprep.mubr.bf16.mxu0 %v5674_v54  ;;  %2993 = vmatprep.mubr.bf16.mxu1 %v5674_v54  ;;  %v2514_v29 = vrot.slane %v6434_v23, %v2513_v22 }
0x1980   :  { %2933 = vmatpush1.bf16.msra.mxu0 %v4697_v30  ;;  %2976 = vmatpush1.bf16.msra.mxu1 %v4699_v33  ;;  %v2510_v30 = vrot.slane %v6434_v23, %v2509_v24 }
0x1981   :  { %3016 = vmatprep.subr.bf16.mxu0 %v4718_v35  ;;  %3059 = vmatprep.subr.bf16.mxu1 %v4720_v38  ;;  %v2518_v35 = vrot.slane %v6434_v23, %v2517_v25 }
0x1983   :  { %4725 = vmatmul.mubr.msk.bf16.vlgmr.msra.gmra.mxu0 %vm60_vm0, %v6242_v4  ;;  %4726 = vmatmul.mubr.msk.bf16.vlgmr.msra.gmra.mxu1 %vm60_vm0, %v6242_v4 }
0x1984   :  { %3017 = vmatpush1.bf16.msra.mxu0 %v4717_v50  ;;  %3060 = vmatpush1.bf16.msra.mxu1 %v4719_v32 }
0x1985   :  { %3018 = vmatprep.subr.bf16.mxu0 %v4702_v36  ;;  %3061 = vmatprep.subr.bf16.mxu1 %v4704_v37 }
0x1986   :  { %3036 = vmatprep.mubr.bf16.mxu0 %v5674_v54  ;;  %3079 = vmatprep.mubr.bf16.mxu1 %v5674_v54  ;;  %v5403_v54 = vld [vmem:[%s6932_s13 + $0x38] sm:$0xff]  }
0x1988   :  { %3019 = vmatpush1.bf16.msra.mxu0 %v4701_v40  ;;  %3062 = vmatpush1.bf16.msra.mxu1 %v4703_v56 }
0x1989   :  { %4944 = vmatprep.subr.bf16.mxu0 %v5401_v51  ;;  %4966 = vmatprep.subr.bf16.mxu1 %v5402_v41  ;;  %v2525_v51 = vsub.s32 5, %v6356_v47 }
0x198b   :  { %4727 = vmatmul.mubr.msk.bf16.vlgmr.msra.gmra.mxu0 %vm60_vm0, %v6242_v4  ;;  %4728 = vmatmul.mubr.msk.bf16.vlgmr.msra.gmra.mxu1 %vm60_vm0, %v6242_v4  ;;  %v5421_v4 = vld [vmem:[%s6932_s13 + $0x50] sm:$0xff]  }
0x198c   :  { %4945 = vmatpush3.bf16.msra.mxu0 %v5403_v54  ;;  %4967 = vmatpush3.bf16.msra.mxu1 %v5404_v46 }
0x198d   :  { %4946 = vmatprep.subr.bf16.mxu0 %v5405_v57  ;;  %4968 = vmatprep.subr.bf16.mxu1 %v5406_v58 }
0x1990   :  { %4947 = vmatpush3.bf16.msra.mxu0 %v5407_v42  ;;  %4969 = vmatpush3.bf16.msra.mxu1 %v5408_v55  ;;  %v2533_v55 = vsub.s32 7, %v6356_v47 }
0x1991   :  { %4948 = vmatprep.subr.bf16.mxu0 %v5409_v45  ;;  %4970 = vmatprep.subr.bf16.mxu1 %v5410_v52 }
0x1994   :  { %4949 = vmatpush3.bf16.msra.mxu0 %v5411_v60  ;;  %4971 = vmatpush3.bf16.msra.mxu1 %v5412_v31 }
0x1995   :  { %4950 = vmatprep.subr.bf16.mxu0 %v5413_v34  ;;  %4972 = vmatprep.subr.bf16.mxu1 %v5414_v53 }
0x1998   :  { %4951 = vmatpush3.bf16.msra.mxu0 %v5415_v49  ;;  %4973 = vmatpush3.bf16.msra.mxu1 %v5416_v16 }
0x1999   :  { %4952 = vmatprep.subr.bf16.mxu0 %v5417_v63  ;;  %4974 = vmatprep.subr.bf16.mxu1 %v5418_v0  ;;  %v2526_v63 = vrot.slane %v6434_v23, %v2525_v51 }
0x199c   :  { %4953 = vmatpush3.bf16.msra.mxu0 %v5419_v2  ;;  %4975 = vmatpush3.bf16.msra.mxu1 %v5420_v3  ;;  %v2534_v2 = vrot.slane %v6434_v23, %v2533_v55 }
0x199d   :  { %4954 = vmatprep.subr.bf16.mxu0 %v5421_v4  ;;  %4976 = vmatprep.subr.bf16.mxu1 %v5422_v6 }
0x19a0   :  { %4955 = vmatpush3.bf16.msra.mxu0 %v5423_v7  ;;  %4977 = vmatpush3.bf16.msra.mxu1 %v5424_v8 }
0x19a1   :  { %4956 = vmatprep.subr.bf16.mxu0 %v5425_v9  ;;  %4978 = vmatprep.subr.bf16.mxu1 %v5426_v10 }
0x19a4   :  { %4957 = vmatpush3.bf16.msra.mxu0 %v5427_v12  ;;  %4979 = vmatpush3.bf16.msra.mxu1 %v5428_v13 }
0x19a5   :  { %4958 = vmatprep.subr.bf16.mxu0 %v5429_v14  ;;  %4980 = vmatprep.subr.bf16.mxu1 %v5430_v15 }
0x19a8   :  { %4959 = vmatpush3.bf16.msra.mxu0 %v5431_v17  ;;  %4981 = vmatpush3.bf16.msra.mxu1 %v5432_v18 }
0x19a9   :  { %4988 = vmatprep.subr.bf16.mxu0 %v5433_v19  ;;  %5010 = vmatprep.subr.bf16.mxu1 %v5434_v20 }
0x1a33   :  { %v2780_v26 = vpop.f32.mrf.mxu0  ;;  %v2823_v27 = vpop.f32.mrf.mxu1 }
0x1a34   :  { %v2781_v44 = vadd.f32 %v2780_v26, %v2506_v28  ;;  %v2824_v48 = vadd.f32 %v2823_v27, %v2514_v29 }
0x1a35   :  { %v2782_v33 = vpop.f32.mrf.mxu0  ;;  %v2825_v38 = vpop.f32.mrf.mxu1 }
0x1a36   :  { %v2783_v36 = vadd.f32 %v2782_v33, %v2510_v30  ;;  %v2826_v37 = vadd.f32 %v2825_v38, %v2518_v35 }
0x1a37   :  { %v2784_v39 = vpop.f32.mrf.mxu0  ;;  %v2827_v43 = vpop.f32.mrf.mxu1 }
0x1a38   :  { %v2785_v50 = vadd.f32 %v2784_v39, %v2506_v28  ;;  %v2828_v32 = vadd.f32 %v2827_v43, %v2514_v29  ;;  %v2521_v39 = vsub.s32 4, %v6356_v47  ;;  %v5483_v47 = vld [vmem:[%s6932_s13 + $0x218] sm:$0xff]  }
0x1a39   :  { %v2786_v40 = vpop.f32.mrf.mxu0  ;;  %v2829_v56 = vpop.f32.mrf.mxu1 }
0x1a3a   :  { %v6451_v41 = vpack.c.bf16 %v2785_v50, %v2781_v44  ;;  %v6453_v54 = vpack.c.bf16 %v2828_v32, %v2824_v48  ;;  %v2787_v46 = vadd.f32 %v2786_v40, %v2510_v30  ;;  %v2830_v57 = vadd.f32 %v2829_v56, %v2518_v35 }
0x1a3b   :  { %v2866_v58 = vpop.f32.mrf.mxu0  ;;  %v6455_v42 = vpop.f32.mrf.mxu1  ;;  %v2522_v56 = vrot.slane %v6434_v23, %v2521_v39 }
0x1a3c   :  { %v3122_v45 = vmul.bf16 1027030327, %v6451_v41  ;;  %v3124_v52 = vmul.bf16 1027030327, %v6453_v54  ;;  %v6460_v59 = vpack.c.bf16 %v2787_v46, %v2783_v36  ;;  %v6462_v60 = vpack.c.bf16 %v2830_v57, %v2826_v37 }
0x1a3d   :  { %v2868_v31 = vpop.f32.mrf.mxu0  ;;  %v2911_v34 = vpop.f32.mrf.mxu1 }
0x1a3e   :  { %v3138_v53 = vmul.bf16 %v3122_v45, %v6451_v41  ;;  %v3123_v49 = vmul.bf16 1027030327, %v6460_v59  ;;  %v3125_v16 = vmul.bf16 1027030327, %v6462_v60  ;;  %v3140_v0 = vmul.bf16 %v3124_v52, %v6453_v54 }
0x1a3f   :  { %v2870_v3 = vpop.f32.mrf.mxu0  ;;  %v2913_v4 = vpop.f32.mrf.mxu1  ;;  %v2869_v12 = vadd.f32 %v2868_v31, %v2526_v63  ;;  %v2912_v17 = vadd.f32 %v2911_v34, %v2534_v2  ;;  %v2530_v52 = vrot.slane %v6434_v23, %v2529_v61  ;;  %v2542_v31 = vrot.slane %v6368_v62, %v2509_v24 }
0x1a40   :  { %v3154_v6 = vmul.bf16 %v3138_v53, %v6451_v41  ;;  %v3139_v9 = vmul.bf16 %v3123_v49, %v6460_v59  ;;  %v3141_v10 = vmul.bf16 %v3125_v16, %v6462_v60  ;;  %v3156_v15 = vmul.bf16 %v3140_v0, %v6453_v54 }
0x1a41   :  { %v2872_v7 = vpop.f32.mrf.mxu0  ;;  %v2915_v8 = vpop.f32.mrf.mxu1  ;;  %v2871_v34 = vadd.f32 %v2870_v3, %v2522_v56  ;;  %v2910_v24 = vadd.f32 %v6455_v42, %v2530_v52 }
0x1a42   :  { %v2873_v13 = vadd.f32 %v2872_v7, %v2526_v63  ;;  %v2916_v14 = vadd.f32 %v2915_v8, %v2534_v2  ;;  %v3155_v20 = vmul.bf16 %v3139_v9, %v6460_v59  ;;  %v3157_v26 = vmul.bf16 %v3141_v10, %v6462_v60 }
0x1a43   :  { %v6478_v18 = vpop.f32.mrf.mxu0  ;;  %v6480_v19 = vpop.f32.mrf.mxu1  ;;  %v3170_v38 = vadd.bf16 %v3154_v6, %v6451_v41  ;;  %v3172_v32 = vadd.bf16 %v3156_v15, %v6453_v54  ;;  %v2550_v63 = vrot.slane %v6368_v62, %v2517_v25  ;;  %v2867_v2 = vadd.f32 %v2866_v58, %v2522_v56 }
0x1a44   :  { %v6484_v27 = vpack.c.bf16 %v2873_v13, %v2869_v12  ;;  %v6486_v28 = vpack.c.bf16 %v2916_v14, %v2912_v17  ;;  %v3171_v33 = vadd.bf16 %v3155_v20, %v6460_v59  ;;  %v3173_v35 = vadd.bf16 %v3157_v26, %v6462_v60 }
0x1a45   :  { %v2954_v29 = vpop.f32.mrf.mxu0  ;;  %v2997_v30 = vpop.f32.mrf.mxu1  ;;  %v3186_v40 = vmul.bf16 1061961548, %v3170_v38  ;;  %v3188_v57 = vmul.bf16 1061961548, %v3172_v32  ;;  %v2914_v6 = vadd.f32 %v2913_v4, %v2530_v52  ;;  %v6516_v3 = vpack.c.bf16 %v2871_v34, %v2867_v2  ;;  %v5437_v34 = vld [vmem:[%s6932_s13 + $0x170] sm:$0xff]  }
0x1a46   :  { %v3127_v43 = vmul.bf16 1027030327, %v6484_v27  ;;  %v3187_v48 = vmul.bf16 1061961548, %v3171_v33  ;;  %v3189_v50 = vmul.bf16 1061961548, %v3173_v35  ;;  %v2955_v23 = vadd.f32 %v2954_v29, %v2542_v31 }
0x1a47   :  { %v6493_v44 = vpop.f32.mrf.mxu0  ;;  %v3129_v36 = vmul.bf16 1027030327, %v6486_v28  ;;  %v6497_v37 = vpop.f32.mrf.mxu1  ;;  %v2998_v10 = vadd.f32 %v2997_v30, %v2550_v63  ;;  %v6521_v13 = vpack.c.bf16 %v2914_v6, %v2910_v24  ;;  %v3126_v4 = vmul.bf16 1027030327, %v6516_v3 }
0x1a48   :  { %5601 = vtanh.bf16 %v3187_v48  ;;  %v3143_v45 = vmul.bf16 %v3127_v43, %v6484_v27  ;;  %v3107_v26 = vmul.bf16 1056980736, %v6460_v59  ;;  %v3109_v38 = vmul.bf16 1056980736, %v6462_v60  ;;  %v5435_v60 = vld [vmem:[%s6932_s13 + $0x138] sm:$0xff]  }
0x1a49   :  { %v2958_v46 = vpop.f32.mrf.mxu0  ;;  %5603 = vtanh.bf16 %v3189_v50  ;;  %v3001_v53 = vpop.f32.mrf.mxu1  ;;  %v3145_v16 = vmul.bf16 %v3129_v36, %v6486_v28  ;;  %v3128_v17 = vmul.bf16 1027030327, %v6521_v13  ;;  %v3142_v33 = vmul.bf16 %v3126_v4, %v6516_v3 }
0x1a4a   :  { %5605 = vtanh.bf16 %v3186_v40  ;;  %v3159_v49 = vmul.bf16 %v3143_v45, %v6484_v27  ;;  %v2959_v0 = vadd.f32 %v2958_v46, %v2542_v31  ;;  %v3002_v7 = vadd.f32 %v3001_v53, %v2550_v63 }
0x1a4b   :  { %5607 = vtanh.bf16 %v3188_v57  ;;  %v3161_v9 = vmul.bf16 %v3145_v16, %v6486_v28  ;;  %v3144_v32 = vmul.bf16 %v3128_v17, %v6521_v13  ;;  %v3106_v40 = vmul.bf16 1056980736, %v6451_v41  ;;  %v5436_v16 = vld [vmem:[%s6932_s13 + $0x1b8] sm:$0xff]   ;;  %v6556_v6 = vpop.f32.mrf.mxu1 }
0x1a4c   :  { %v3175_v61 = vadd.bf16 %v3159_v49, %v6484_v27  ;;  %v6519_v12 = vpack.c.bf16 %v2959_v0, %v2955_v23  ;;  %v6524_v58 = vpack.c.bf16 %v3002_v7, %v2998_v10  ;;  %v3158_v57 = vmul.bf16 %v3142_v33, %v6516_v3  ;;  %v6547_v49 = vpop.f32.mrf.mxu0  ;;  %v5441_v7 = vld [vmem:[%s6932_s13 + $0x168] sm:$0xff]  }
0x1a4d   :  { %v3177_v25 = vadd.bf16 %v3161_v9, %v6486_v28  ;;  %v3108_v52 = vmul.bf16 1056980736, %v6453_v54  ;;  %v3160_v53 = vmul.bf16 %v3144_v32, %v6521_v13  ;;  %v5438_v54 = vld [vmem:[%s6932_s13 + $0x1f0] sm:$0xff]   ;;  %v3111_v24 = vmul.bf16 1056980736, %v6484_v27  ;;  %v3083_v17 = vpop.f32.mrf.mxu1  ;;  %v5446_v32 = vld [vmem:[%s6932_s13 + $0x1e0] sm:$0xff]  }
0x1a4e   :  { %v3191_v8 = vmul.bf16 1061961548, %v3175_v61  ;;  %v3131_v42 = vmul.bf16 1027030327, %v6519_v12  ;;  %v3133_v20 = vmul.bf16 1027030327, %v6524_v58  ;;  %v3174_v23 = vadd.bf16 %v3158_v57, %v6516_v3  ;;  %v3040_v10 = vpop.f32.mrf.mxu0 }
0x1a4f   :  { %v3193_v14 = vmul.bf16 1061961548, %v3177_v25  ;;  %v5439_v61 = vld [vmem:[%s6932_s13 + $0x130] sm:$0xff]   ;;  %v3176_v4 = vadd.bf16 %v3160_v53, %v6521_v13  ;;  %v5448_v57 = vld [vmem:[%s6932_s13 + $0x1a0] sm:$0xff]  }
0x1a50   :  { %5609 = vtanh.bf16 %v3191_v8  ;;  %v3147_v48 = vmul.bf16 %v3131_v42, %v6519_v12  ;;  %v3149_v59 = vmul.bf16 %v3133_v20, %v6524_v58  ;;  %v5440_v25 = vld [vmem:[%s6932_s13 + $0x1b0] sm:$0xff]   ;;  %v5442_v42 = vld [vmem:[%s6932_s13 + $0x1e8] sm:$0xff]  }
0x1a51   :  { %5611 = vtanh.bf16 %v3193_v14  ;;  %v5443_v20 = vld [vmem:[%s6932_s13 + $0x128] sm:$0xff]   ;;  %v5453_v53 = vld [vmem:[%s6932_s13 + $0x150] sm:$0xff]  }
0x1a52   :  { %v3163_v41 = vmul.bf16 %v3147_v48, %v6519_v12  ;;  %v3165_v0 = vmul.bf16 %v3149_v59, %v6524_v58  ;;  %v3192_v48 = vmul.bf16 1061961548, %v3176_v4  ;;  %v2538_v59 = vrot.slane %v6368_v62, %v2505_v21  ;;  %v5461_v4 = vld [vmem:[%s6932_s13 + $0x140] sm:$0xff]  }
0x1a53   :  { %v2546_v21 = vrot.slane %v6368_v62, %v2513_v22 }
0x1a54   :  { %v3179_v9 = vadd.bf16 %v3163_v41, %v6519_v12  ;;  %v2953_v22 = vadd.f32 %v6478_v18, %v2538_v59  ;;  %v5455_v18 = vld [vmem:[%s6932_s13 + $0x110] sm:$0xff]  }
0x1a56   :  { %v5602_v15 = vpop.eup %5601 }
0x1a57   :  { %v3219_v29 = vadd.bf16 1065369472, %v5602_v15  ;;  %v5604_v30 = vpop.eup %5603  ;;  %v3181_v15 = vadd.bf16 %v3165_v0, %v6524_v58  ;;  %v2996_v0 = vadd.f32 %v6480_v19, %v2546_v21  ;;  %v5456_v19 = vld [vmem:[%s6932_s13 + $0x190] sm:$0xff]  }
0x1a58   :  { %v3221_v43 = vadd.bf16 1065369472, %v5604_v30  ;;  %v5606_v50 = vpop.eup %5605  ;;  %v3113_v30 = vmul.bf16 1056980736, %v6486_v28  ;;  %v5447_v28 = vld [vmem:[%s6932_s13 + $0x120] sm:$0xff]  }
0x1a59   :  { %v3235_v35 = vmul.bf16 %v3219_v29, %v3107_v26  ;;  %v3218_v56 = vadd.bf16 1065369472, %v5606_v50  ;;  %v5608_v46 = vpop.eup %5607  ;;  %v5445_v26 = vld [vmem:[%s6932_s13 + $0x160] sm:$0xff]   ;;  %v3190_v29 = vmul.bf16 1061961548, %v3174_v23  ;;  %v5457_v23 = vld [vmem:[%s6932_s13 + $0x148] sm:$0xff]  }
0x1a5a   :  { %v3237_v36 = vmul.bf16 %v3221_v43, %v3109_v38  ;;  %v3220_v31 = vadd.bf16 1065369472, %v5608_v46  ;;  %v6582_v38 = vpop.f32.mrf.mxu0  ;;  %v5444_v43 = vld [vmem:[%s6932_s13 + $0x1a8] sm:$0xff]  }
0x1a5b   :  { %4313 = vmatprep.mubr.bf16.mxu0 %v3235_v35  ;;  %v3234_v45 = vmul.bf16 %v3218_v56, %v3106_v40  ;;  %v3195_v35 = vmul.bf16 1061961548, %v3179_v9  ;;  %v6590_v40 = vpop.f32.mrf.mxu1  ;;  %5613 = vtanh.bf16 %v3190_v29  ;;  %v5449_v56 = vld [vmem:[%s6932_s13 + $0x158] sm:$0xff]  }
0x1a5c   :  { %4354 = vmatprep.mubr.bf16.mxu1 %v3237_v36  ;;  %v3236_v63 = vmul.bf16 %v3220_v31, %v3108_v52  ;;  %v3197_v36 = vmul.bf16 1061961548, %v3181_v15  ;;  %v3044_v46 = vpop.f32.mrf.mxu0  ;;  %v2957_v52 = vadd.f32 %v6493_v44, %v2538_v59  ;;  %v3000_v44 = vadd.f32 %v6497_v37, %v2546_v21  ;;  %v5460_v15 = vld [vmem:[%s6932_s13 + $0x188] sm:$0xff]   ;;  %v5466_v59 = vld [vmem:[%s6932_s13 + $0x2f8] sm:$0xff]  }
0x1a5d   :  { %4314 = vmatmul.mubr.bf16.vlgmr.msra.gmra.mxu0 %v3234_v45  ;;  %5615 = vtanh.bf16 %v3195_v35  ;;  %v5450_v45 = vld [vmem:[%s6932_s13 + $0x1d8] sm:$0xff]   ;;  %v3087_v31 = vpop.f32.mrf.mxu1 }
0x1a5e   :  { %v5610_v2 = vpop.eup %5609  ;;  %4989 = vmatpush3.bf16.msra.mxu0 %v5435_v60  ;;  %4355 = vmatmul.mubr.bf16.vlgmr.msra.gmra.mxu1 %v3236_v63  ;;  %5617 = vtanh.bf16 %v3192_v48  ;;  %v2558_v60 = vrot.slane %v6368_v62, %v2525_v51  ;;  %v2566_v51 = vrot.slane %v6368_v62, %v2533_v55  ;;  %v5454_v55 = vld [vmem:[%s6932_s13 + $0x1d0] sm:$0xff]  }
0x1a5f   :  { %4990 = vmatprep.subr.bf16.mxu0 %v5437_v34  ;;  %v3223_v8 = vadd.bf16 1065369472, %v5610_v2  ;;  %5011 = vmatpush3.bf16.msra.mxu1 %v5436_v16  ;;  %v5612_v27 = vpop.eup %5611  ;;  %5619 = vtanh.bf16 %v3197_v36  ;;  %v5451_v34 = vld [vmem:[%s6932_s13 + $0x118] sm:$0xff]   ;;  %v6632_v2 = vpack.c.bf16 %v2957_v52, %v2953_v22 }
0x1a60   :  { %5012 = vmatprep.subr.bf16.mxu1 %v5438_v54  ;;  %v3225_v33 = vadd.bf16 1065369472, %v5612_v27  ;;  %v3045_v41 = vadd.f32 %v3044_v46, %v2558_v60  ;;  %v5452_v16 = vld [vmem:[%s6932_s13 + $0x198] sm:$0xff]   ;;  %v3041_v63 = vadd.f32 %v3040_v10, %v2558_v60  ;;  %v3088_v54 = vadd.f32 %v3087_v31, %v2566_v51  ;;  %v5459_v10 = vld [vmem:[%s6932_s13 + $0x108] sm:$0xff]   ;;  %v5469_v31 = vld [vmem:[%s6932_s13 + $0x270] sm:$0xff]  }
0x1a61   :  { %v3239_v14 = vmul.bf16 %v3223_v8, %v3111_v24  ;;  %v3084_v37 = vadd.f32 %v3083_v17, %v2566_v51  ;;  %v5458_v8 = vld [vmem:[%s6932_s13 + $0x1c8] sm:$0xff]   ;;  %v3130_v9 = vmul.bf16 1027030327, %v6632_v2  ;;  %v5467_v60 = vld [vmem:[%s6932_s13 + $0x238] sm:$0xff]  }
0x1a62   :  { %4991 = vmatpush3.bf16.msra.mxu0 %v5439_v61  ;;  %v3241_v50 = vmul.bf16 %v3225_v33, %v3113_v30  ;;  %v6637_v61 = vpack.c.bf16 %v3045_v41, %v3041_v63  ;;  %v5463_v30 = vld [vmem:[%s6932_s13 + $0x100] sm:$0xff]   ;;  %v5471_v63 = vld [vmem:[%s6932_s13 + $0x230] sm:$0xff]  }
0x1a63   :  { %4992 = vmatprep.subr.bf16.mxu0 %v5441_v7  ;;  %4395 = vmatprep.mubr.bf16.mxu0 %v3239_v14  ;;  %v6642_v7 = vpack.c.bf16 %v3000_v44, %v2996_v0  ;;  %v6647_v24 = vpack.c.bf16 %v3088_v54, %v3084_v37  ;;  %v3146_v29 = vmul.bf16 %v3130_v9, %v6632_v2  ;;  %v5472_v0 = vld [vmem:[%s6932_s13 + $0x2b0] sm:$0xff]   ;;  %v5474_v37 = vld [vmem:[%s6932_s13 + $0x2e8] sm:$0xff]   ;;  %v5477_v9 = vld [vmem:[%s6932_s13 + $0x260] sm:$0xff]  }
0x1a64   :  { %5013 = vmatpush3.bf16.msra.mxu1 %v5440_v25  ;;  %4436 = vmatprep.mubr.bf16.mxu1 %v3241_v50  ;;  %v3135_v25 = vmul.bf16 1027030327, %v6637_v61 }
0x1a65   :  { %5014 = vmatprep.subr.bf16.mxu1 %v5442_v42  ;;  %v3132_v42 = vmul.bf16 1027030327, %v6642_v7  ;;  %v3137_v17 = vmul.bf16 1027030327, %v6647_v24 }
0x1a66   :  { %4993 = vmatpush3.bf16.msra.mxu0 %v5443_v20  ;;  %v5462_v20 = vld [vmem:[%s6932_s13 + $0x1c0] sm:$0xff]   ;;  %v3151_v48 = vmul.bf16 %v3135_v25, %v6637_v61  ;;  %v5476_v25 = vld [vmem:[%s6932_s13 + $0x2a8] sm:$0xff]  }
0x1a67   :  { %4994 = vmatprep.subr.bf16.mxu0 %v5445_v26  ;;  %v3148_v50 = vmul.bf16 %v3132_v42, %v6642_v7  ;;  %v3153_v46 = vmul.bf16 %v3137_v17, %v6647_v24  ;;  %v2554_v17 = vrot.slane %v6368_v62, %v2521_v39  ;;  %v5485_v62 = vld [vmem:[%s6932_s13 + $0x250] sm:$0xff]  }
0x1a68   :  { %5015 = vmatpush3.bf16.msra.mxu1 %v5444_v43  ;;  %v5465_v43 = vld [vmem:[%s6932_s13 + $0x278] sm:$0xff]  }
0x1a69   :  { %5016 = vmatprep.subr.bf16.mxu1 %v5446_v32  ;;  %v5614_v14 = vpop.eup %5613  ;;  %v5464_v32 = vld [vmem:[%s6932_s13 + $0x180] sm:$0xff]   ;;  %v3164_v51 = vmul.bf16 %v3148_v50, %v6642_v7  ;;  %v3169_v44 = vmul.bf16 %v3153_v46, %v6647_v24  ;;  %v3039_v39 = vadd.f32 %v6547_v49, %v2554_v17  ;;  %v5487_v49 = vld [vmem:[%s6932_s13 + $0x210] sm:$0xff]  }
0x1a6a   :  { %4995 = vmatpush3.bf16.msra.mxu0 %v5447_v28  ;;  %v3222_v35 = vadd.bf16 1065369472, %v5614_v14  ;;  %v3110_v28 = vmul.bf16 1056980736, %v6516_v3  ;;  %v3112_v3 = vmul.bf16 1056980736, %v6521_v13 }
0x1a6b   :  { %4996 = vmatprep.subr.bf16.mxu0 %v5449_v56  ;;  %v5616_v27 = vpop.eup %5615  ;;  %v5470_v13 = vld [vmem:[%s6932_s13 + $0x2f0] sm:$0xff]   ;;  %v5478_v14 = vld [vmem:[%s6932_s13 + $0x2e0] sm:$0xff]  }
0x1a6c   :  { %5017 = vmatpush3.bf16.msra.mxu1 %v5448_v57  ;;  %v5618_v26 = vpop.eup %5617  ;;  %v3227_v36 = vadd.bf16 1065369472, %v5616_v27  ;;  %v3162_v57 = vmul.bf16 %v3146_v29, %v6632_v2  ;;  %v3238_v52 = vmul.bf16 %v3222_v35, %v3110_v28  ;;  %v5481_v27 = vld [vmem:[%s6932_s13 + $0x258] sm:$0xff]   ;;  %v3043_v29 = vadd.f32 %v6582_v38, %v2554_v17  ;;  %v5488_v50 = vld [vmem:[%s6932_s13 + $0x290] sm:$0xff]   ;;  %v5510_v17 = vld [vmem:[%s6932_s13 + $0x3e0] sm:$0xff]  }
0x1a6d   :  { %5018 = vmatprep.subr.bf16.mxu1 %v5450_v45  ;;  %v5620_v33 = vpop.eup %5619  ;;  %v3224_v56 = vadd.bf16 1065369472, %v5618_v26  ;;  %v3115_v45 = vmul.bf16 1056980736, %v6519_v12  ;;  %v3117_v12 = vmul.bf16 1056980736, %v6524_v58  ;;  %v3082_v35 = vadd.f32 %v6556_v6, %v6379_v1 }
0x1a6e   :  { %4997 = vmatpush3.bf16.msra.mxu0 %v5451_v34  ;;  %v3229_v21 = vadd.bf16 1065369472, %v5620_v33  ;;  %v3167_v34 = vmul.bf16 %v3151_v48, %v6637_v61  ;;  %v3178_v54 = vadd.bf16 %v3162_v57, %v6632_v2  ;;  %v5473_v58 = vld [vmem:[%s6932_s13 + $0x268] sm:$0xff]   ;;  %v5482_v26 = vld [vmem:[%s6932_s13 + $0x2d8] sm:$0xff]   ;;  %v5486_v33 = vld [vmem:[%s6932_s13 + $0x2d0] sm:$0xff]  }
0x1a6f   :  { %4998 = vmatprep.subr.bf16.mxu0 %v5453_v53  ;;  %v3243_v41 = vmul.bf16 %v3227_v36, %v3115_v45  ;;  %v5468_v53 = vld [vmem:[%s6932_s13 + $0x2b8] sm:$0xff]   ;;  %v3240_v22 = vmul.bf16 %v3224_v56, %v3112_v3  ;;  %v5493_v36 = vld [vmem:[%s6932_s13 + $0x240] sm:$0xff]  }
0x1a70   :  { %5019 = vmatpush3.bf16.msra.mxu1 %v5452_v16  ;;  %v3245_v16 = vmul.bf16 %v3229_v21, %v3117_v12  ;;  %v5484_v38 = vld [vmem:[%s6932_s13 + $0x298] sm:$0xff]   ;;  %v5494_v57 = vld [vmem:[%s6932_s13 + $0x2c0] sm:$0xff]  }
0x1a71   :  { %5020 = vmatprep.subr.bf16.mxu1 %v5454_v55  ;;  %v3183_v55 = vadd.bf16 %v3167_v34, %v6637_v61  ;;  %v5495_v21 = vld [vmem:[%s6932_s13 + $0x200] sm:$0xff]  }
0x1a72   :  { %4999 = vmatpush3.bf16.msra.mxu0 %v5455_v18  ;;  %v3180_v18 = vadd.bf16 %v3164_v51, %v6642_v7  ;;  %v5496_v51 = vld [vmem:[%s6932_s13 + $0x280] sm:$0xff]  }
0x1a73   :  { %5000 = vmatprep.subr.bf16.mxu0 %v5457_v23  ;;  %v3185_v23 = vadd.bf16 %v3169_v44, %v6647_v24  ;;  %v5499_v44 = vld [vmem:[%s6932_s13 + $0x338] sm:$0xff]  }
0x1a74   :  { %5021 = vmatpush3.bf16.msra.mxu1 %v5456_v19  ;;  %v5475_v19 = vld [vmem:[%s6932_s13 + $0x228] sm:$0xff]  }
0x1a75   :  { %5022 = vmatprep.subr.bf16.mxu1 %v5458_v8  ;;  %v3194_v8 = vmul.bf16 1061961548, %v3178_v54  ;;  %v3201_v42 = vmul.bf16 1061961548, %v3185_v23 }
0x1a76   :  { %5001 = vmatpush3.bf16.msra.mxu0 %v5459_v10  ;;  %v3199_v10 = vmul.bf16 1061961548, %v3183_v55 }
0x1a77   :  { %5002 = vmatprep.subr.bf16.mxu0 %v5461_v4  ;;  %v3196_v4 = vmul.bf16 1061961548, %v3180_v18  ;;  %5621 = vtanh.bf16 %v3194_v8  ;;  %v5500_v18 = vld [vmem:[%s6932_s13 + $0x3b8] sm:$0xff]   ;;  %v5503_v8 = vld [vmem:[%s6932_s13 + $0x330] sm:$0xff]  }
0x1a78   :  { %5023 = vmatpush3.bf16.msra.mxu1 %v5460_v15  ;;  %v5479_v15 = vld [vmem:[%s6932_s13 + $0x220] sm:$0xff]   ;;  %5623 = vtanh.bf16 %v3199_v10  ;;  %v5504_v10 = vld [vmem:[%s6932_s13 + $0x3b0] sm:$0xff]  }
0x1a79   :  { %5024 = vmatprep.subr.bf16.mxu1 %v5462_v20  ;;  %v5480_v20 = vld [vmem:[%s6932_s13 + $0x2a0] sm:$0xff]   ;;  %5625 = vtanh.bf16 %v3196_v4 }
0x1a7a   :  { %5003 = vmatpush3.bf16.msra.mxu0 %v5463_v30  ;;  %5627 = vtanh.bf16 %v3201_v42  ;;  %v3086_v30 = vadd.f32 %v6590_v40, %v6379_v1  ;;  %v5489_v40 = vld [vmem:[%s6932_s13 + $0x248] sm:$0xff]   ;;  %v5509_v42 = vld [vmem:[%s6932_s13 + $0x360] sm:$0xff]  }
0x1a7b   :  { %5032 = vmatprep.subr.bf16.mxu0 %v5465_v43  ;;  %v6765_v43 = vpack.c.bf16 %v3043_v29, %v3039_v39  ;;  %v5490_v1 = vld [vmem:[%s6932_s13 + $0x2c8] sm:$0xff]   ;;  %v5512_v29 = vld [vmem:[%s6932_s13 + $0x3a0] sm:$0xff]   ;;  %v5517_v39 = vld [vmem:[%s6932_s13 + $0x350] sm:$0xff]  }
0x1a7c   :  { %5025 = vmatpush3.bf16.msra.mxu1 %v5464_v32  ;;  %v6773_v48 = vpack.c.bf16 %v3086_v30, %v3082_v35  ;;  %v5491_v32 = vld [vmem:[%s6932_s13 + $0x208] sm:$0xff]   ;;  %v5516_v30 = vld [vmem:[%s6932_s13 + $0x398] sm:$0xff]  }
0x1a7d   :  { %4396 = vmatmul.mubr.bf16.vlgmr.msra.gmra.mxu0 %v3238_v52  ;;  %5054 = vmatprep.subr.bf16.mxu1 %v5466_v59  ;;  %v3134_v6 = vmul.bf16 1027030327, %v6765_v43  ;;  %v5492_v59 = vld [vmem:[%s6932_s13 + $0x288] sm:$0xff]  }
0x1a7e   :  { %5033 = vmatpush3.bf16.msra.mxu0 %v5467_v60  ;;  %4477 = vmatprep.mubr.bf16.mxu0 %v3243_v41  ;;  %v3136_v56 = vmul.bf16 1027030327, %v6773_v48  ;;  %v5521_v35 = vld [vmem:[%s6932_s13 + $0x348] sm:$0xff]  }
0x1a7f   :  { %4437 = vmatmul.mubr.bf16.vlgmr.msra.gmra.mxu1 %v3240_v22  ;;  %5034 = vmatprep.subr.bf16.mxu0 %v5469_v31  ;;  %v3150_v45 = vmul.bf16 %v3134_v6, %v6765_v43  ;;  %v5497_v31 = vld [vmem:[%s6932_s13 + $0x378] sm:$0xff]  }
0x1a80   :  { %5055 = vmatpush3.bf16.msra.mxu1 %v5468_v53  ;;  %4518 = vmatprep.mubr.bf16.mxu1 %v3245_v16  ;;  %v3152_v34 = vmul.bf16 %v3136_v56, %v6773_v48  ;;  %v3114_v53 = vmul.bf16 1056980736, %v6632_v2  ;;  %v5498_v22 = vld [vmem:[%s6932_s13 + $0x3f8] sm:$0xff]   ;;  %v3119_v16 = vmul.bf16 1056980736, %v6637_v61  ;;  %v5501_v2 = vld [vmem:[%s6932_s13 + $0x370] sm:$0xff]  }
0x1a81   :  { %5056 = vmatprep.subr.bf16.mxu1 %v5470_v13  ;;  %v3166_v13 = vmul.bf16 %v3150_v45, %v6765_v43  ;;  %v5527_v56 = vld [vmem:[%s6932_s13 + $0x300] sm:$0xff]  }
0x1a82   :  { %5035 = vmatpush3.bf16.msra.mxu0 %v5471_v63  ;;  %v3168_v55 = vmul.bf16 %v3152_v34, %v6773_v48 }
0x1a83   :  { %5036 = vmatprep.subr.bf16.mxu0 %v5473_v58  ;;  %v3116_v58 = vmul.bf16 1056980736, %v6642_v7  ;;  %v5502_v7 = vld [vmem:[%s6932_s13 + $0x3f0] sm:$0xff]   ;;  %v3182_v23 = vadd.bf16 %v3166_v13, %v6765_v43 }
0x1a84   :  { %5057 = vmatpush3.bf16.msra.mxu1 %v5472_v0 }
0x1a85   :  { %5058 = vmatprep.subr.bf16.mxu1 %v5474_v37  ;;  %v5622_v28 = vpop.eup %5621  ;;  %v3121_v37 = vmul.bf16 1056980736, %v6647_v24  ;;  %v5505_v24 = vld [vmem:[%s6932_s13 + $0x368] sm:$0xff]   ;;  %v3198_v4 = vmul.bf16 1061961548, %v3182_v23 }
0x1a86   :  { %5037 = vmatpush3.bf16.msra.mxu0 %v5475_v19  ;;  %v5624_v46 = vpop.eup %5623  ;;  %v3226_v3 = vadd.bf16 1065369472, %v5622_v28 }
0x1a87   :  { %5038 = vmatprep.subr.bf16.mxu0 %v5477_v9  ;;  %v5626_v60 = vpop.eup %5625  ;;  %v3231_v41 = vadd.bf16 1065369472, %v5624_v46  ;;  %v3184_v9 = vadd.bf16 %v3168_v55, %v6773_v48  ;;  %5629 = vtanh.bf16 %v3198_v4  ;;  %v5528_v46 = vld [vmem:[%s6932_s13 + $0x380] sm:$0xff]  }
0x1a88   :  { %5059 = vmatpush3.bf16.msra.mxu1 %v5476_v25  ;;  %v5628_v52 = vpop.eup %5627  ;;  %v3228_v12 = vadd.bf16 1065369472, %v5626_v60  ;;  %v3242_v54 = vmul.bf16 %v3226_v3, %v3114_v53  ;;  %v5506_v25 = vld [vmem:[%s6932_s13 + $0x3e8] sm:$0xff]  }
0x1a89   :  { %5060 = vmatprep.subr.bf16.mxu1 %v5478_v14  ;;  %v3233_v63 = vadd.bf16 1065369472, %v5628_v52  ;;  %v3247_v0 = vmul.bf16 %v3231_v41, %v3119_v16  ;;  %v5507_v14 = vld [vmem:[%s6932_s13 + $0x328] sm:$0xff]  }
0x1a8a   :  { %5039 = vmatpush3.bf16.msra.mxu0 %v5479_v15  ;;  %v3244_v61 = vmul.bf16 %v3228_v12, %v3116_v58  ;;  %v3200_v15 = vmul.bf16 1061961548, %v3184_v9 }
0x1a8b   :  { %5040 = vmatprep.subr.bf16.mxu0 %v5481_v27  ;;  %v3249_v19 = vmul.bf16 %v3233_v63, %v3121_v37  ;;  %v5508_v27 = vld [vmem:[%s6932_s13 + $0x3a8] sm:$0xff]  }
0x1a8c   :  { %5061 = vmatpush3.bf16.msra.mxu1 %v5480_v20  ;;  %v5511_v20 = vld [vmem:[%s6932_s13 + $0x320] sm:$0xff]   ;;  %5631 = vtanh.bf16 %v3200_v15 }
0x1a8d   :  { %5062 = vmatprep.subr.bf16.mxu1 %v5482_v26  ;;  %v5513_v26 = vld [vmem:[%s6932_s13 + $0x358] sm:$0xff]  }
0x1a8e   :  { %5041 = vmatpush3.bf16.msra.mxu0 %v5483_v47  ;;  %v5514_v47 = vld [vmem:[%s6932_s13 + $0x3d8] sm:$0xff]  }
0x1a8f   :  { %5042 = vmatprep.subr.bf16.mxu0 %v5485_v62  ;;  %v5515_v62 = vld [vmem:[%s6932_s13 + $0x318] sm:$0xff]  }
0x1a90   :  { %5063 = vmatpush3.bf16.msra.mxu1 %v5484_v38  ;;  %v5518_v38 = vld [vmem:[%s6932_s13 + $0x3d0] sm:$0xff]  }
0x1a91   :  { %5064 = vmatprep.subr.bf16.mxu1 %v5486_v33  ;;  %v5519_v33 = vld [vmem:[%s6932_s13 + $0x310] sm:$0xff]  }
0x1a92   :  { %5043 = vmatpush3.bf16.msra.mxu0 %v5487_v49  ;;  %v5520_v49 = vld [vmem:[%s6932_s13 + $0x390] sm:$0xff]  }
0x1a93   :  { %5044 = vmatprep.subr.bf16.mxu0 %v5489_v40  ;;  %v5522_v40 = vld [vmem:[%s6932_s13 + $0x3c8] sm:$0xff]  }
0x1a94   :  { %5065 = vmatpush3.bf16.msra.mxu1 %v5488_v50  ;;  %v5523_v50 = vld [vmem:[%s6932_s13 + $0x308] sm:$0xff]  }
0x1a95   :  { %5066 = vmatprep.subr.bf16.mxu1 %v5490_v1  ;;  %v5525_v1 = vld [vmem:[%s6932_s13 + $0x340] sm:$0xff]   ;;  %v5630_v6 = vpop.eup %5629 }
0x1a96   :  { %5045 = vmatpush3.bf16.msra.mxu0 %v5491_v32  ;;  %v5524_v32 = vld [vmem:[%s6932_s13 + $0x388] sm:$0xff]  }
0x1a97   :  { %5046 = vmatprep.subr.bf16.mxu0 %v5493_v36  ;;  %v5526_v36 = vld [vmem:[%s6932_s13 + $0x3c0] sm:$0xff]  }
0x1a98   :  { %5067 = vmatpush3.bf16.msra.mxu1 %v5492_v59  ;;  %v3230_v59 = vadd.bf16 1065369472, %v5630_v6 }
0x1a99   :  { %5068 = vmatprep.subr.bf16.mxu1 %v5494_v57  ;;  %v3118_v57 = vmul.bf16 1056980736, %v6765_v43 }
0x1a9a   :  { %5047 = vmatpush3.bf16.msra.mxu0 %v5495_v21  ;;  %v5632_v28 = vpop.eup %5631  ;;  %v3120_v21 = vmul.bf16 1056980736, %v6773_v48 }
0x1a9b   :  { %5076 = vmatprep.subr.bf16.mxu0 %v5497_v31  ;;  %v3232_v60 = vadd.bf16 1065369472, %v5632_v28  ;;  %v3246_v45 = vmul.bf16 %v3230_v59, %v3118_v57 }
0x1a9c   :  { %5069 = vmatpush3.bf16.msra.mxu1 %v5496_v51 }
0x1a9d   :  { %4478 = vmatmul.mubr.bf16.vlgmr.msra.gmra.mxu0 %v3242_v54  ;;  %5098 = vmatprep.subr.bf16.mxu1 %v5498_v22  ;;  %v3248_v52 = vmul.bf16 %v3232_v60, %v3120_v21 }
0x1a9e   :  { %5077 = vmatpush3.bf16.msra.mxu0 %v5499_v44  ;;  %4559 = vmatprep.mubr.bf16.mxu0 %v3247_v0 }
0x1a9f   :  { %4519 = vmatmul.mubr.bf16.vlgmr.msra.gmra.mxu1 %v3244_v61  ;;  %5078 = vmatprep.subr.bf16.mxu0 %v5501_v2  ;;  %v4729_v2 = vld [vmem:[%s6933_s14] ss:$0 sm:$0xff]  ;;  %s5675_s14 = smov [#allocation2]  }
0x1aa0   :  { %5099 = vmatpush3.bf16.msra.mxu1 %v5500_v18  ;;  %4600 = vmatprep.mubr.bf16.mxu1 %v3249_v19  ;;  %s4618_s30 = sshll.u32 %s5675_s14, 4  ;;  %s4619_s30 = int_to_ptr.vmem [resolvable:$true] %s4618_s30 }
0x1aa1   :  { %5100 = vmatprep.subr.bf16.mxu1 %v5502_v7  ;;  %s5635_s16 = scalar_lea.vmem %s4619_s30, 256  ;;  %p5640_p1 = scmp.lt.s32.totalorder %s4619_s30, %s4619_s30 }
0x1aa2   :  { %5079 = vmatpush3.bf16.msra.mxu0 %v5503_v8  ;;  %p5636_p0 = scmp.ne.s32.totalorder %s4619_s30, %s5635_s16  ;;  %p5641_p2 = scmp.lt.s32.totalorder %s5635_s16, %s5635_s16 }
0x1aa3   :  { %5080 = vmatprep.subr.bf16.mxu0 %v5505_v24 }
0x1aa4   :  { %5101 = vmatpush3.bf16.msra.mxu1 %v5504_v10  ;;  %p5642_p3 = por %p5641_p2, %p5640_p1 }
0x1aa5   :  { %5102 = vmatprep.subr.bf16.mxu1 %v5506_v25 }
0x1aa6   :  { %5081 = vmatpush3.bf16.msra.mxu0 %v5507_v14  ;;  %p5643_p4 = pnand %p5642_p3, %p5636_p0 }
0x1aa7   :  { %5082 = vmatprep.subr.bf16.mxu0 %v5509_v42 }
0x1aa8   :  { %5103 = vmatpush3.bf16.msra.mxu1 %v5508_v27 }
0x1aa9   :  { %5104 = vmatprep.subr.bf16.mxu1 %v5510_v17 }
0x1aaa   :  { %5083 = vmatpush3.bf16.msra.mxu0 %v5511_v20 }
0x1aab   :  { %5084 = vmatprep.subr.bf16.mxu0 %v5513_v26 }
0x1aac   :  { %5105 = vmatpush3.bf16.msra.mxu1 %v5512_v29 }
0x1aad   :  { %5106 = vmatprep.subr.bf16.mxu1 %v5514_v47 }
0x1aae   :  { %5085 = vmatpush3.bf16.msra.mxu0 %v5515_v62 }
0x1aaf   :  { %5086 = vmatprep.subr.bf16.mxu0 %v5517_v39 }
0x1ab0   :  { %5107 = vmatpush3.bf16.msra.mxu1 %v5516_v30 }
0x1ab1   :  { %5108 = vmatprep.subr.bf16.mxu1 %v5518_v38 }
0x1ab2   :  { %5087 = vmatpush3.bf16.msra.mxu0 %v5519_v33 }
0x1ab3   :  { %5088 = vmatprep.subr.bf16.mxu0 %v5521_v35 }
0x1ab4   :  { %5109 = vmatpush3.bf16.msra.mxu1 %v5520_v49 }
0x1ab5   :  { %5110 = vmatprep.subr.bf16.mxu1 %v5522_v40 }
0x1ab6   :  { %5089 = vmatpush3.bf16.msra.mxu0 %v5523_v50 }
0x1ab7   :  { %5090 = vmatprep.subr.bf16.mxu0 %v5525_v1 }
0x1ab8   :  { %5111 = vmatpush3.bf16.msra.mxu1 %v5524_v32 }
0x1ab9   :  { %5112 = vmatprep.subr.bf16.mxu1 %v5526_v36 }
0x1aba   :  { %5091 = vmatpush3.bf16.msra.mxu0 %v5527_v56 }
0x1abc   :  { %5113 = vmatpush3.bf16.msra.mxu1 %v5528_v46 }
0x1abd   :  { %4560 = vmatmul.mubr.bf16.vlgmr.msra.gmra.mxu0 %v3246_v45 }
0x1abf   :  { %4601 = vmatmul.mubr.bf16.vlgmr.msra.gmra.mxu1 %v3248_v52 }
0x1b1d   :  { %v4960_v3 = vpop.f32.mrf.mxu0 }
0x1b1e   :  { %v4982_v31 = vpop.f32.mrf.mxu1 }
0x1b1f   :  { %v4961_v34 = vpop.f32.mrf.mxu0 }
0x1b20   :  { %v4983_v51 = vpop.f32.mrf.mxu1  ;;  %v4962_v48 = vadd.f32 %v4961_v34, %v4960_v3 }
0x1b21   :  { %v4963_v41 = vpop.f32.mrf.mxu0  ;;  %v4984_v23 = vadd.f32 %v4983_v51, %v4982_v31 }
0x1b22   :  { %v4985_v53 = vpop.f32.mrf.mxu1  ;;  %v4316_v18 = vadd.f32 %v4962_v48, %v4729_v2 }
0x1b23   :  { %v4964_v12 = vpop.f32.mrf.mxu0 }
0x1b24   :  { %v4986_v13 = vpop.f32.mrf.mxu1  ;;  %v4965_v37 = vadd.f32 %v4964_v12, %v4963_v41  ;;  %v4357_v8 = vadd.f32 %v4984_v23, %v4316_v18 }
0x1b25   :  { %v4987_v25 = vadd.f32 %v4986_v13, %v4985_v53 }
0x1b26   :  { %v4319_v24 = vadd.f32 %v4965_v37, %v4729_v2 }
0x1b28   :  { %v4360_v42 = vadd.f32 %v4987_v25, %v4319_v24 }
0x1b3d   :  { %v5004_v22 = vpop.f32.mrf.mxu0 }
0x1b3f   :  { %v5026_v44 = vpop.f32.mrf.mxu1  ;;  %v5005_v43 = vpop.f32.mrf.mxu0 }
0x1b40   :  { %v5006_v19 = vadd.f32 %v5005_v43, %v5004_v22 }
0x1b41   :  { %v5027_v16 = vpop.f32.mrf.mxu1  ;;  %v5007_v63 = vpop.f32.mrf.mxu0 }
0x1b42   :  { %v4398_v4 = vadd.f32 %v5006_v19, %v4357_v8  ;;  %v5028_v15 = vadd.f32 %v5027_v16, %v5026_v44 }
0x1b43   :  { %v5029_v54 = vpop.f32.mrf.mxu1  ;;  %v5008_v58 = vpop.f32.mrf.mxu0 }
0x1b44   :  { %v5009_v14 = vadd.f32 %v5008_v58, %v5007_v63  ;;  %v4439_v26 = vadd.f32 %v5028_v15, %v4398_v4 }
0x1b45   :  { %v5030_v0 = vpop.f32.mrf.mxu1 }
0x1b46   :  { %v4401_v29 = vadd.f32 %v5009_v14, %v4360_v42  ;;  %v5031_v47 = vadd.f32 %v5030_v0, %v5029_v54 }
0x1b48   :  { %v4442_v33 = vadd.f32 %v5031_v47, %v4401_v29 }
0x1b5d   :  { %v5048_v55 = vpop.f32.mrf.mxu0 }
0x1b5f   :  { %v5070_v61 = vpop.f32.mrf.mxu1  ;;  %v5049_v7 = vpop.f32.mrf.mxu0 }
0x1b60   :  { %v5050_v27 = vadd.f32 %v5049_v7, %v5048_v55 }
0x1b61   :  { %v5071_v9 = vpop.f32.mrf.mxu1  ;;  %v5051_v10 = vpop.f32.mrf.mxu0 }
0x1b62   :  { %v4480_v62 = vadd.f32 %v5050_v27, %v4439_v26  ;;  %v5072_v35 = vadd.f32 %v5071_v9, %v5070_v61 }
0x1b63   :  { %v5073_v17 = vpop.f32.mrf.mxu1  ;;  %v5052_v20 = vpop.f32.mrf.mxu0 }
0x1b64   :  { %v5053_v39 = vadd.f32 %v5052_v20, %v5051_v10  ;;  %v4521_v50 = vadd.f32 %v5072_v35, %v4480_v62 }
0x1b65   :  { %v5074_v30 = vpop.f32.mrf.mxu1 }
0x1b66   :  { %v4483_v1 = vadd.f32 %v5053_v39, %v4442_v33  ;;  %v5075_v28 = vadd.f32 %v5074_v30, %v5073_v17 }
0x1b68   :  { %v4524_v60 = vadd.f32 %v5075_v28, %v4483_v1 }
0x1b7d   :  { %v5092_v38 = vpop.f32.mrf.mxu0 }
0x1b7f   :  { %v5114_v49 = vpop.f32.mrf.mxu1  ;;  %v5093_v40 = vpop.f32.mrf.mxu0 }
0x1b80   :  { %v5094_v6 = vadd.f32 %v5093_v40, %v5092_v38 }
0x1b81   :  { %v5115_v32 = vpop.f32.mrf.mxu1  ;;  %v5095_v36 = vpop.f32.mrf.mxu0 }
0x1b82   :  { %v4562_v56 = vadd.f32 %v5094_v6, %v4521_v50  ;;  %v5116_v59 = vadd.f32 %v5115_v32, %v5114_v49 }
0x1b83   :  { %v5117_v46 = vpop.f32.mrf.mxu1  ;;  %v5096_v57 = vpop.f32.mrf.mxu0 }
0x1b84   :  { %v4603_v45 = vadd.f32 %v5116_v59, %v4562_v56  ;;  %v5097_v21 = vadd.f32 %v5096_v57, %v5095_v36 }
0x1b85   :  { %v5118_v52 = vpop.f32.mrf.mxu1 }
0x1b86   :  { %v4609_v3 = vadd.f32 %v4603_v45, %v6171_v5  ;;  %v4565_v31 = vadd.f32 %v5097_v21, %v4524_v60  ;;  %v5119_v34 = vadd.f32 %v5118_v52, %v5117_v46 }
0x1b88   :  { %4611 = vst.msk [vmem:[#allocation2] sm:$0xff] %vm60_vm0, %v4609_v3  ;;  %v4606_v51 = vadd.f32 %v5119_v34, %v4565_v31 }
0x1b8a   :  { %v4610_v41 = vadd.f32 %v4606_v51, %v6178_v11 }
0x1b8c   :  { %4612 = vst.msk [vmem:[#allocation2 + $0x8] sm:$0xff] %vm60_vm0, %v4610_v41 }
0x1b8d   :  { %5646 = shalt.err (!%p5643_p4)
}
0x1b8e   :  { %s5676_s1 = smov 128   ;;  %s5677_s17 = smov 8  }
0x1b8f   :  { %4624 = dma.vmem_to_hbm [thread:$0]  %s4619_s30, 256, %s6934_s15, [#allocation3], %s5676_s1, %s5676_s1, %s5677_s17  }
0x1b90   :  { %5655 = dma.done.wait [#allocation3], 256  }
0x1b91   :  { %5656 = vsyncadd [#allocation3], 4294967040 }
0x1b92   :  { %4628 = vsyncpa [#allocation3], 1 }

</bundles_post_ra>
